<compile_context>
chip_gen: v7x
topology: tpu7x:2x2x1
jax: 0.10.0
libtpu: 0.0.40
codegen_flags: <defaults>
</compile_context>

<pallas_src>
import functools

import jax
import jax.numpy as jnp
from jax.experimental import pallas as pl
from jax.experimental.pallas import tpu as pltpu


# ----------------------------------------------------------------------------
# Fused Pallas kernel: (bf16 A @ bf16 B) + f32 bias + gelu_nf, single pass
# ----------------------------------------------------------------------------
def _erf_approx_f32(x):
  # Abramowitz & Stegun 7.1.26 (max abs error ~1.5e-7; float32-level accuracy).
  # Avoids depending on an erf primitive lowering inside Mosaic.
  a1, a2, a3, a4, a5 = (0.254829592, -0.284496736, 1.421413741,
                        -1.453152027, 1.061405429)
  p = 0.3275911
  z = jnp.abs(x)
  t = 1.0 / (1.0 + p * z)
  poly = ((((a5 * t + a4) * t + a3) * t + a2) * t + a1) * t
  y = 1.0 - poly * jnp.exp(-z * z)
  return jnp.where(x >= 0.0, y, -y)


def _gelu_nf_f32(x):
  # F.gelu (exact, erf-based) * 1.7015043497085571, computed in f32.
  return 0.5 * x * (1.0 + _erf_approx_f32(x * 0.7071067811865476)) \
      * 1.7015043497085571


def _mm_bias_act_kernel(a_ref, b_ref, bias_ref, o_ref, *, activation):
  # Single K tile / single N tile: one MXU dot per program, f32 accumulate.
  acc = jnp.dot(a_ref[...], b_ref[...], preferred_element_type=jnp.float32)
  acc = acc + bias_ref[...]              # f32 epilogue (fast path on v5e too)
  if activation == "gelu_nf":
    acc = _gelu_nf_f32(acc)
  o_ref[...] = acc.astype(o_ref.dtype)


def _pick_tm(M):
  # Big tiles to amortize the ~0.35us/step overhead, but keep >=2 M blocks
  # when M is large so both v7x TensorCores get work on the "parallel" axis.
  if M >= 1024:
    return 512
  if M > 256:
    return 256
  return M  # full-dim block (always legal)


def matmul_bias_act(a, b, bias, *, activation=None, out_dtype=jnp.float32):
  """out = act(a @ b + bias).  a:(M,K), b:(K,N), bias:(N,)."""
  M, K = a.shape
  N = b.shape[1]
  # All ModelInjection GEMMs have K <= 2048 and N <= 512: keep K and N as
  # single full VMEM tiles.  TODO(synk): add a K-tiled accumulator path if this
  # kernel is reused with much larger K.
  a = a.astype(jnp.bfloat16)
  b = b.astype(jnp.bfloat16)
  bias = bias.astype(jnp.float32).reshape(1, N)

  tm = _pick_tm(M)
  grid_m = pl.cdiv(M, tm)

  return pl.pallas_call(
      functools.partial(_mm_bias_act_kernel, activation=activation),
      out_shape=jax.ShapeDtypeStruct((M, N), out_dtype),
      grid_spec=pltpu.PrefetchScalarGridSpec(
          num_scalar_prefetch=0,
          grid=(grid_m,),
          in_specs=[
              pl.BlockSpec((tm, K), lambda i: (i, 0)),   # A: M tiled, full K
              pl.BlockSpec((K, N), lambda i: (0, 0)),    # B: resident
              pl.BlockSpec((1, N), lambda i: (0, 0)),    # bias: resident
          ],
          out_specs=pl.BlockSpec((tm, N), lambda i: (i, 0)),
      ),
      compiler_params=pltpu.CompilerParams(
          dimension_semantics=("parallel",)),
  )(a, b, bias)


# ----------------------------------------------------------------------------
# ScaledWSConv2d: weight standardization (tiny, plain JAX) + im2col + kernel
# ----------------------------------------------------------------------------
def _standardize_conv_w(w, gain, eps=1e-4):
  # w: (C_out, C_in, kh, kw); torch.var default is unbiased -> ddof=1.
  fan_in = w.shape[1] * w.shape[2] * w.shape[3]
  mean = jnp.mean(w, axis=(1, 2, 3), keepdims=True)
  var = jnp.var(w, axis=(1, 2, 3), keepdims=True, ddof=1)
  w = (w - mean) / jnp.sqrt(var * fan_in + eps)
  return w * gain


def _im2col(x, kh, kw, stride):
  # x: (B, H, W, C) -> (B*Ho*Wo, kh*kw*C); K order = (kh, kw, C_in).
  B, H, W, C = x.shape
  Ho = (H - kh) // stride + 1
  Wo = (W - kw) // stride + 1
  cols = []
  for i in range(kh):
    for j in range(kw):
      cols.append(x[:, i:i + stride * (Ho - 1) + 1:stride,
                    j:j + stride * (Wo - 1) + 1:stride, :])
  cols = jnp.concatenate(cols, axis=-1)
  return cols.reshape(B * Ho * Wo, kh * kw * C), (B, Ho, Wo)


def ws_conv2d(x, p, *, stride=1, reflect_pad=0, activation="gelu_nf",
              out_dtype=jnp.bfloat16):
  if reflect_pad:
    x = jnp.pad(x, ((0, 0), (reflect_pad,) * 2, (reflect_pad,) * 2, (0, 0)),
                mode="reflect")
  w = _standardize_conv_w(p["w"], p["gain"])          # f32, tiny
  c_out, c_in, kh, kw = w.shape
  # Cast activations to bf16 BEFORE im2col so the replicated cols buffer is
  # half the bytes (partial mitigation of im2col HBM amplification).
  a, (B, Ho, Wo) = _im2col(x.astype(jnp.bfloat16), kh, kw, stride)
  wmat = jnp.transpose(w, (2, 3, 1, 0)).reshape(kh * kw * c_in, c_out)
  out = matmul_bias_act(a, wmat, p["b"], activation=activation,
                        out_dtype=out_dtype)
  return out.reshape(B, Ho, Wo, c_out)


# ----------------------------------------------------------------------------
# ModelInjection forward (NHWC)
# ----------------------------------------------------------------------------
def model_injection_forward(x, params):
  """x: (B, H, W, 4) NHWC -> [h] with h: (B, H/4, W/4, planes), f32."""
  h = ws_conv2d(x, params["stem"], stride=1, reflect_pad=1)   # 3x3, pad refl 1
  h = ws_conv2d(h, params["l1"], stride=2, reflect_pad=1)     # 4x4 s2
  h = ws_conv2d(h, params["l2"], stride=2, reflect_pad=1)     # 4x4 s2
  h = ws_conv2d(h, params["proj"], stride=1, reflect_pad=0,   # 1x1
                out_dtype=jnp.float32)
  return [h]


# ----------------------------------------------------------------------------
# Deterministic parameter initialization (synthetic; no checkpoint load)
# ----------------------------------------------------------------------------
def init_params(key, planes=32):
  ks = jax.random.split(key, 4)

  def conv(k, c_out, c_in, kh, kw):
    k1, k2 = jax.random.split(k)
    return dict(
        w=jax.random.normal(k1, (c_out, c_in, kh, kw), jnp.float32) * 0.1,
        b=jax.random.normal(k2, (c_out,), jnp.float32) * 0.01,
        gain=jnp.ones((c_out, 1, 1, 1), jnp.float32))

  return dict(
      stem=conv(ks[0], 64, 4, 3, 3),
      l1=conv(ks[1], 128, 64, 4, 4),
      l2=conv(ks[2], 256, 128, 4, 4),
      proj=conv(ks[3], planes, 256, 1, 1))


if __name__ == "__main__":
  cfg = {"planes": 32}                 # small config (cfg.get('planes', 512))
  B, H, W = 2, 16, 16                  # torch input (2, 4, 16, 16) in NCHW

  key = jax.random.PRNGKey(0)
  kx, kp = jax.random.split(key)
  x = jax.random.normal(kx, (B, H, W, 4), jnp.float32)   # NHWC
  params = init_params(kp, planes=cfg["planes"])

  fwd = jax.jit(model_injection_forward)
  out = fwd(x, params)
  jax.block_until_ready(out)

  h = out[0]
  assert h.shape == (B, H // 4, W // 4, cfg["planes"]), h.shape
  assert h.dtype == jnp.float32
  assert bool(jnp.all(jnp.isfinite(h)))
  print("KERNEL_OK")
</pallas_src>

<mosaic_0001>
module attributes {stable_mosaic.version = 11 : i64} {
  func.func @_mm_bias_act_kernel(%arg0: i32, %arg1: memref<256x36xbf16, #tpu.memory_space<vmem>>, %arg2: memref<36x64xbf16, #tpu.memory_space<vmem>>, %arg3: memref<1x64xf32, #tpu.memory_space<vmem>>, %arg4: memref<256x64xbf16, #tpu.memory_space<vmem>>) attributes {dimension_semantics = [#tpu.dimension_semantics<parallel>], iteration_bounds = array<i64: 2>, scalar_prefetch = 0 : i64, scratch_operands = 0 : i64, tpu.core_type = #tpu.core_type<tc>, window_params = [{transform_indices = @transform_0, window_bounds = array<i64: 256, 36>}, {pipeline_mode = #tpu.pipeline_mode<synchronous>, transform_indices = @transform_1, window_bounds = array<i64: 36, 64>}, {pipeline_mode = #tpu.pipeline_mode<synchronous>, transform_indices = @transform_2, window_bounds = array<i64: 1, 64>}, {transform_indices = @transform_3, window_bounds = array<i64: 256, 64>}]} {
    %c0 = arith.constant 0 : index
    %c0_0 = arith.constant 0 : index
    %0 = vector.load %arg1[%c0, %c0_0] : memref<256x36xbf16, #tpu.memory_space<vmem>>, vector<256x36xbf16>
    %c0_1 = arith.constant 0 : index
    %c0_2 = arith.constant 0 : index
    %1 = vector.load %arg2[%c0_1, %c0_2] : memref<36x64xbf16, #tpu.memory_space<vmem>>, vector<36x64xbf16>
    %cst = arith.constant dense<0.000000e+00> : vector<256x64xf32>
    %2 = tpu.matmul %0, %1, %cst {dimension_numbers = #tpu.dot_dimension_numbers<[1], [0], [0], [1], [0, 0, 1, 1], [], []>} : vector<256x36xbf16>, vector<36x64xbf16>, vector<256x64xf32> -> vector<256x64xf32>
    %c0_3 = arith.constant 0 : index
    %c0_4 = arith.constant 0 : index
    %3 = vector.load %arg3[%c0_3, %c0_4] : memref<1x64xf32, #tpu.memory_space<vmem>>, vector<1x64xf32>
    %4 = vector.broadcast %3 : vector<1x64xf32> to vector<256x64xf32>
    %5 = arith.addf %2, %4 : vector<256x64xf32>
    %cst_5 = arith.constant 5.000000e-01 : f32
    %6 = vector.broadcast %cst_5 : f32 to vector<256x64xf32>
    %7 = arith.mulf %6, %5 : vector<256x64xf32>
    %cst_6 = arith.constant 0.707106769 : f32
    %8 = vector.broadcast %cst_6 : f32 to vector<256x64xf32>
    %9 = arith.mulf %5, %8 : vector<256x64xf32>
    %10 = math.absf %9 : vector<256x64xf32>
    %cst_7 = arith.constant 0.327591091 : f32
    %11 = vector.broadcast %cst_7 : f32 to vector<256x64xf32>
    %12 = arith.mulf %11, %10 : vector<256x64xf32>
    %cst_8 = arith.constant 1.000000e+00 : f32
    %13 = vector.broadcast %cst_8 : f32 to vector<256x64xf32>
    %14 = arith.addf %13, %12 : vector<256x64xf32>
    %cst_9 = arith.constant 1.000000e+00 : f32
    %15 = vector.broadcast %cst_9 : f32 to vector<256x64xf32>
    %16 = arith.divf %15, %14 : vector<256x64xf32>
    %cst_10 = arith.constant 1.06140542 : f32
    %17 = vector.broadcast %cst_10 : f32 to vector<256x64xf32>
    %18 = arith.mulf %17, %16 : vector<256x64xf32>
    %cst_11 = arith.constant -1.45315206 : f32
    %19 = vector.broadcast %cst_11 : f32 to vector<256x64xf32>
    %20 = arith.addf %18, %19 : vector<256x64xf32>
    %21 = arith.mulf %20, %16 : vector<256x64xf32>
    %cst_12 = arith.constant 1.42141378 : f32
    %22 = vector.broadcast %cst_12 : f32 to vector<256x64xf32>
    %23 = arith.addf %21, %22 : vector<256x64xf32>
    %24 = arith.mulf %23, %16 : vector<256x64xf32>
    %cst_13 = arith.constant -0.284496725 : f32
    %25 = vector.broadcast %cst_13 : f32 to vector<256x64xf32>
    %26 = arith.addf %24, %25 : vector<256x64xf32>
    %27 = arith.mulf %26, %16 : vector<256x64xf32>
    %cst_14 = arith.constant 0.254829586 : f32
    %28 = vector.broadcast %cst_14 : f32 to vector<256x64xf32>
    %29 = arith.addf %27, %28 : vector<256x64xf32>
    %30 = arith.mulf %29, %16 : vector<256x64xf32>
    %cst_15 = arith.constant 0.000000e+00 : f32
    %31 = vector.broadcast %cst_15 : f32 to vector<256x64xf32>
    %32 = arith.subf %31, %10 : vector<256x64xf32>
    %33 = arith.mulf %32, %10 : vector<256x64xf32>
    %34 = math.exp %33 : vector<256x64xf32>
    %35 = arith.mulf %30, %34 : vector<256x64xf32>
    %cst_16 = arith.constant 1.000000e+00 : f32
    %36 = vector.broadcast %cst_16 : f32 to vector<256x64xf32>
    %37 = arith.subf %36, %35 : vector<256x64xf32>
    %cst_17 = arith.constant 0.000000e+00 : f32
    %38 = vector.broadcast %cst_17 : f32 to vector<256x64xf32>
    %39 = arith.cmpf oge, %9, %38 : vector<256x64xf32>
    %cst_18 = arith.constant 0.000000e+00 : f32
    %40 = vector.broadcast %cst_18 : f32 to vector<256x64xf32>
    %41 = arith.subf %40, %37 : vector<256x64xf32>
    %42 = arith.select %39, %37, %41 : vector<256x64xi1>, vector<256x64xf32>
    %cst_19 = arith.constant 1.000000e+00 : f32
    %43 = vector.broadcast %cst_19 : f32 to vector<256x64xf32>
    %44 = arith.addf %43, %42 : vector<256x64xf32>
    %45 = arith.mulf %7, %44 : vector<256x64xf32>
    %cst_20 = arith.constant 1.70150435 : f32
    %46 = vector.broadcast %cst_20 : f32 to vector<256x64xf32>
    %47 = arith.mulf %45, %46 : vector<256x64xf32>
    %48 = arith.truncf %47 : vector<256x64xf32> to vector<256x64xbf16>
    %c0_21 = arith.constant 0 : index
    %c0_22 = arith.constant 0 : index
    %49 = vector.load %arg4[%c0_21, %c0_22] : memref<256x64xbf16, #tpu.memory_space<vmem>>, vector<256x64xbf16>
    tpu.vector_store %arg4[%c0_21, %c0_22], %48 {strides = array<i32>} : memref<256x64xbf16, #tpu.memory_space<vmem>>, vector<256x64xbf16>,
    return
  }
  func.func @transform_0(%arg0: i32) -> (i32, i32) {
    %c0_i32 = arith.constant 0 : i32
    %c0_i32_0 = arith.constant 0 : i32
    return %arg0, %c0_i32 : i32, i32
  }
  func.func @transform_1(%arg0: i32) -> (i32, i32) {
    %c0_i32 = arith.constant 0 : i32
    %c0_i32_0 = arith.constant 0 : i32
    %c0_i32_1 = arith.constant 0 : i32
    return %c0_i32, %c0_i32_0 : i32, i32
  }
  func.func @transform_2(%arg0: i32) -> (i32, i32) {
    %c0_i32 = arith.constant 0 : i32
    %c0_i32_0 = arith.constant 0 : i32
    %c0_i32_1 = arith.constant 0 : i32
    return %c0_i32, %c0_i32_0 : i32, i32
  }
  func.func @transform_3(%arg0: i32) -> (i32, i32) {
    %c0_i32 = arith.constant 0 : i32
    %c0_i32_0 = arith.constant 0 : i32
    return %arg0, %c0_i32 : i32, i32
  }
}

module attributes {stable_mosaic.version = 11 : i64} {
  func.func @_mm_bias_act_kernel(%arg0: i32, %arg1: memref<128x1024xbf16, #tpu.memory_space<vmem>>, %arg2: memref<1024x128xbf16, #tpu.memory_space<vmem>>, %arg3: memref<1x128xf32, #tpu.memory_space<vmem>>, %arg4: memref<128x128xbf16, #tpu.memory_space<vmem>>) attributes {dimension_semantics = [#tpu.dimension_semantics<parallel>], iteration_bounds = array<i64: 1>, scalar_prefetch = 0 : i64, scratch_operands = 0 : i64, tpu.core_type = #tpu.core_type<tc>, window_params = [{transform_indices = @transform_0, window_bounds = array<i64: 128, 1024>}, {pipeline_mode = #tpu.pipeline_mode<synchronous>, transform_indices = @transform_1, window_bounds = array<i64: 1024, 128>}, {pipeline_mode = #tpu.pipeline_mode<synchronous>, transform_indices = @transform_2, window_bounds = array<i64: 1, 128>}, {transform_indices = @transform_3, window_bounds = array<i64: 128, 128>}]} {
    %c0 = arith.constant 0 : index
    %c0_0 = arith.constant 0 : index
    %0 = vector.load %arg1[%c0, %c0_0] : memref<128x1024xbf16, #tpu.memory_space<vmem>>, vector<128x1024xbf16>
    %c0_1 = arith.constant 0 : index
    %c0_2 = arith.constant 0 : index
    %1 = vector.load %arg2[%c0_1, %c0_2] : memref<1024x128xbf16, #tpu.memory_space<vmem>>, vector<1024x128xbf16>
    %cst = arith.constant dense<0.000000e+00> : vector<128x128xf32>
    %2 = tpu.matmul %0, %1, %cst {dimension_numbers = #tpu.dot_dimension_numbers<[1], [0], [0], [1], [0, 0, 1, 1], [], []>} : vector<128x1024xbf16>, vector<1024x128xbf16>, vector<128x128xf32> -> vector<128x128xf32>
    %c0_3 = arith.constant 0 : index
    %c0_4 = arith.constant 0 : index
    %3 = vector.load %arg3[%c0_3, %c0_4] : memref<1x128xf32, #tpu.memory_space<vmem>>, vector<1x128xf32>
    %4 = vector.broadcast %3 : vector<1x128xf32> to vector<128x128xf32>
    %5 = arith.addf %2, %4 : vector<128x128xf32>
    %cst_5 = arith.constant 5.000000e-01 : f32
    %6 = vector.broadcast %cst_5 : f32 to vector<128x128xf32>
    %7 = arith.mulf %6, %5 : vector<128x128xf32>
    %cst_6 = arith.constant 0.707106769 : f32
    %8 = vector.broadcast %cst_6 : f32 to vector<128x128xf32>
    %9 = arith.mulf %5, %8 : vector<128x128xf32>
    %10 = math.absf %9 : vector<128x128xf32>
    %cst_7 = arith.constant 0.327591091 : f32
    %11 = vector.broadcast %cst_7 : f32 to vector<128x128xf32>
    %12 = arith.mulf %11, %10 : vector<128x128xf32>
    %cst_8 = arith.constant 1.000000e+00 : f32
    %13 = vector.broadcast %cst_8 : f32 to vector<128x128xf32>
    %14 = arith.addf %13, %12 : vector<128x128xf32>
    %cst_9 = arith.constant 1.000000e+00 : f32
    %15 = vector.broadcast %cst_9 : f32 to vector<128x128xf32>
    %16 = arith.divf %15, %14 : vector<128x128xf32>
    %cst_10 = arith.constant 1.06140542 : f32
    %17 = vector.broadcast %cst_10 : f32 to vector<128x128xf32>
    %18 = arith.mulf %17, %16 : vector<128x128xf32>
    %cst_11 = arith.constant -1.45315206 : f32
    %19 = vector.broadcast %cst_11 : f32 to vector<128x128xf32>
    %20 = arith.addf %18, %19 : vector<128x128xf32>
    %21 = arith.mulf %20, %16 : vector<128x128xf32>
    %cst_12 = arith.constant 1.42141378 : f32
    %22 = vector.broadcast %cst_12 : f32 to vector<128x128xf32>
    %23 = arith.addf %21, %22 : vector<128x128xf32>
    %24 = arith.mulf %23, %16 : vector<128x128xf32>
    %cst_13 = arith.constant -0.284496725 : f32
    %25 = vector.broadcast %cst_13 : f32 to vector<128x128xf32>
    %26 = arith.addf %24, %25 : vector<128x128xf32>
    %27 = arith.mulf %26, %16 : vector<128x128xf32>
    %cst_14 = arith.constant 0.254829586 : f32
    %28 = vector.broadcast %cst_14 : f32 to vector<128x128xf32>
    %29 = arith.addf %27, %28 : vector<128x128xf32>
    %30 = arith.mulf %29, %16 : vector<128x128xf32>
    %cst_15 = arith.constant 0.000000e+00 : f32
    %31 = vector.broadcast %cst_15 : f32 to vector<128x128xf32>
    %32 = arith.subf %31, %10 : vector<128x128xf32>
    %33 = arith.mulf %32, %10 : vector<128x128xf32>
    %34 = math.exp %33 : vector<128x128xf32>
    %35 = arith.mulf %30, %34 : vector<128x128xf32>
    %cst_16 = arith.constant 1.000000e+00 : f32
    %36 = vector.broadcast %cst_16 : f32 to vector<128x128xf32>
    %37 = arith.subf %36, %35 : vector<128x128xf32>
    %cst_17 = arith.constant 0.000000e+00 : f32
    %38 = vector.broadcast %cst_17 : f32 to vector<128x128xf32>
    %39 = arith.cmpf oge, %9, %38 : vector<128x128xf32>
    %cst_18 = arith.constant 0.000000e+00 : f32
    %40 = vector.broadcast %cst_18 : f32 to vector<128x128xf32>
    %41 = arith.subf %40, %37 : vector<128x128xf32>
    %42 = arith.select %39, %37, %41 : vector<128x128xi1>, vector<128x128xf32>
    %cst_19 = arith.constant 1.000000e+00 : f32
    %43 = vector.broadcast %cst_19 : f32 to vector<128x128xf32>
    %44 = arith.addf %43, %42 : vector<128x128xf32>
    %45 = arith.mulf %7, %44 : vector<128x128xf32>
    %cst_20 = arith.constant 1.70150435 : f32
    %46 = vector.broadcast %cst_20 : f32 to vector<128x128xf32>
    %47 = arith.mulf %45, %46 : vector<128x128xf32>
    %48 = arith.truncf %47 : vector<128x128xf32> to vector<128x128xbf16>
    %c0_21 = arith.constant 0 : index
    %c0_22 = arith.constant 0 : index
    %49 = vector.load %arg4[%c0_21, %c0_22] : memref<128x128xbf16, #tpu.memory_space<vmem>>, vector<128x128xbf16>
    tpu.vector_store %arg4[%c0_21, %c0_22], %48 {strides = array<i32>} : memref<128x128xbf16, #tpu.memory_space<vmem>>, vector<128x128xbf16>,
    return
  }
  func.func @transform_0(%arg0: i32) -> (i32, i32) {
    %c0_i32 = arith.constant 0 : i32
    %c0_i32_0 = arith.constant 0 : i32
    return %arg0, %c0_i32 : i32, i32
  }
  func.func @transform_1(%arg0: i32) -> (i32, i32) {
    %c0_i32 = arith.constant 0 : i32
    %c0_i32_0 = arith.constant 0 : i32
    %c0_i32_1 = arith.constant 0 : i32
    return %c0_i32, %c0_i32_0 : i32, i32
  }
  func.func @transform_2(%arg0: i32) -> (i32, i32) {
    %c0_i32 = arith.constant 0 : i32
    %c0_i32_0 = arith.constant 0 : i32
    %c0_i32_1 = arith.constant 0 : i32
    return %c0_i32, %c0_i32_0 : i32, i32
  }
  func.func @transform_3(%arg0: i32) -> (i32, i32) {
    %c0_i32 = arith.constant 0 : i32
    %c0_i32_0 = arith.constant 0 : i32
    return %arg0, %c0_i32 : i32, i32
  }
}

module attributes {stable_mosaic.version = 11 : i64} {
  func.func @_mm_bias_act_kernel(%arg0: i32, %arg1: memref<32x2048xbf16, #tpu.memory_space<vmem>>, %arg2: memref<2048x256xbf16, #tpu.memory_space<vmem>>, %arg3: memref<1x256xf32, #tpu.memory_space<vmem>>, %arg4: memref<32x256xbf16, #tpu.memory_space<vmem>>) attributes {dimension_semantics = [#tpu.dimension_semantics<parallel>], iteration_bounds = array<i64: 1>, scalar_prefetch = 0 : i64, scratch_operands = 0 : i64, tpu.core_type = #tpu.core_type<tc>, window_params = [{transform_indices = @transform_0, window_bounds = array<i64: 32, 2048>}, {pipeline_mode = #tpu.pipeline_mode<synchronous>, transform_indices = @transform_1, window_bounds = array<i64: 2048, 256>}, {pipeline_mode = #tpu.pipeline_mode<synchronous>, transform_indices = @transform_2, window_bounds = array<i64: 1, 256>}, {transform_indices = @transform_3, window_bounds = array<i64: 32, 256>}]} {
    %c0 = arith.constant 0 : index
    %c0_0 = arith.constant 0 : index
    %0 = vector.load %arg1[%c0, %c0_0] : memref<32x2048xbf16, #tpu.memory_space<vmem>>, vector<32x2048xbf16>
    %c0_1 = arith.constant 0 : index
    %c0_2 = arith.constant 0 : index
    %1 = vector.load %arg2[%c0_1, %c0_2] : memref<2048x256xbf16, #tpu.memory_space<vmem>>, vector<2048x256xbf16>
    %cst = arith.constant dense<0.000000e+00> : vector<32x256xf32>
    %2 = tpu.matmul %0, %1, %cst {dimension_numbers = #tpu.dot_dimension_numbers<[1], [0], [0], [1], [0, 0, 1, 1], [], []>} : vector<32x2048xbf16>, vector<2048x256xbf16>, vector<32x256xf32> -> vector<32x256xf32>
    %c0_3 = arith.constant 0 : index
    %c0_4 = arith.constant 0 : index
    %3 = vector.load %arg3[%c0_3, %c0_4] : memref<1x256xf32, #tpu.memory_space<vmem>>, vector<1x256xf32>
    %4 = vector.broadcast %3 : vector<1x256xf32> to vector<32x256xf32>
    %5 = arith.addf %2, %4 : vector<32x256xf32>
    %cst_5 = arith.constant 5.000000e-01 : f32
    %6 = vector.broadcast %cst_5 : f32 to vector<32x256xf32>
    %7 = arith.mulf %6, %5 : vector<32x256xf32>
    %cst_6 = arith.constant 0.707106769 : f32
    %8 = vector.broadcast %cst_6 : f32 to vector<32x256xf32>
    %9 = arith.mulf %5, %8 : vector<32x256xf32>
    %10 = math.absf %9 : vector<32x256xf32>
    %cst_7 = arith.constant 0.327591091 : f32
    %11 = vector.broadcast %cst_7 : f32 to vector<32x256xf32>
    %12 = arith.mulf %11, %10 : vector<32x256xf32>
    %cst_8 = arith.constant 1.000000e+00 : f32
    %13 = vector.broadcast %cst_8 : f32 to vector<32x256xf32>
    %14 = arith.addf %13, %12 : vector<32x256xf32>
    %cst_9 = arith.constant 1.000000e+00 : f32
    %15 = vector.broadcast %cst_9 : f32 to vector<32x256xf32>
    %16 = arith.divf %15, %14 : vector<32x256xf32>
    %cst_10 = arith.constant 1.06140542 : f32
    %17 = vector.broadcast %cst_10 : f32 to vector<32x256xf32>
    %18 = arith.mulf %17, %16 : vector<32x256xf32>
    %cst_11 = arith.constant -1.45315206 : f32
    %19 = vector.broadcast %cst_11 : f32 to vector<32x256xf32>
    %20 = arith.addf %18, %19 : vector<32x256xf32>
    %21 = arith.mulf %20, %16 : vector<32x256xf32>
    %cst_12 = arith.constant 1.42141378 : f32
    %22 = vector.broadcast %cst_12 : f32 to vector<32x256xf32>
    %23 = arith.addf %21, %22 : vector<32x256xf32>
    %24 = arith.mulf %23, %16 : vector<32x256xf32>
    %cst_13 = arith.constant -0.284496725 : f32
    %25 = vector.broadcast %cst_13 : f32 to vector<32x256xf32>
    %26 = arith.addf %24, %25 : vector<32x256xf32>
    %27 = arith.mulf %26, %16 : vector<32x256xf32>
    %cst_14 = arith.constant 0.254829586 : f32
    %28 = vector.broadcast %cst_14 : f32 to vector<32x256xf32>
    %29 = arith.addf %27, %28 : vector<32x256xf32>
    %30 = arith.mulf %29, %16 : vector<32x256xf32>
    %cst_15 = arith.constant 0.000000e+00 : f32
    %31 = vector.broadcast %cst_15 : f32 to vector<32x256xf32>
    %32 = arith.subf %31, %10 : vector<32x256xf32>
    %33 = arith.mulf %32, %10 : vector<32x256xf32>
    %34 = math.exp %33 : vector<32x256xf32>
    %35 = arith.mulf %30, %34 : vector<32x256xf32>
    %cst_16 = arith.constant 1.000000e+00 : f32
    %36 = vector.broadcast %cst_16 : f32 to vector<32x256xf32>
    %37 = arith.subf %36, %35 : vector<32x256xf32>
    %cst_17 = arith.constant 0.000000e+00 : f32
    %38 = vector.broadcast %cst_17 : f32 to vector<32x256xf32>
    %39 = arith.cmpf oge, %9, %38 : vector<32x256xf32>
    %cst_18 = arith.constant 0.000000e+00 : f32
    %40 = vector.broadcast %cst_18 : f32 to vector<32x256xf32>
    %41 = arith.subf %40, %37 : vector<32x256xf32>
    %42 = arith.select %39, %37, %41 : vector<32x256xi1>, vector<32x256xf32>
    %cst_19 = arith.constant 1.000000e+00 : f32
    %43 = vector.broadcast %cst_19 : f32 to vector<32x256xf32>
    %44 = arith.addf %43, %42 : vector<32x256xf32>
    %45 = arith.mulf %7, %44 : vector<32x256xf32>
    %cst_20 = arith.constant 1.70150435 : f32
    %46 = vector.broadcast %cst_20 : f32 to vector<32x256xf32>
    %47 = arith.mulf %45, %46 : vector<32x256xf32>
    %48 = arith.truncf %47 : vector<32x256xf32> to vector<32x256xbf16>
    %c0_21 = arith.constant 0 : index
    %c0_22 = arith.constant 0 : index
    %49 = vector.load %arg4[%c0_21, %c0_22] : memref<32x256xbf16, #tpu.memory_space<vmem>>, vector<32x256xbf16>
    tpu.vector_store %arg4[%c0_21, %c0_22], %48 {strides = array<i32>} : memref<32x256xbf16, #tpu.memory_space<vmem>>, vector<32x256xbf16>,
    return
  }
  func.func @transform_0(%arg0: i32) -> (i32, i32) {
    %c0_i32 = arith.constant 0 : i32
    %c0_i32_0 = arith.constant 0 : i32
    return %arg0, %c0_i32 : i32, i32
  }
  func.func @transform_1(%arg0: i32) -> (i32, i32) {
    %c0_i32 = arith.constant 0 : i32
    %c0_i32_0 = arith.constant 0 : i32
    %c0_i32_1 = arith.constant 0 : i32
    return %c0_i32, %c0_i32_0 : i32, i32
  }
  func.func @transform_2(%arg0: i32) -> (i32, i32) {
    %c0_i32 = arith.constant 0 : i32
    %c0_i32_0 = arith.constant 0 : i32
    %c0_i32_1 = arith.constant 0 : i32
    return %c0_i32, %c0_i32_0 : i32, i32
  }
  func.func @transform_3(%arg0: i32) -> (i32, i32) {
    %c0_i32 = arith.constant 0 : i32
    %c0_i32_0 = arith.constant 0 : i32
    return %arg0, %c0_i32 : i32, i32
  }
}

module attributes {stable_mosaic.version = 11 : i64} {
  func.func @_mm_bias_act_kernel(%arg0: i32, %arg1: memref<32x256xbf16, #tpu.memory_space<vmem>>, %arg2: memref<256x32xbf16, #tpu.memory_space<vmem>>, %arg3: memref<1x32xf32, #tpu.memory_space<vmem>>, %arg4: memref<32x32xf32, #tpu.memory_space<vmem>>) attributes {dimension_semantics = [#tpu.dimension_semantics<parallel>], iteration_bounds = array<i64: 1>, scalar_prefetch = 0 : i64, scratch_operands = 0 : i64, tpu.core_type = #tpu.core_type<tc>, window_params = [{transform_indices = @transform_0, window_bounds = array<i64: 32, 256>}, {pipeline_mode = #tpu.pipeline_mode<synchronous>, transform_indices = @transform_1, window_bounds = array<i64: 256, 32>}, {pipeline_mode = #tpu.pipeline_mode<synchronous>, transform_indices = @transform_2, window_bounds = array<i64: 1, 32>}, {transform_indices = @transform_3, window_bounds = array<i64: 32, 32>}]} {
    %c0 = arith.constant 0 : index
    %c0_0 = arith.constant 0 : index
    %0 = vector.load %arg1[%c0, %c0_0] : memref<32x256xbf16, #tpu.memory_space<vmem>>, vector<32x256xbf16>
    %c0_1 = arith.constant 0 : index
    %c0_2 = arith.constant 0 : index
    %1 = vector.load %arg2[%c0_1, %c0_2] : memref<256x32xbf16, #tpu.memory_space<vmem>>, vector<256x32xbf16>
    %cst = arith.constant dense<0.000000e+00> : vector<32x32xf32>
    %2 = tpu.matmul %0, %1, %cst {dimension_numbers = #tpu.dot_dimension_numbers<[1], [0], [0], [1], [0, 0, 1, 1], [], []>} : vector<32x256xbf16>, vector<256x32xbf16>, vector<32x32xf32> -> vector<32x32xf32>
    %c0_3 = arith.constant 0 : index
    %c0_4 = arith.constant 0 : index
    %3 = vector.load %arg3[%c0_3, %c0_4] : memref<1x32xf32, #tpu.memory_space<vmem>>, vector<1x32xf32>
    %4 = vector.broadcast %3 : vector<1x32xf32> to vector<32x32xf32>
    %5 = arith.addf %2, %4 : vector<32x32xf32>
    %cst_5 = arith.constant 5.000000e-01 : f32
    %6 = vector.broadcast %cst_5 : f32 to vector<32x32xf32>
    %7 = arith.mulf %6, %5 : vector<32x32xf32>
    %cst_6 = arith.constant 0.707106769 : f32
    %8 = vector.broadcast %cst_6 : f32 to vector<32x32xf32>
    %9 = arith.mulf %5, %8 : vector<32x32xf32>
    %10 = math.absf %9 : vector<32x32xf32>
    %cst_7 = arith.constant 0.327591091 : f32
    %11 = vector.broadcast %cst_7 : f32 to vector<32x32xf32>
    %12 = arith.mulf %11, %10 : vector<32x32xf32>
    %cst_8 = arith.constant 1.000000e+00 : f32
    %13 = vector.broadcast %cst_8 : f32 to vector<32x32xf32>
    %14 = arith.addf %13, %12 : vector<32x32xf32>
    %cst_9 = arith.constant 1.000000e+00 : f32
    %15 = vector.broadcast %cst_9 : f32 to vector<32x32xf32>
    %16 = arith.divf %15, %14 : vector<32x32xf32>
    %cst_10 = arith.constant 1.06140542 : f32
    %17 = vector.broadcast %cst_10 : f32 to vector<32x32xf32>
    %18 = arith.mulf %17, %16 : vector<32x32xf32>
    %cst_11 = arith.constant -1.45315206 : f32
    %19 = vector.broadcast %cst_11 : f32 to vector<32x32xf32>
    %20 = arith.addf %18, %19 : vector<32x32xf32>
    %21 = arith.mulf %20, %16 : vector<32x32xf32>
    %cst_12 = arith.constant 1.42141378 : f32
    %22 = vector.broadcast %cst_12 : f32 to vector<32x32xf32>
    %23 = arith.addf %21, %22 : vector<32x32xf32>
    %24 = arith.mulf %23, %16 : vector<32x32xf32>
    %cst_13 = arith.constant -0.284496725 : f32
    %25 = vector.broadcast %cst_13 : f32 to vector<32x32xf32>
    %26 = arith.addf %24, %25 : vector<32x32xf32>
    %27 = arith.mulf %26, %16 : vector<32x32xf32>
    %cst_14 = arith.constant 0.254829586 : f32
    %28 = vector.broadcast %cst_14 : f32 to vector<32x32xf32>
    %29 = arith.addf %27, %28 : vector<32x32xf32>
    %30 = arith.mulf %29, %16 : vector<32x32xf32>
    %cst_15 = arith.constant 0.000000e+00 : f32
    %31 = vector.broadcast %cst_15 : f32 to vector<32x32xf32>
    %32 = arith.subf %31, %10 : vector<32x32xf32>
    %33 = arith.mulf %32, %10 : vector<32x32xf32>
    %34 = math.exp %33 : vector<32x32xf32>
    %35 = arith.mulf %30, %34 : vector<32x32xf32>
    %cst_16 = arith.constant 1.000000e+00 : f32
    %36 = vector.broadcast %cst_16 : f32 to vector<32x32xf32>
    %37 = arith.subf %36, %35 : vector<32x32xf32>
    %cst_17 = arith.constant 0.000000e+00 : f32
    %38 = vector.broadcast %cst_17 : f32 to vector<32x32xf32>
    %39 = arith.cmpf oge, %9, %38 : vector<32x32xf32>
    %cst_18 = arith.constant 0.000000e+00 : f32
    %40 = vector.broadcast %cst_18 : f32 to vector<32x32xf32>
    %41 = arith.subf %40, %37 : vector<32x32xf32>
    %42 = arith.select %39, %37, %41 : vector<32x32xi1>, vector<32x32xf32>
    %cst_19 = arith.constant 1.000000e+00 : f32
    %43 = vector.broadcast %cst_19 : f32 to vector<32x32xf32>
    %44 = arith.addf %43, %42 : vector<32x32xf32>
    %45 = arith.mulf %7, %44 : vector<32x32xf32>
    %cst_20 = arith.constant 1.70150435 : f32
    %46 = vector.broadcast %cst_20 : f32 to vector<32x32xf32>
    %47 = arith.mulf %45, %46 : vector<32x32xf32>
    %c0_21 = arith.constant 0 : index
    %c0_22 = arith.constant 0 : index
    %48 = vector.load %arg4[%c0_21, %c0_22] : memref<32x32xf32, #tpu.memory_space<vmem>>, vector<32x32xf32>
    tpu.vector_store %arg4[%c0_21, %c0_22], %47 {strides = array<i32>} : memref<32x32xf32, #tpu.memory_space<vmem>>, vector<32x32xf32>,
    return
  }
  func.func @transform_0(%arg0: i32) -> (i32, i32) {
    %c0_i32 = arith.constant 0 : i32
    %c0_i32_0 = arith.constant 0 : i32
    return %arg0, %c0_i32 : i32, i32
  }
  func.func @transform_1(%arg0: i32) -> (i32, i32) {
    %c0_i32 = arith.constant 0 : i32
    %c0_i32_0 = arith.constant 0 : i32
    %c0_i32_1 = arith.constant 0 : i32
    return %c0_i32, %c0_i32_0 : i32, i32
  }
  func.func @transform_2(%arg0: i32) -> (i32, i32) {
    %c0_i32 = arith.constant 0 : i32
    %c0_i32_0 = arith.constant 0 : i32
    %c0_i32_1 = arith.constant 0 : i32
    return %c0_i32, %c0_i32_0 : i32, i32
  }
  func.func @transform_3(%arg0: i32) -> (i32, i32) {
    %c0_i32 = arith.constant 0 : i32
    %c0_i32_0 = arith.constant 0 : i32
    return %arg0, %c0_i32 : i32, i32
  }
}

</mosaic_0001>

<bundles_post_ra>
// kernel: model_injection_forward.4
= control target key start
LH: loop header
LB: loop body
LE: loop exit
PB: predicated region body
PF: predicated region fallthrough
CT: control target
= control target key end

     0   :  { %s2001_s12 = smov 0   ;;  %s2804_s0 = inlined_call_operand.vmem [shape: bf16[512,36], index: 0, kind: input, shape index: {}]   ;;  %s2805_s1 = inlined_call_operand.vmem [shape: bf16[36,64], index: 1, kind: input, shape index: {}]   ;;  %s2806_s2 = inlined_call_operand.vmem [shape: f32[1,64], index: 2, kind: input, shape index: {}]   ;;  %s2807_s3 = inlined_call_operand.vmem [shape: bf16[512,64], index: 3, kind: output, shape index: {}]  }
   0x1 LB: > { %s1641_s13 = sadd.s32 4294967295, %s1979_s12   ;;  %p1645_p0 = scmp.ge.s32.totalorder %s1979_s12, 1  ;;  %s1979_s12 = sphi %s2001_s12, %s13_s12  }
   0x2   : > { %p138_p1 = scmp.lt.s32.totalorder %s1979_s12, 3 }
   0x4   : > { %p139_p2 = pnand %p1645_p0, %p138_p1 }
   0x6   : > { %142 = sbr.rel (%p139_p2) target bundleno = 491 (0x1eb), region = 32 }
   0xd   : > { %v1825_v0 = vld [vmem:[%s2805_s1] sm:$0xff]   ;;  %v1826_v1 = vld [vmem:[%s2805_s1 + $0x8] sm:$0xff]   ;;  %s1646_s18 = sshll.u32 %s1641_s13, 5  ;;  %v1827_v2 = vld [vmem:[%s2805_s1 + $0x10] ss:$0 sps:$4 sm:$0x33]  }
   0xe   : > { %1771 = vmatprep.subr.bf16.mxu0 %v1825_v0  ;;  %1809 = vmatprep.subr.bf16.mxu1 %v1825_v0  ;;  %p163_p3 = scmp.lt.s32.totalorder %s1646_s18, 63  ;;  %vm363_vm0 = vcmask 1041408   ;;  %vm314_vm1 = vcmask 293888   ;;  %v2063_v20 = vld [vmem:[%s2806_s2] ss:$0 sm:$0xff]  ;;  %vm1552_vm6 = vcmask 519168  }
   0xf   : > { %1772 = vmatpush3.bf16.msra.mxu0 %v1825_v0  ;;  %1812 = vmatpush3.bf16.msra.mxu1 %v1825_v0  ;;  %v365_v3 = vsel %vm363_vm0, %v1827_v2, 0 }
  0x10   : > { %1773 = vmatprep.subr.bf16.mxu0 %v1826_v1  ;;  %1810 = vmatprep.subr.bf16.mxu1 %v1826_v1  ;;  %s2825_s18 = smov (!%p163_p3, %s1646_s18), 63 }
  0x11   : > { %s1647_s21 = sshll.u32 %s2825_s18, 2 }
  0x12   : > { %s2026_s24 = scalar_lea.vmem %s2804_s0, %s1647_s21  ;;  %s2253_s29 = scalar_lea.vmem %s2807_s3, %s1647_s21 }
  0x13   : > { %1774 = vmatpush3.bf16.msra.mxu0 %v1826_v1  ;;  %1813 = vmatpush3.bf16.msra.mxu1 %v1826_v1  ;;  %v1828_v4 = vld [vmem:[%s2026_s24] sm:$0xff]   ;;  %v1830_v6 = vld [vmem:[%s2026_s24 + $0x8] sm:$0xff]   ;;  %v1832_v8 = vld [vmem:[%s2026_s24 + $0x10] sm:$0xff]  }
  0x14   : > { %1815 = vmatprep.subr.msk.bf16.mxu0 %vm363_vm0, %v1827_v2  ;;  %1816 = vmatprep.subr.msk.bf16.mxu1 %vm363_vm0, %v1827_v2  ;;  %v1829_v5 = vld [vmem:[%s2026_s24 + $0x40] sm:$0xff]   ;;  %v1831_v7 = vld [vmem:[%s2026_s24 + $0x48] sm:$0xff]   ;;  %v1833_v9 = vld [vmem:[%s2026_s24 + $0x50] sm:$0xff]  }
  0x15   : > { %1777 = vmatprep.mubr.msk.bf16.mxu0 %vm314_vm1, %v1828_v4  ;;  %1793 = vmatprep.mubr.msk.bf16.mxu1 %vm314_vm1, %v1829_v5  ;;  %v1834_v10 = vld [vmem:[%s2026_s24 + $0x18] sm:$0xff]   ;;  %v1836_v12 = vld [vmem:[%s2026_s24 + $0x20] sm:$0xff]   ;;  %v1838_v14 = vld [vmem:[%s2026_s24 + $0x28] sm:$0xff]  }
  0x16   : > { %v1835_v11 = vld [vmem:[%s2026_s24 + $0x58] sm:$0xff]   ;;  %v1837_v13 = vld [vmem:[%s2026_s24 + $0x60] sm:$0xff]   ;;  %v1839_v15 = vld [vmem:[%s2026_s24 + $0x68] sm:$0xff]  }
  0x17   : > { %1776 = vmatpush3.bf16.msra.mxu0 %v365_v3  ;;  %1814 = vmatpush3.bf16.msra.mxu1 %v365_v3  ;;  %v1840_v16 = vld [vmem:[%s2026_s24 + $0x30] sm:$0xff]   ;;  %v1842_v18 = vld [vmem:[%s2026_s24 + $0x38] sm:$0xff]  }
  0x18   : > { %v1841_v17 = vld [vmem:[%s2026_s24 + $0x70] sm:$0xff]   ;;  %v1843_v19 = vld [vmem:[%s2026_s24 + $0x78] sm:$0xff]  }
  0x1a   : > { %1778 = vmatmul.mubr.msk.bf16.vlgmr.msra.gmra.mrb[0].mxu0 %vm314_vm1, %v1830_v6  ;;  %1794 = vmatmul.mubr.msk.bf16.vlgmr.msra.gmra.mrb[0].mxu1 %vm314_vm1, %v1831_v7 }
  0x1b   : > { %1781 = vmatprep.mubr.msk.bf16.mxu0 %vm314_vm1, %v1832_v8  ;;  %1797 = vmatprep.mubr.msk.bf16.mxu1 %vm314_vm1, %v1833_v9 }
  0x22   : > { %1782 = vmatmul.mubr.msk.bf16.gmra.mrb[4].mxu0 %vm314_vm1, %v1834_v10  ;;  %1798 = vmatmul.mubr.msk.bf16.gmra.mrb[4].mxu1 %vm314_vm1, %v1835_v11 }
  0x23   : > { %1785 = vmatprep.mubr.msk.bf16.mxu0 %vm314_vm1, %v1836_v12  ;;  %1801 = vmatprep.mubr.msk.bf16.mxu1 %vm314_vm1, %v1837_v13 }
  0x2a   : > { %1786 = vmatmul.mubr.msk.bf16.gmra.mrb[8].mxu0 %vm314_vm1, %v1838_v14  ;;  %1802 = vmatmul.mubr.msk.bf16.gmra.mrb[8].mxu1 %vm314_vm1, %v1839_v15 }
  0x2b   : > { %1789 = vmatprep.mubr.msk.bf16.mxu0 %vm314_vm1, %v1840_v16  ;;  %1805 = vmatprep.mubr.msk.bf16.mxu1 %vm314_vm1, %v1841_v17 }
  0x32   : > { %1790 = vmatmul.mubr.msk.bf16.gmra.mrb[12].mxu0 %vm314_vm1, %v1842_v18  ;;  %1806 = vmatmul.mubr.msk.bf16.gmra.mrb[12].mxu1 %vm314_vm1, %v1843_v19 }
  0xed   : > { %v1779_v21 = vpop.f32.mrb[0].mxu0  ;;  %v1795_v22 = vpop.f32.mrb[0].mxu1 }
  0xee   : > { %v410_v23 = vadd.f32 %v1779_v21, %v2063_v20  ;;  %v474_v24 = vadd.f32 %v1795_v22, %v2063_v20  ;;  %v401_v25 = vpop.f32.mrb[1].mxu0  ;;  %v465_v26 = vpop.f32.mrb[1].mxu1 }
  0xef   : > { %v402_v27 = vadd.f32 %v2063_v20, %v401_v25  ;;  %v466_v28 = vadd.f32 %v2063_v20, %v465_v26  ;;  %v1780_v29 = vpop.f32.mrb[2].mxu0  ;;  %v1796_v30 = vpop.f32.mrb[2].mxu1 }
  0xf0   : > { %v2069_v31 = vmul.f32 0.70710677, %v410_v23  ;;  %v2071_v32 = vmul.f32 0.70710677, %v474_v24  ;;  %v404_v50 = vpop.f32.mrb[3].mxu0  ;;  %v468_v51 = vpop.f32.mrb[3].mxu1  ;;  %v413_v59 = vadd.f32 %v1780_v29, %v2063_v20  ;;  %v477_v0 = vadd.f32 %v1796_v30, %v2063_v20 }
  0xf1   : > { %v2073_v33 = vmul.f32 0.70710677, %v402_v27  ;;  %v2075_v34 = vmul.f32 0.70710677, %v466_v28  ;;  %v2081_v52 = vmul.f32 0.5, %v410_v23  ;;  %v2092_v62 = vmul.f32 0.5, %v474_v24 }
  0xf2   : > { %v594_v35 = vand.u32 2147483647, %v2069_v31  ;;  %v610_v36 = vand.u32 2147483647, %v2071_v32  ;;  %v2099_v4 = vmul.f32 0.70710677, %v413_v59  ;;  %v2102_v5 = vadd.f32 %v2063_v20, %v404_v50 }
  0xf3   : > { %v592_v37 = vand.u32 2147483647, %v2073_v33  ;;  %v608_v38 = vand.u32 2147483647, %v2075_v34  ;;  %v2108_v10 = vmul.f32 0.70710677, %v477_v0  ;;  %v2112_v13 = vadd.f32 %v2063_v20, %v468_v51 }
  0xf4   : > { %v626_v39 = vmul.f32 0.3275911, %v594_v35  ;;  %v1042_v40 = vsub.f32 0.0, %v594_v35  ;;  %v642_v41 = vmul.f32 0.3275911, %v610_v36  ;;  %v1058_v42 = vsub.f32 0.0, %v610_v36 }
  0xf5   : > { %v624_v43 = vmul.f32 0.3275911, %v592_v37  ;;  %v1040_v44 = vsub.f32 0.0, %v592_v37  ;;  %v640_v45 = vmul.f32 0.3275911, %v608_v38  ;;  %v1056_v46 = vsub.f32 0.0, %v608_v38 }
  0xf6   : > { %v658_v47 = vadd.f32 1.0, %v626_v39  ;;  %v1074_v48 = vmul.f32 %v1042_v40, %v594_v35  ;;  %v674_v49 = vadd.f32 1.0, %v642_v41  ;;  %v1090_v53 = vmul.f32 %v1058_v42, %v610_v36  ;;  %v2083_v55 = vpop.f32.mrb[4].mxu0  ;;  %v2085_v56 = vpop.f32.mrb[4].mxu1 }
  0xf7   : > { %v1072_v54 = vmul.f32 %v1040_v44, %v592_v37  ;;  %v656_v57 = vadd.f32 1.0, %v624_v43  ;;  %v1088_v58 = vmul.f32 %v1056_v46, %v608_v38  ;;  %v2088_v60 = vpop.f32.mrb[5].mxu0  ;;  %v2090_v61 = vpop.f32.mrb[5].mxu1  ;;  %v672_v63 = vadd.f32 1.0, %v640_v45 }
  0xf8   : > { %1844 = vrcp.f32 %v658_v47  ;;  %v2095_v1 = vpop.f32.mrb[6].mxu0  ;;  %v2097_v2 = vpop.f32.mrb[6].mxu1  ;;  %v1108_v3 = vmul.f32 1.442695, %v1074_v48  ;;  %v1140_v8 = vmul.f32 1.442695, %v1090_v53 }
  0xf9   : > { %1846 = vrcp.f32 %v674_v49  ;;  %v2104_v6 = vpop.f32.mrb[7].mxu0  ;;  %v2106_v7 = vpop.f32.mrb[7].mxu1  ;;  %v1104_v9 = vmul.f32 1.442695, %v1072_v54  ;;  %v1136_v11 = vmul.f32 1.442695, %v1088_v58 }
  0xfa   : > { %1848 = vrcp.f32 %v656_v57  ;;  %v595_v12 = vand.u32 2147483647, %v2099_v4  ;;  %v2114_v14 = vmul.f32 0.5, %v402_v27  ;;  %v611_v15 = vand.u32 2147483647, %v2108_v10 }
  0xfb   : > { %v2118_v16 = vmul.f32 0.70710677, %v2102_v5  ;;  %v2122_v18 = vmul.f32 0.5, %v466_v28  ;;  %1850 = vrcp.f32 %v672_v63  ;;  %v2132_v35 = vmul.f32 0.70710677, %v2112_v13 }
  0xfc   : > { %v627_v19 = vmul.f32 0.3275911, %v595_v12  ;;  %v1043_v21 = vsub.f32 0.0, %v595_v12  ;;  %v643_v24 = vmul.f32 0.3275911, %v611_v15  ;;  %v1059_v25 = vsub.f32 0.0, %v611_v15 }
  0xfd   : > { %v2120_v17 = vpop.f32.mrb[8].mxu0  ;;  %v2124_v22 = vpop.f32.mrb[8].mxu1  ;;  %v593_v26 = vand.u32 2147483647, %v2118_v16  ;;  %1852 = vpow2.f32 %v1108_v3  ;;  %v2144_v43 = vmul.f32 0.5, %v413_v59  ;;  %v2150_v48 = vmul.f32 0.5, %v477_v0 }
  0xfe   : > { %v2126_v23 = vpop.f32.mrb[9].mxu0  ;;  %v2129_v27 = vpop.f32.mrb[9].mxu1  ;;  %v659_v29 = vadd.f32 1.0, %v627_v19  ;;  %v1075_v30 = vmul.f32 %v1043_v21, %v595_v12  ;;  %1854 = vpow2.f32 %v1140_v8  ;;  %v675_v37 = vadd.f32 1.0, %v643_v24 }
  0xff   : > { %2808 = vst [vmem:[#allocation2_spill] sm:$0xff] %v2129_v27  ;;  %v2134_v28 = vpop.f32.mrb[10].mxu0  ;;  %v2136_v36 = vpop.f32.mrb[10].mxu1  ;;  %v625_v38 = vmul.f32 0.3275911, %v593_v26  ;;  %v1041_v39 = vsub.f32 0.0, %v593_v26  ;;  %v1091_v44 = vmul.f32 %v1059_v25, %v611_v15  ;;  %v2155_v59 = vadd.f32 %v2083_v55, %v2063_v20 }
 0x100   : > { %2809 = vst [vmem:[#allocation3_spill] sm:$0xff] %v2134_v28  ;;  %2810 = vst [vmem:[#allocation4_spill] sm:$0xff] %v2136_v36  ;;  %v2138_v40 = vpop.f32.mrb[11].mxu0  ;;  %v2140_v41 = vpop.f32.mrb[11].mxu1  ;;  %1856 = vrcp.f32 %v659_v29  ;;  %v609_v45 = vand.u32 2147483647, %v2132_v35 }
 0x101   : > { %2811 = vst [vmem:[#allocation5_spill] sm:$0xff] %v2138_v40  ;;  %2812 = vst [vmem:[#allocation6_spill] sm:$0xff] %v2140_v41  ;;  %1858 = vrcp.f32 %v675_v37  ;;  %v657_v49 = vadd.f32 1.0, %v625_v38  ;;  %v1110_v51 = vmul.f32 1.442695, %v1075_v30  ;;  %v1073_v53 = vmul.f32 %v1041_v39, %v593_v26 }
 0x102   : > { %v2142_v42 = vpop.eup %1844  ;;  %v641_v54 = vmul.f32 0.3275911, %v609_v45  ;;  %1860 = vpow2.f32 %v1104_v9  ;;  %v1057_v58 = vsub.f32 0.0, %v609_v45  ;;  %v1142_v12 = vmul.f32 1.442695, %v1091_v44 }
 0x103   : > { %v2147_v46 = vpop.eup %1846  ;;  %v754_v47 = vmul.f32 1.0614054, %v2142_v42  ;;  %1862 = vrcp.f32 %v657_v49  ;;  %v1106_v9 = vmul.f32 1.442695, %v1073_v53  ;;  %v2169_v26 = vmul.f32 0.70710677, %v2155_v59 }
 0x104   : > { %v770_v50 = vmul.f32 1.0614054, %v2147_v46  ;;  %v2161_v0 = vpop.eup %1848  ;;  %v673_v15 = vadd.f32 1.0, %v641_v54  ;;  %1864 = vpow2.f32 %v1136_v11  ;;  %v1089_v25 = vmul.f32 %v1057_v58, %v609_v45 }
 0x105   : > { %v786_v57 = vadd.f32 -1.4531521, %v754_v47  ;;  %v2157_v63 = vpop.f32.mrb[12].mxu0  ;;  %v2159_v3 = vpop.f32.mrb[12].mxu1  ;;  %v752_v21 = vmul.f32 1.0614054, %v2161_v0  ;;  %1866 = vpow2.f32 %v1110_v51 }
 0x106   : > { %2813 = vst [vmem:[#allocation7_spill] sm:$0xff] %v2157_v63  ;;  %2814 = vst [vmem:[#allocation8_spill] sm:$0xff] %v2159_v3  ;;  %v802_v8 = vadd.f32 -1.4531521, %v770_v50  ;;  %v2165_v24 = vpop.eup %1850  ;;  %1868 = vrcp.f32 %v673_v15  ;;  %v2173_v11 = vmul.f32 0.5, %v2102_v5  ;;  %vm1234_vm2 = vcmp.ge.f32.partialorder %v2069_v31, 0.0 }
 0x107   : > { %v818_v19 = vmul.f32 %v2142_v42, %v786_v57  ;;  %v784_v30 = vadd.f32 -1.4531521, %v752_v21  ;;  %v768_v37 = vmul.f32 1.0614054, %v2165_v24  ;;  %v1853_v38 = vpop.eup %1852  ;;  %1870 = vpow2.f32 %v1142_v12 }
 0x108   : > { %v834_v55 = vmul.f32 %v2147_v46, %v802_v8  ;;  %v598_v44 = vand.u32 2147483647, %v2169_v26  ;;  %v1855_v47 = vpop.eup %1854  ;;  %1872 = vpow2.f32 %v1106_v9  ;;  %v1138_v54 = vmul.f32 1.442695, %v1089_v25 }
 0x109   : > { %v850_v29 = vadd.f32 1.4214138, %v818_v19  ;;  %v816_v45 = vmul.f32 %v2161_v0, %v784_v30  ;;  %v800_v50 = vadd.f32 -1.4531521, %v768_v37  ;;  %v2188_v9 = vadd.f32 %v2085_v56, %v2063_v20  ;;  %v2190_v30 = vpop.f32.mrb[13].mxu0 }
 0x10a   : > { %v866_v39 = vadd.f32 1.4214138, %v834_v55  ;;  %v2178_v51 = vpop.eup %1856  ;;  %v630_v57 = vmul.f32 0.3275911, %v598_v44  ;;  %v1046_v58 = vsub.f32 0.0, %v598_v44  ;;  %2815 = vst [vmem:[#allocation9_spill] sm:$0xff] %v2190_v30  ;;  %1874 = vpow2.f32 %v1138_v54 }
 0x10b   : > { %v882_v49 = vmul.f32 %v2142_v42, %v850_v29  ;;  %v2181_v8 = vpop.eup %1858  ;;  %v848_v12 = vadd.f32 1.4214138, %v816_v45  ;;  %v832_v15 = vmul.f32 %v2165_v24, %v800_v50  ;;  %v755_v19 = vmul.f32 1.0614054, %v2178_v51 }
 0x10c   : > { %v898_v53 = vmul.f32 %v2147_v46, %v866_v39  ;;  %v771_v55 = vmul.f32 1.0614054, %v2181_v8  ;;  %v662_v29 = vadd.f32 1.0, %v630_v57  ;;  %v1861_v25 = vpop.eup %1860  ;;  %v2197_v57 = vmul.f32 %v1046_v58, %v598_v44 }
 0x10d   : > { %v914_v5 = vadd.f32 -0.28449672, %v882_v49  ;;  %v880_v39 = vmul.f32 %v2161_v0, %v848_v12  ;;  %v864_v49 = vadd.f32 1.4214138, %v832_v15  ;;  %v787_v45 = vadd.f32 -1.4531521, %v755_v19  ;;  %v2194_v50 = vpop.eup %1862 }
 0x10e   : > { %v930_v21 = vadd.f32 -0.28449672, %v898_v53  ;;  %v803_v3 = vadd.f32 -1.4531521, %v771_v55  ;;  %v1865_v63 = vpop.eup %1864  ;;  %v753_v19 = vmul.f32 1.0614054, %v2194_v50  ;;  %1876 = vrcp.f32 %v662_v29 }
 0x10f   : > { %v946_v37 = vmul.f32 %v2142_v42, %v914_v5  ;;  %v912_v41 = vadd.f32 -0.28449672, %v880_v39  ;;  %v896_v30 = vmul.f32 %v2165_v24, %v864_v49  ;;  %v819_v40 = vmul.f32 %v2178_v51, %v787_v45  ;;  %v2201_v5 = vpop.eup %1866 }
 0x110   : > { %v962_v53 = vmul.f32 %v2147_v46, %v930_v21  ;;  %v835_v15 = vmul.f32 %v2181_v8, %v803_v3  ;;  %v2206_v54 = vpop.eup %1868  ;;  %vm1250_vm3 = vcmp.ge.f32.partialorder %v2071_v32, 0.0  ;;  %v785_v45 = vadd.f32 -1.4531521, %v753_v19 }
 0x111   : > { %v978_v56 = vadd.f32 0.2548296, %v946_v37  ;;  %v944_v58 = vmul.f32 %v2161_v0, %v912_v41  ;;  %v928_v21 = vadd.f32 -0.28449672, %v896_v30  ;;  %v851_v55 = vadd.f32 1.4214138, %v819_v40  ;;  %v1871_v37 = vpop.eup %1870 }
 0x112   : > { %v994_v12 = vadd.f32 0.2548296, %v962_v53  ;;  %v867_v49 = vadd.f32 1.4214138, %v835_v15  ;;  %v769_v3 = vmul.f32 1.0614054, %v2206_v54  ;;  %v2213_v53 = vpop.eup %1872  ;;  %v817_v41 = vmul.f32 %v2194_v50, %v785_v45 }
 0x113   : > { %v1010_v44 = vmul.f32 %v2142_v42, %v978_v56  ;;  %v976_v36 = vadd.f32 0.2548296, %v944_v58  ;;  %v960_v28 = vmul.f32 %v2165_v24, %v928_v21  ;;  %v883_v42 = vmul.f32 %v2178_v51, %v851_v55 }
 0x114   : > { %v1026_v39 = vmul.f32 %v2147_v46, %v994_v12  ;;  %vm1232_vm4 = vcmp.ge.f32.partialorder %v2073_v33, 0.0  ;;  %v899_v40 = vmul.f32 %v2181_v8, %v867_v49  ;;  %v801_v46 = vadd.f32 -1.4531521, %v769_v3  ;;  %v2225_v49 = vpop.eup %1874  ;;  %v2229_v3 = vpop.f32.mrb[13].mxu1 }
 0x115   : > { %v1170_v29 = vmul.f32 %v1853_v38, %v1010_v44  ;;  %v1008_v12 = vmul.f32 %v2161_v0, %v976_v36  ;;  %v992_v15 = vadd.f32 0.2548296, %v960_v28  ;;  %v915_v19 = vadd.f32 -0.28449672, %v883_v42 }
 0x116   : > { %v1186_v56 = vmul.f32 %v1855_v47, %v1026_v39  ;;  %vm1248_vm5 = vcmp.ge.f32.partialorder %v2075_v34, 0.0  ;;  %v931_v38 = vadd.f32 -0.28449672, %v899_v40  ;;  %v849_v44 = vadd.f32 1.4214138, %v817_v41 }
 0x117   : > { %v1202_v30 = vsub.f32 1.0, %v1170_v29  ;;  %v833_v58 = vmul.f32 %v2206_v54, %v801_v46  ;;  %v1168_v21 = vmul.f32 %v1861_v25, %v1008_v12  ;;  %v1024_v55 = vmul.f32 %v2165_v24, %v992_v15 }
 0x118   : > { %v1218_v27 = vsub.f32 1.0, %v1186_v56  ;;  %v947_v39 = vmul.f32 %v2178_v51, %v915_v19  ;;  %v963_v28 = vmul.f32 %v2181_v8, %v931_v38  ;;  %v881_v36 = vmul.f32 %v2194_v50, %v849_v44  ;;  %v2233_v40 = vpop.eup %1876 }
 0x119   : > { %v1266_v47 = vsub.f32 0.0, %v1202_v30  ;;  %v865_v0 = vadd.f32 1.4214138, %v833_v58  ;;  %v1200_v42 = vsub.f32 1.0, %v1168_v21  ;;  %v1184_v56 = vmul.f32 %v1865_v63, %v1024_v55 }
 0x11a   : > { %v1282_v45 = vsub.f32 0.0, %v1218_v27  ;;  %v979_v25 = vadd.f32 0.2548296, %v947_v39  ;;  %vm1235_vm7 = vcmp.ge.f32.partialorder %v2099_v4, 0.0  ;;  %v995_v46 = vadd.f32 0.2548296, %v963_v28 }
 0x11b   : > { %v1298_v29 = vsel %vm1234_vm2, %v1202_v30, %v1266_v47  ;;  %v913_v12 = vadd.f32 -0.28449672, %v881_v36  ;;  %v1264_v19 = vsub.f32 0.0, %v1200_v42  ;;  %v1216_v38 = vsub.f32 1.0, %v1184_v56 }
 0x11c   : > { %v1330_v24 = vadd.f32 1.0, %v1298_v29  ;;  %v1314_v41 = vsel %vm1250_vm3, %v1218_v27, %v1282_v45  ;;  %v1011_v31 = vmul.f32 %v2178_v51, %v979_v25  ;;  %vm1251_vm8 = vcmp.ge.f32.partialorder %v2108_v10, 0.0 }
 0x11d   : > { %v1346_v15 = vadd.f32 1.0, %v1314_v41  ;;  %v1027_v30 = vmul.f32 %v2181_v8, %v995_v46  ;;  %v945_v44 = vmul.f32 %v2194_v50, %v913_v12  ;;  %v897_v32 = vmul.f32 %v2206_v54, %v865_v0  ;;  %v2264_v46 = vpop.f32.mrb[14].mxu0 }
 0x11e   : > { %v1362_v63 = vmul.f32 %v1330_v24, %v2081_v52  ;;  %v1296_v58 = vsel %vm1232_vm4, %v1200_v42, %v1264_v19  ;;  %v1280_v47 = vsub.f32 0.0, %v1216_v38  ;;  %v1171_v21 = vmul.f32 %v2201_v5, %v1011_v31 }
 0x11f   : > { %v1378_v27 = vmul.f32 %v1346_v15, %v2092_v62  ;;  %v1328_v51 = vadd.f32 1.0, %v1296_v58  ;;  %v1187_v39 = vmul.f32 %v1871_v37, %v1027_v30  ;;  %v977_v45 = vadd.f32 0.2548296, %v945_v44 }
 0x120   : > { %v1394_v55 = vmul.f32 1.7015043, %v1362_v63  ;;  %v1312_v62 = vsel %vm1248_vm5, %v1216_v38, %v1280_v47  ;;  %v1203_v33 = vsub.f32 1.0, %v1171_v21  ;;  %v929_v8 = vadd.f32 -0.28449672, %v897_v32 }
 0x121   : > { %v1410_v52 = vmul.f32 1.7015043, %v1378_v27  ;;  %v1360_v5 = vmul.f32 %v1328_v51, %v2114_v14  ;;  %v1344_v36 = vadd.f32 1.0, %v1312_v62  ;;  %v1219_v37 = vsub.f32 1.0, %v1187_v39  ;;  %v2275_v27 = vpop.f32.mrb[14].mxu1 }
 0x122   : > { %v1722_v28 = vpack.c.bf16 %v1394_v55, %v1394_v55  ;;  %v1267_v29 = vsub.f32 0.0, %v1203_v33  ;;  %v1009_v42 = vmul.f32 %v2194_v50, %v977_v45  ;;  %v961_v56 = vmul.f32 %v2206_v54, %v929_v8 }
 0x123   : > { %v1738_v0 = vpack.c.bf16 %v1410_v52, %v1410_v52  ;;  %v1392_v25 = vmul.f32 1.7015043, %v1360_v5  ;;  %v1376_v34 = vmul.f32 %v1344_v36, %v2122_v18  ;;  %v1283_v24 = vsub.f32 0.0, %v1219_v37 }
 0x124   : > { %1555 = vst.msk [vmem:[%s2253_s29 + $0x8] sm:$0xf] %vm1552_vm6, %v1722_v28  ;;  %v758_v41 = vmul.f32 1.0614054, %v2233_v40  ;;  %v1299_v14 = vsel %vm1235_vm7, %v1203_v33, %v1267_v29  ;;  %v1169_v50 = vmul.f32 %v2213_v53, %v1009_v42  ;;  %v993_v12 = vadd.f32 0.2548296, %v961_v56 }
 0x125   : > { %1571 = vst.msk [vmem:[%s2253_s29 + $0x48] sm:$0xf] %vm1552_vm6, %v1738_v0  ;;  %v1116_v15 = vmul.f32 1.442695, %v2197_v57  ;;  %v1720_v19 = vpack.c.bf16 %v1392_v25, %v1392_v25  ;;  %v1408_v38 = vmul.f32 1.7015043, %v1376_v34  ;;  %v1315_v18 = vsel %vm1251_vm8, %v1219_v37, %v1283_v24 }
 0x126   : > { %v1331_v31 = vadd.f32 1.0, %v1299_v14  ;;  %v1347_v63 = vadd.f32 1.0, %v1315_v18  ;;  %v1201_v30 = vsub.f32 1.0, %v1169_v50  ;;  %v1025_v44 = vmul.f32 %v2206_v54, %v993_v12  ;;  %v2308_v25 = vpop.f32.mrb[15].mxu0 }
 0x127   : > { %v790_v32 = vadd.f32 -1.4531521, %v758_v41  ;;  %1553 = vst.msk [vmem:[%s2253_s29] sm:$0xf] %vm1552_vm6, %v1720_v19  ;;  %v1736_v4 = vpack.c.bf16 %v1408_v38, %v1408_v38  ;;  %v2281_v57 = vmul.f32 0.70710677, %v2188_v9  ;;  %v2285_v10 = vadd.f32 %v2063_v20, %v2088_v60 }
 0x128   : > { %v1363_v53 = vmul.f32 %v1331_v31, %v2144_v43  ;;  %v1379_v58 = vmul.f32 %v1347_v63, %v2150_v48  ;;  %v1265_v47 = vsub.f32 0.0, %v1201_v30  ;;  %v1185_v54 = vmul.f32 %v2225_v49, %v1025_v44  ;;  %v2318_v19 = vpop.f32.mrb[15].mxu1 }
 0x129   : > { %v822_v21 = vmul.f32 %v2233_v40, %v790_v32  ;;  %1569 = vst.msk [vmem:[%s2253_s29 + $0x40] sm:$0xf] %vm1552_vm6, %v1736_v4  ;;  %vm1233_vm9 = vcmp.ge.f32.partialorder %v2118_v16, 0.0  ;;  %1878 = vpow2.f32 %v1116_v15  ;;  %v614_v43 = vand.u32 2147483647, %v2281_v57 }
 0x12a   : > { %v1395_v55 = vmul.f32 1.7015043, %v1363_v53  ;;  %v1411_v51 = vmul.f32 1.7015043, %v1379_v58  ;;  %v1297_v60 = vsel %vm1233_vm9, %v1201_v30, %v1265_v47  ;;  %v1217_v39 = vsub.f32 1.0, %v1185_v54 }
 0x12b   : > { %v854_v45 = vadd.f32 1.4214138, %v822_v21  ;;  %v1329_v52 = vadd.f32 1.0, %v1297_v60  ;;  %v646_v62 = vmul.f32 0.3275911, %v614_v43  ;;  %v482_v49 = vadd.f32 %v2063_v20, %v2090_v61 }
 0x12c   : > { %v1723_v48 = vpack.c.bf16 %v1395_v55, %v1395_v55  ;;  %v1739_v33 = vpack.c.bf16 %v1411_v51, %v1411_v51  ;;  %v1281_v8 = vsub.f32 0.0, %v1217_v39  ;;  %v2298_v16 = vmul.f32 0.70710677, %v2285_v10 }
 0x12d   : > { %v886_v28 = vmul.f32 %v2233_v40, %v854_v45  ;;  %v1361_v5 = vmul.f32 %v1329_v52, %v2173_v11  ;;  %vm1249_vm10 = vcmp.ge.f32.partialorder %v2132_v35, 0.0  ;;  %v678_v36 = vadd.f32 1.0, %v646_v62 }
 0x12e   : > { %1556 = vst.msk [vmem:[%s2253_s29 + $0xc] sm:$0xf] %vm1552_vm6, %v1723_v48  ;;  %1572 = vst.msk [vmem:[%s2253_s29 + $0x4c] sm:$0xf] %vm1552_vm6, %v1739_v33  ;;  %v1313_v37 = vsel %vm1249_vm10, %v1217_v39, %v1281_v8  ;;  %v596_v61 = vand.u32 2147483647, %v2298_v16  ;;  %v2315_v50 = vadd.f32 %v2095_v1, %v2063_v20  ;;  %v2329_v47 = vadd.f32 %v2097_v2, %v2063_v20 }
 0x12f   : > { %v918_v0 = vadd.f32 -0.28449672, %v886_v28  ;;  %v1393_v29 = vmul.f32 1.7015043, %v1361_v5  ;;  %v545_v42 = vmul.f32 0.5, %v2112_v13  ;;  %v1345_v56 = vadd.f32 1.0, %v1313_v37 }
 0x130   : > { %1880 = vrcp.f32 %v678_v36  ;;  %v628_v11 = vmul.f32 0.3275911, %v596_v61  ;;  %v2311_v24 = vmul.f32 0.70710677, %v482_v49  ;;  %v1062_v14 = vsub.f32 0.0, %v614_v43 }
 0x131   : > { %v950_v34 = vmul.f32 %v2233_v40, %v918_v0  ;;  %v1721_v35 = vpack.c.bf16 %v1393_v29, %v1393_v29  ;;  %v1377_v41 = vmul.f32 %v1345_v56, %v545_v42  ;;  %v2323_v18 = vmul.f32 0.70710677, %v2315_v50 }
 0x132   : > { %v660_v15 = vadd.f32 1.0, %v628_v11  ;;  %v612_v13 = vand.u32 2147483647, %v2311_v24  ;;  %v1094_v44 = vmul.f32 %v1062_v14, %v614_v43  ;;  %v1044_v53 = vsub.f32 0.0, %v596_v61 }
 0x133   : > { %v982_v12 = vadd.f32 0.2548296, %v950_v34  ;;  %v1879_v38 = vpop.eup %1878  ;;  %1554 = vst.msk [vmem:[%s2253_s29 + $0x4] sm:$0xf] %vm1552_vm6, %v1721_v35  ;;  %v1409_v31 = vmul.f32 1.7015043, %v1377_v41  ;;  %v2337_v21 = vadd.f32 %v2063_v20, %v2104_v6  ;;  %v2359_v28 = vadd.f32 %v2063_v20, %v2106_v7 }
 0x134   : > { %1882 = vrcp.f32 %v660_v15  ;;  %v644_v30 = vmul.f32 0.3275911, %v612_v13  ;;  %v599_v32 = vand.u32 2147483647, %v2323_v18  ;;  %v534_v54 = vmul.f32 0.5, %v2155_v59 }
 0x135   : > { %v1014_v63 = vmul.f32 %v2233_v40, %v982_v12  ;;  %v1737_v1 = vpack.c.bf16 %v1409_v31, %v1409_v31  ;;  %vm1238_vm11 = vcmp.ge.f32.partialorder %v2169_v26, 0.0  ;;  %v2340_v43 = vmul.f32 0.5, %v2188_v9 }
 0x136   : > { %v676_v58 = vadd.f32 1.0, %v644_v30  ;;  %v631_v40 = vmul.f32 0.3275911, %v599_v32  ;;  %v2343_v51 = vmul.f32 0.70710677, %v2329_v47  ;;  %v2348_v59 = vmul.f32 0.5, %v2285_v10 }
 0x137   : > { %v1174_v4 = vmul.f32 %v1879_v38, %v1014_v63  ;;  %1570 = vst.msk [vmem:[%s2253_s29 + $0x44] sm:$0xf] %vm1552_vm6, %v1737_v1  ;;  %v1148_v60 = vmul.f32 1.442695, %v1094_v44  ;;  %v1060_v39 = vsub.f32 0.0, %v612_v13  ;;  %v1076_v52 = vmul.f32 %v1044_v53, %v596_v61 }
 0x138   : > { %1884 = vrcp.f32 %v676_v58  ;;  %v663_v45 = vadd.f32 1.0, %v631_v40  ;;  %v615_v62 = vand.u32 2147483647, %v2343_v51  ;;  %v2352_v9 = vmul.f32 0.5, %v482_v49 }
 0x139   : > { %v1206_v55 = vsub.f32 1.0, %v1174_v4  ;;  %v1047_v33 = vsub.f32 0.0, %v599_v32  ;;  %v2355_v8 = vmul.f32 0.70710677, %v2337_v21  ;;  %v1092_v0 = vmul.f32 %v1060_v39, %v612_v13 }
 0x13a   : > { %v2345_v2 = vpop.eup %1880  ;;  %1886 = vrcp.f32 %v663_v45  ;;  %v647_v36 = vmul.f32 0.3275911, %v615_v62  ;;  %v1063_v61 = vsub.f32 0.0, %v615_v62  ;;  %v1112_v56 = vmul.f32 1.442695, %v1076_v52 }
 0x13b   : > { %v1270_v48 = vsub.f32 0.0, %v1206_v55  ;;  %v774_v6 = vmul.f32 1.0614054, %v2345_v2  ;;  %v597_v49 = vand.u32 2147483647, %v2355_v8  ;;  %1888 = vpow2.f32 %v1148_v60 }
 0x13c   : > { %v679_v34 = vadd.f32 1.0, %v647_v36  ;;  %v1079_v26 = vmul.f32 %v1047_v33, %v599_v32  ;;  %v2369_v12 = vmul.f32 0.70710677, %v2359_v28  ;;  %v1144_v38 = vmul.f32 1.442695, %v1092_v0 }
 0x13d   : > { %v1302_v10 = vsel %vm1238_vm11, %v1206_v55, %v1270_v48  ;;  %v806_v5 = vadd.f32 -1.4531521, %v774_v6  ;;  %v629_v35 = vmul.f32 0.3275911, %v597_v49  ;;  %v1045_v14 = vsub.f32 0.0, %v597_v49 }
 0x13e   : > { %v1334_v37 = vadd.f32 1.0, %v1302_v10  ;;  %v2364_v29 = vpop.eup %1882  ;;  %1890 = vrcp.f32 %v679_v34  ;;  %v1095_v31 = vmul.f32 %v1063_v61, %v615_v62  ;;  %v613_v32 = vand.u32 2147483647, %v2369_v12 }
 0x13f   : > { %v838_v42 = vmul.f32 %v2345_v2, %v806_v5  ;;  %v756_v11 = vmul.f32 1.0614054, %v2364_v29  ;;  %v661_v1 = vadd.f32 1.0, %v629_v35  ;;  %v1077_v44 = vmul.f32 %v1045_v14, %v597_v49 }
 0x140   : > { %v1366_v7 = vmul.f32 %v1334_v37, %v534_v54  ;;  %v1118_v54 = vmul.f32 1.442695, %v1079_v26  ;;  %v645_v55 = vmul.f32 0.3275911, %v613_v32  ;;  %v2379_v60 = vadd.f32 %v2120_v17, %v2063_v20 }
 0x141   : > { %v870_v41 = vadd.f32 1.4214138, %v838_v42  ;;  %v788_v13 = vadd.f32 -1.4531521, %v756_v11  ;;  %1892 = vrcp.f32 %v661_v1  ;;  %v1150_v48 = vmul.f32 1.442695, %v1095_v31 }
 0x142   : > { %v1398_v15 = vmul.f32 1.7015043, %v1366_v7  ;;  %v2371_v63 = vpop.eup %1884  ;;  %1894 = vpow2.f32 %v1112_v56  ;;  %v1114_v62 = vmul.f32 1.442695, %v1077_v44  ;;  %v677_v33 = vadd.f32 1.0, %v645_v55 }
 0x143   : > { %v902_v30 = vmul.f32 %v2345_v2, %v870_v41  ;;  %v820_v53 = vmul.f32 %v2364_v29, %v788_v13  ;;  %v772_v58 = vmul.f32 1.0614054, %v2371_v63  ;;  %1896 = vpow2.f32 %v1144_v38 }
 0x144   : > { %v1726_v4 = vpack.c.bf16 %v1398_v15, %v1398_v15  ;;  %v2383_v6 = vpop.eup %1886  ;;  %1898 = vpow2.f32 %v1118_v54  ;;  %v1061_v0 = vsub.f32 0.0, %v613_v32  ;;  %v2390_v61 = vmul.f32 0.70710677, %v2379_v60 }
 0x145   : > { %v934_v40 = vadd.f32 -0.28449672, %v902_v30  ;;  %v852_v39 = vadd.f32 1.4214138, %v820_v53  ;;  %v804_v45 = vadd.f32 -1.4531521, %v772_v58  ;;  %v1889_v36 = vpop.eup %1888  ;;  %1900 = vrcp.f32 %v677_v33 }
 0x146   : > { %1559 = vst.msk [vmem:[%s2253_s29 + $0x18] sm:$0xf] %vm1552_vm6, %v1726_v4  ;;  %v759_v17 = vmul.f32 1.0614054, %v2383_v6  ;;  %vm1254_vm12 = vcmp.ge.f32.partialorder %v2281_v57, 0.0  ;;  %1902 = vpow2.f32 %v1150_v48  ;;  %v2397_v11 = vmul.f32 0.5, %v2315_v50 }
 0x147   : > { %v966_v52 = vmul.f32 %v2345_v2, %v934_v40  ;;  %v884_v10 = vmul.f32 %v2364_v29, %v852_v39  ;;  %v836_v5 = vmul.f32 %v2371_v63, %v804_v45  ;;  %1904 = vpow2.f32 %v1114_v62 }
 0x148   : > { %v791_v56 = vadd.f32 -1.4531521, %v759_v17  ;;  %v2393_v34 = vpop.eup %1890  ;;  %v602_v26 = vand.u32 2147483647, %v2390_v61  ;;  %v1093_v38 = vmul.f32 %v1061_v0, %v613_v32  ;;  %v2406_v50 = vadd.f32 %v2124_v22, %v2063_v20 }
 0x149   : > { %v998_v37 = vadd.f32 0.2548296, %v966_v52  ;;  %v916_v49 = vadd.f32 -0.28449672, %v884_v10  ;;  %v868_v42 = vadd.f32 1.4214138, %v836_v5  ;;  %v2418_v33 = vadd.f32 %v2063_v20, %v2126_v23 }
 0x14a   : > { %v823_v14 = vmul.f32 %v2383_v6, %v791_v56  ;;  %v775_v15 = vmul.f32 1.0614054, %v2393_v34  ;;  %v634_v31 = vmul.f32 0.3275911, %v602_v26  ;;  %v1050_v30 = vsub.f32 0.0, %v602_v26 }
 0x14b   : > { %v1030_v7 = vmul.f32 %v2345_v2, %v998_v37  ;;  %v948_v35 = vmul.f32 %v2364_v29, %v916_v49  ;;  %v900_v41 = vmul.f32 %v2371_v63, %v868_v42  ;;  %v2408_v4 = vpop.eup %1892  ;;  %vm1236_vm13 = vcmp.ge.f32.partialorder %v2298_v16, 0.0 }
 0x14c   : > { %v855_v44 = vadd.f32 1.4214138, %v823_v14  ;;  %v807_v58 = vadd.f32 -1.4531521, %v775_v15  ;;  %v666_v54 = vadd.f32 1.0, %v634_v31  ;;  %v1082_v40 = vmul.f32 %v1050_v30, %v602_v26  ;;  %v1895_v55 = vpop.eup %1894 }
 0x14d   : > { %v1190_v13 = vmul.f32 %v1889_v36, %v1030_v7  ;;  %v980_v1 = vadd.f32 0.2548296, %v948_v35  ;;  %v932_v2 = vadd.f32 -0.28449672, %v900_v41  ;;  %v757_v48 = vmul.f32 1.0614054, %v2408_v4  ;;  %v1897_v52 = vpop.eup %1896 }
 0x14e   : > { %v887_v45 = vmul.f32 %v2383_v6, %v855_v44  ;;  %v839_v62 = vmul.f32 %v2393_v34, %v807_v58  ;;  %1906 = vrcp.f32 %v666_v54  ;;  %v1899_v10 = vpop.eup %1898  ;;  %vm1252_vm14 = vcmp.ge.f32.partialorder %v2311_v24, 0.0 }
 0x14f   : > { %v1222_v53 = vsub.f32 1.0, %v1190_v13  ;;  %v1012_v32 = vmul.f32 %v2364_v29, %v980_v1  ;;  %v964_v39 = vmul.f32 %v2371_v63, %v932_v2  ;;  %v789_v29 = vadd.f32 -1.4531521, %v757_v48  ;;  %v2420_v37 = vpop.eup %1900 }
 0x150   : > { %v919_v36 = vadd.f32 -0.28449672, %v887_v45  ;;  %v871_v49 = vadd.f32 1.4214138, %v839_v62  ;;  %v1146_v42 = vmul.f32 1.442695, %v1093_v38  ;;  %v1903_v7 = vpop.eup %1902 }
 0x151   : > { %v1286_v22 = vsub.f32 0.0, %v1222_v53  ;;  %v1172_v5 = vmul.f32 %v1895_v55, %v1012_v32  ;;  %v996_v17 = vadd.f32 0.2548296, %v964_v39  ;;  %v2425_v56 = vmul.f32 1.442695, %v1082_v40  ;;  %v2429_v41 = vpop.eup %1904 }
 0x152   : > { %v951_v35 = vmul.f32 %v2383_v6, %v919_v36  ;;  %v903_v14 = vmul.f32 %v2393_v34, %v871_v49  ;;  %v821_v57 = vmul.f32 %v2408_v4, %v789_v29  ;;  %v773_v15 = vmul.f32 1.0614054, %v2420_v37 }
 0x153   : > { %v1318_v0 = vsel %vm1254_vm12, %v1222_v53, %v1286_v22  ;;  %v1204_v20 = vsub.f32 1.0, %v1172_v5  ;;  %v1028_v23 = vmul.f32 %v2371_v63, %v996_v17  ;;  %v2435_v13 = vmul.f32 0.70710677, %v2406_v50 }
 0x154   : > { %v1350_v26 = vadd.f32 1.0, %v1318_v0  ;;  %v983_v1 = vadd.f32 0.2548296, %v951_v35  ;;  %vm1239_vm15 = vcmp.ge.f32.partialorder %v2323_v18, 0.0  ;;  %v935_v63 = vadd.f32 -0.28449672, %v903_v14 }
 0x155   : > { %v1268_v31 = vsub.f32 0.0, %v1204_v20  ;;  %v1188_v30 = vmul.f32 %v1897_v52, %v1028_v23  ;;  %v853_v2 = vadd.f32 1.4214138, %v821_v57  ;;  %v805_v44 = vadd.f32 -1.4531521, %v773_v15 }
 0x156   : > { %v1382_v38 = vmul.f32 %v1350_v26, %v2340_v43  ;;  %1908 = vpow2.f32 %v1146_v42  ;;  %v1015_v40 = vmul.f32 %v2383_v6, %v983_v1  ;;  %v967_v43 = vmul.f32 %v2393_v34, %v935_v63 }
 0x157   : > { %v1300_v58 = vsel %vm1236_vm13, %v1204_v20, %v1268_v31  ;;  %v1220_v54 = vsub.f32 1.0, %v1188_v30  ;;  %v885_v32 = vmul.f32 %v2408_v4, %v853_v2  ;;  %v837_v39 = vmul.f32 %v2420_v37, %v805_v44 }
 0x158   : > { %v1414_v53 = vmul.f32 1.7015043, %v1382_v38  ;;  %v1332_v55 = vadd.f32 1.0, %v1300_v58  ;;  %v1175_v52 = vmul.f32 %v1899_v10, %v1015_v40  ;;  %v2446_v22 = vand.u32 2147483647, %v2435_v13  ;;  %v2448_v62 = vpop.eup %1906 }
 0x159   : > { %v1284_v48 = vsub.f32 0.0, %v1220_v54  ;;  %v999_v5 = vadd.f32 0.2548296, %v967_v43  ;;  %v917_v17 = vadd.f32 -0.28449672, %v885_v32  ;;  %vm1255_vm0 = vcmp.ge.f32.partialorder %v2343_v51, 0.0 }
 0x15a   : > { %v1742_v45 = vpack.c.bf16 %v1414_v53, %v1414_v53  ;;  %v1364_v16 = vmul.f32 %v1332_v55, %v2348_v59  ;;  %v869_v6 = vadd.f32 1.4214138, %v837_v39  ;;  %v1207_v29 = vsub.f32 1.0, %v1175_v52 }
 0x15b   : > { %v1316_v36 = vsel %vm1252_vm14, %v1220_v54, %v1284_v48  ;;  %v762_v0 = vmul.f32 1.0614054, %v2448_v62  ;;  %v650_v10 = vmul.f32 0.3275911, %v2446_v22  ;;  %v1031_v26 = vmul.f32 %v2393_v34, %v999_v5 }
 0x15c   : > { %1575 = vst.msk [vmem:[%s2253_s29 + $0x58] sm:$0xf] %vm1552_vm6, %v1742_v45  ;;  %v1396_v49 = vmul.f32 1.7015043, %v1364_v16  ;;  %v1348_v42 = vadd.f32 1.0, %v1316_v36  ;;  %v949_v59 = vmul.f32 %v2408_v4, %v917_v17  ;;  %v1271_v20 = vsub.f32 0.0, %v1207_v29 }
 0x15d   : > { %v901_v23 = vmul.f32 %v2420_v37, %v869_v6  ;;  %v794_v35 = vadd.f32 -1.4531521, %v762_v0  ;;  %v682_v14 = vadd.f32 1.0, %v650_v10  ;;  %v1191_v15 = vmul.f32 %v1903_v7, %v1031_v26  ;;  %v2485_v17 = vld [vmem:[%s2806_s2] ss:$0 sm:$0xff] }
 0x15e   : > { %v1724_v57 = vpack.c.bf16 %v1396_v49, %v1396_v49  ;;  %v1380_v24 = vmul.f32 %v1348_v42, %v2352_v9  ;;  %v981_v38 = vadd.f32 0.2548296, %v949_v59  ;;  %v1303_v31 = vsel %vm1239_vm15, %v1207_v29, %v1271_v20  ;;  %v2816_v6 = vld [vmem:[#allocation2_spill] sm:$0xff] }
 0x15f   : > { %v933_v30 = vadd.f32 -0.28449672, %v901_v23  ;;  %v826_v1 = vmul.f32 %v2448_v62, %v794_v35  ;;  %1910 = vrcp.f32 %v682_v14  ;;  %v1335_v2 = vadd.f32 1.0, %v1303_v31 }
 0x160   : > { %v1909_v34 = vpop.eup %1908  ;;  %1557 = vst.msk [vmem:[%s2253_s29 + $0x10] sm:$0xf] %vm1552_vm6, %v1724_v57  ;;  %v1412_v63 = vmul.f32 1.7015043, %v1380_v24  ;;  %v1223_v44 = vsub.f32 1.0, %v1191_v15  ;;  %v1013_v53 = vmul.f32 %v2408_v4, %v981_v38  ;;  %1912 = vpow2.f32 %v2425_v56 }
 0x161   : > { %v965_v9 = vmul.f32 %v2420_v37, %v933_v30  ;;  %v858_v7 = vadd.f32 1.4214138, %v826_v1  ;;  %v1367_v58 = vmul.f32 %v1335_v2, %v2397_v11  ;;  %v1066_v32 = vsub.f32 0.0, %v2446_v22  ;;  %v2817_v1 = vld [vmem:[#allocation3_spill] sm:$0xff] }
 0x162   : > { %v1740_v18 = vpack.c.bf16 %v1412_v63, %v1412_v63  ;;  %v1287_v54 = vsub.f32 0.0, %v1223_v44  ;;  %v1173_v40 = vmul.f32 %v2429_v41, %v1013_v53  ;;  %v2477_v56 = vmul.f32 0.70710677, %v2418_v33 }
 0x163   : > { %v997_v55 = vadd.f32 0.2548296, %v965_v9  ;;  %v890_v43 = vmul.f32 %v2448_v62, %v858_v7  ;;  %v1399_v4 = vmul.f32 1.7015043, %v1367_v58  ;;  %v551_v11 = vmul.f32 0.5, %v2329_v47 }
 0x164   : > { %1573 = vst.msk [vmem:[%s2253_s29 + $0x50] sm:$0xf] %vm1552_vm6, %v1740_v18  ;;  %v1319_v39 = vsel %vm1255_vm0, %v1223_v44, %v1287_v54  ;;  %v1205_v45 = vsub.f32 1.0, %v1173_v40  ;;  %v600_v5 = vand.u32 2147483647, %v2477_v56  ;;  %v2489_v36 = vadd.f32 %v2485_v17, %v2816_v6 }
 0x165   : > { %v1351_v48 = vadd.f32 1.0, %v1319_v39  ;;  %v1029_v41 = vmul.f32 %v2420_v37, %v997_v55  ;;  %v922_v51 = vadd.f32 -0.28449672, %v890_v43  ;;  %v1727_v52 = vpack.c.bf16 %v1399_v4, %v1399_v4 }
 0x166   : > { %v1269_v16 = vsub.f32 0.0, %v1205_v45  ;;  %vm1237_vm1 = vcmp.ge.f32.partialorder %v2355_v8, 0.0  ;;  %v533_v0 = vmul.f32 0.5, %v2337_v21  ;;  %v1098_v49 = vmul.f32 %v1066_v32, %v2446_v22 }
 0x167   : > { %v1383_v29 = vmul.f32 %v1351_v48, %v551_v11  ;;  %v1189_v47 = vmul.f32 %v1909_v34, %v1029_v41  ;;  %v954_v37 = vmul.f32 %v2448_v62, %v922_v51  ;;  %1560 = vst.msk [vmem:[%s2253_s29 + $0x1c] sm:$0xf] %vm1552_vm6, %v1727_v52  ;;  %v632_v42 = vmul.f32 0.3275911, %v600_v5 }
 0x168   : > { %v1301_v10 = vsel %vm1237_vm1, %v1205_v45, %v1269_v16  ;;  %vm1253_vm2 = vcmp.ge.f32.partialorder %v2369_v12, 0.0  ;;  %v2502_v57 = vmul.f32 0.70710677, %v2489_v36  ;;  %v2508_v34 = vadd.f32 %v2485_v17, %v2817_v1  ;;  %v2819_v45 = vld [vmem:[#allocation5_spill] sm:$0xff] }
 0x169   : > { %v2497_v26 = vpop.eup %1910  ;;  %v1415_v59 = vmul.f32 1.7015043, %v1383_v29  ;;  %v1333_v20 = vadd.f32 1.0, %v1301_v10  ;;  %v1221_v23 = vsub.f32 1.0, %v1189_v47  ;;  %v986_v35 = vadd.f32 0.2548296, %v954_v37 }
 0x16a   : > { %v778_v8 = vmul.f32 1.0614054, %v2497_v26  ;;  %v664_v14 = vadd.f32 1.0, %v632_v42  ;;  %v1913_v21 = vpop.eup %1912  ;;  %v616_v30 = vand.u32 2147483647, %v2502_v57  ;;  %v549_v53 = vmul.f32 0.5, %v2359_v28 }
 0x16b   : > { %v1743_v24 = vpack.c.bf16 %v1415_v59, %v1415_v59  ;;  %v1365_v15 = vmul.f32 %v1333_v20, %v533_v0  ;;  %v1285_v22 = vsub.f32 0.0, %v1221_v23  ;;  %v1018_v38 = vmul.f32 %v2448_v62, %v986_v35  ;;  %v2818_v28 = vld [vmem:[#allocation4_spill] sm:$0xff] }
 0x16c   : > { %v810_v31 = vadd.f32 -1.4531521, %v778_v8  ;;  %1914 = vrcp.f32 %v664_v14  ;;  %v1156_v44 = vmul.f32 1.442695, %v1098_v49  ;;  %v648_v7 = vmul.f32 0.3275911, %v616_v30 }
 0x16d   : > { %1576 = vst.msk [vmem:[%s2253_s29 + $0x5c] sm:$0xf] %vm1552_vm6, %v1743_v24  ;;  %v1397_v12 = vmul.f32 1.7015043, %v1365_v15  ;;  %v1317_v63 = vsel %vm1253_vm2, %v1221_v23, %v1285_v22  ;;  %v1178_v2 = vmul.f32 %v1913_v21, %v1018_v38  ;;  %vm1242_vm3 = vcmp.ge.f32.partialorder %v2390_v61, 0.0 }
 0x16e   : > { %v1349_v9 = vadd.f32 1.0, %v1317_v63  ;;  %v842_v62 = vmul.f32 %v2497_v26, %v810_v31  ;;  %v1048_v54 = vsub.f32 0.0, %v600_v5  ;;  %v680_v43 = vadd.f32 1.0, %v648_v7 }
 0x16f   : > { %v1725_v18 = vpack.c.bf16 %v1397_v12, %v1397_v12  ;;  %v1210_v58 = vsub.f32 1.0, %v1178_v2  ;;  %v2516_v32 = vmul.f32 0.70710677, %v2508_v34  ;;  %1916 = vpow2.f32 %v1156_v44 }
 0x170   : > { %v1381_v40 = vmul.f32 %v1349_v9, %v549_v53  ;;  %v874_v55 = vadd.f32 1.4214138, %v842_v62  ;;  %v509_v39 = vadd.f32 %v2485_v17, %v2818_v28  ;;  %v2524_v11 = vadd.f32 %v2485_v17, %v2819_v45  ;;  %v2820_v9 = vld [vmem:[#allocation6_spill] sm:$0xff] }
 0x171   : > { %1558 = vst.msk [vmem:[%s2253_s29 + $0x14] sm:$0xf] %vm1552_vm6, %v1725_v18  ;;  %v1274_v4 = vsub.f32 0.0, %v1210_v58  ;;  %1918 = vrcp.f32 %v680_v43  ;;  %v603_v51 = vand.u32 2147483647, %v2516_v32  ;;  %v538_v52 = vmul.f32 0.5, %v2379_v60 }
 0x172   : > { %v1413_v48 = vmul.f32 1.7015043, %v1381_v40  ;;  %v906_v41 = vmul.f32 %v2497_v26, %v874_v55  ;;  %v1080_v6 = vmul.f32 %v1048_v54, %v600_v5  ;;  %v1064_v29 = vsub.f32 0.0, %v616_v30 }
 0x173   : > { %v1306_v16 = vsel %vm1242_vm3, %v1210_v58, %v1274_v4  ;;  %v635_v10 = vmul.f32 0.3275911, %v603_v51  ;;  %v2531_v49 = vmul.f32 0.70710677, %v509_v39  ;;  %v2539_v60 = vmul.f32 0.70710677, %v2524_v11 }
 0x174   : > { %v1741_v47 = vpack.c.bf16 %v1413_v48, %v1413_v48  ;;  %v1338_v37 = vadd.f32 1.0, %v1306_v16  ;;  %v938_v0 = vadd.f32 -0.28449672, %v906_v41  ;;  %v1120_v5 = vmul.f32 1.442695, %v1080_v6 }
 0x175   : > { %v667_v23 = vadd.f32 1.0, %v635_v10  ;;  %v1096_v35 = vmul.f32 %v1064_v29, %v616_v30  ;;  %v619_v8 = vand.u32 2147483647, %v2531_v49  ;;  %v601_v24 = vand.u32 2147483647, %v2539_v60 }
 0x176   : > { %v2533_v42 = vpop.eup %1914  ;;  %1574 = vst.msk [vmem:[%s2253_s29 + $0x54] sm:$0xf] %vm1552_vm6, %v1741_v47  ;;  %v1370_v59 = vmul.f32 %v1338_v37, %v538_v52  ;;  %v970_v20 = vmul.f32 %v2497_v26, %v938_v0  ;;  %v554_v15 = vmul.f32 0.5, %v2406_v50  ;;  %vm1258_vm4 = vcmp.ge.f32.partialorder %v2435_v13, 0.0  ;;  %v2821_v52 = vld [vmem:[#allocation7_spill] sm:$0xff] }
 0x177   : > { %v760_v61 = vmul.f32 1.0614054, %v2533_v42  ;;  %1920 = vrcp.f32 %v667_v23  ;;  %v651_v38 = vmul.f32 0.3275911, %v619_v8  ;;  %v1051_v12 = vsub.f32 0.0, %v603_v51 }
 0x178   : > { %v1402_v14 = vmul.f32 1.7015043, %v1370_v59  ;;  %v1002_v21 = vadd.f32 0.2548296, %v970_v20  ;;  %v633_v63 = vmul.f32 0.3275911, %v601_v24  ;;  %v2553_v62 = vadd.f32 %v2485_v17, %v2820_v9 }
 0x179   : > { %v792_v22 = vadd.f32 -1.4531521, %v760_v61  ;;  %v1917_v30 = vpop.eup %1916  ;;  %v2548_v2 = vmul.f32 0.5, %v2418_v33  ;;  %v683_v53 = vadd.f32 1.0, %v651_v38  ;;  %1922 = vpow2.f32 %v1120_v5 }
 0x17a   : > { %v1730_v31 = vpack.c.bf16 %v1402_v14, %v1402_v14  ;;  %v1034_v1 = vmul.f32 %v2497_v26, %v1002_v21  ;;  %v1152_v26 = vmul.f32 1.442695, %v1096_v35  ;;  %v665_v18 = vadd.f32 1.0, %v633_v63 }
 0x17b   : > { %v824_v44 = vmul.f32 %v2533_v42, %v792_v22  ;;  %v2555_v50 = vpop.eup %1918  ;;  %v2560_v54 = vmul.f32 0.5, %v2489_v36  ;;  %1924 = vrcp.f32 %v683_v53  ;;  %v2564_v55 = vmul.f32 0.5, %v2508_v34 }
 0x17c   : > { %1563 = vst.msk [vmem:[%s2253_s29 + $0x28] sm:$0xf] %vm1552_vm6, %v1730_v31  ;;  %v1194_v7 = vmul.f32 %v1917_v30, %v1034_v1  ;;  %v776_v33 = vmul.f32 1.0614054, %v2555_v50  ;;  %v1083_v43 = vmul.f32 %v1051_v12, %v603_v51  ;;  %1926 = vrcp.f32 %v665_v18  ;;  %v2822_v30 = vld [vmem:[#allocation8_spill] sm:$0xff] }
 0x17d   : > { %v856_v58 = vadd.f32 1.4214138, %v824_v44  ;;  %v2567_v45 = vmul.f32 0.5, %v509_v39  ;;  %v2570_v48 = vmul.f32 0.70710677, %v2553_v62  ;;  %1928 = vpow2.f32 %v1152_v26 }
 0x17e   : > { %v1226_v40 = vsub.f32 1.0, %v1194_v7  ;;  %v808_v28 = vadd.f32 -1.4531521, %v776_v33  ;;  %v1067_v36 = vsub.f32 0.0, %v619_v8  ;;  %v2574_v16 = vadd.f32 %v2485_v17, %v2821_v52 }
 0x17f   : > { %v888_v4 = vmul.f32 %v2533_v42, %v856_v58  ;;  %v2578_v51 = vmul.f32 0.5, %v2524_v11  ;;  %v617_v29 = vand.u32 2147483647, %v2570_v48  ;;  %v1126_v37 = vmul.f32 1.442695, %v1083_v43 }
 0x180   : > { %v1290_v41 = vsub.f32 0.0, %v1226_v40  ;;  %v840_v34 = vmul.f32 %v2555_v50, %v808_v28  ;;  %v1049_v0 = vsub.f32 0.0, %v601_v24  ;;  %v2586_v10 = vmul.f32 0.70710677, %v2574_v16 }
 0x181   : > { %v920_v6 = vadd.f32 -0.28449672, %v888_v4  ;;  %v2581_v39 = vpop.eup %1920  ;;  %v1099_v11 = vmul.f32 %v1067_v36, %v619_v8  ;;  %v649_v5 = vmul.f32 0.3275911, %v617_v29  ;;  %v1065_v35 = vsub.f32 0.0, %v617_v29 }
 0x182   : > { %v1322_v47 = vsel %vm1258_vm4, %v1226_v40, %v1290_v41  ;;  %v872_v23 = vadd.f32 1.4214138, %v840_v34  ;;  %v763_v61 = vmul.f32 1.0614054, %v2581_v39  ;;  %v2591_v14 = vand.u32 2147483647, %v2586_v10 }
 0x183   : > { %v1354_v59 = vadd.f32 1.0, %v1322_v47  ;;  %v952_v20 = vmul.f32 %v2533_v42, %v920_v6  ;;  %v1923_v31 = vpop.eup %1922  ;;  %vm1240_vm5 = vcmp.ge.f32.partialorder %v2477_v56, 0.0  ;;  %v1081_v1 = vmul.f32 %v1049_v0, %v601_v24 }
 0x184   : > { %v904_v22 = vmul.f32 %v2555_v50, %v872_v23  ;;  %v795_v38 = vadd.f32 -1.4531521, %v763_v61  ;;  %v681_v12 = vadd.f32 1.0, %v649_v5  ;;  %v638_v63 = vmul.f32 0.3275911, %v2591_v14 }
 0x185   : > { %v1386_v21 = vmul.f32 %v1354_v59, %v554_v15  ;;  %v984_v13 = vadd.f32 0.2548296, %v952_v20  ;;  %v2598_v8 = vadd.f32 %v2485_v17, %v2822_v30  ;;  %v2600_v44 = vpop.eup %1924  ;;  %v1097_v18 = vmul.f32 %v1065_v35, %v617_v29 }
 0x186   : > { %v936_v9 = vadd.f32 -0.28449672, %v904_v22  ;;  %v827_v7 = vmul.f32 %v2581_v39, %v795_v38  ;;  %v2604_v26 = vpop.eup %1926  ;;  %v779_v24 = vmul.f32 1.0614054, %v2600_v44  ;;  %1930 = vrcp.f32 %v681_v12 }
 0x187   : > { %v1418_v53 = vmul.f32 1.7015043, %v1386_v21  ;;  %v1016_v15 = vmul.f32 %v2533_v42, %v984_v13  ;;  %v670_v58 = vadd.f32 1.0, %v638_v63  ;;  %v1929_v28 = vpop.eup %1928  ;;  %1932 = vpow2.f32 %v1126_v37 }
 0x188   : > { %v968_v43 = vmul.f32 %v2555_v50, %v936_v9  ;;  %v859_v4 = vadd.f32 1.4214138, %v827_v7  ;;  %v811_v41 = vadd.f32 -1.4531521, %v779_v24  ;;  %v1158_v42 = vmul.f32 1.442695, %v1099_v11 }
 0x189   : > { %v1746_v33 = vpack.c.bf16 %v1418_v53, %v1418_v53  ;;  %v1176_v40 = vmul.f32 %v1923_v31, %v1016_v15  ;;  %v761_v36 = vmul.f32 1.0614054, %v2604_v26  ;;  %1934 = vrcp.f32 %v670_v58 }
 0x18a   : > { %v1000_v6 = vadd.f32 0.2548296, %v968_v43  ;;  %v891_v34 = vmul.f32 %v2581_v39, %v859_v4  ;;  %vm1256_vm7 = vcmp.ge.f32.partialorder %v2502_v57, 0.0  ;;  %v843_v29 = vmul.f32 %v2600_v44, %v811_v41  ;;  %v2823_v41 = vld [vmem:[#allocation9_spill] sm:$0xff] }
 0x18b   : > { %1579 = vst.msk [vmem:[%s2253_s29 + $0x68] sm:$0xf] %vm1552_vm6, %v1746_v33  ;;  %v1208_v52 = vsub.f32 1.0, %v1176_v40  ;;  %v793_v47 = vadd.f32 -1.4531521, %v761_v36  ;;  %1936 = vpow2.f32 %v1158_v42  ;;  %v1054_v35 = vsub.f32 0.0, %v2591_v14 }
 0x18c   : > { %v1122_v0 = vmul.f32 1.442695, %v1081_v1  ;;  %v1154_v59 = vmul.f32 1.442695, %v1097_v18  ;;  %v1032_v37 = vmul.f32 %v2555_v50, %v1000_v6  ;;  %v923_v23 = vadd.f32 -0.28449672, %v891_v34 }
 0x18d   : > { %v1272_v20 = vsub.f32 0.0, %v1208_v52  ;;  %v2616_v61 = vmul.f32 0.70710677, %v2598_v8  ;;  %v875_v11 = vadd.f32 1.4214138, %v843_v29  ;;  %v825_v5 = vmul.f32 %v2604_v26, %v793_v47 }
 0x18e   : > { %v1192_v13 = vmul.f32 %v1929_v28, %v1032_v37  ;;  %v955_v22 = vmul.f32 %v2581_v39, %v923_v23  ;;  %1938 = vpow2.f32 %v1122_v0  ;;  %vm1243_vm8 = vcmp.ge.f32.partialorder %v2516_v32, 0.0 }
 0x18f   : > { %v1304_v21 = vsel %vm1240_vm5, %v1208_v52, %v1272_v20  ;;  %v2624_v38 = vand.u32 2147483647, %v2616_v61  ;;  %v907_v31 = vmul.f32 %v2600_v44, %v875_v11  ;;  %v857_v1 = vadd.f32 1.4214138, %v825_v5 }
 0x190   : > { %v1336_v50 = vadd.f32 1.0, %v1304_v21  ;;  %v1224_v12 = vsub.f32 1.0, %v1192_v13  ;;  %v987_v63 = vadd.f32 0.2548296, %v955_v22  ;;  %1940 = vpow2.f32 %v1154_v59  ;;  %v2628_v53 = vpop.eup %1930 }
 0x191   : > { %v654_v30 = vmul.f32 0.3275911, %v2624_v38  ;;  %v939_v15 = vadd.f32 -0.28449672, %v907_v31  ;;  %v889_v9 = vmul.f32 %v2604_v26, %v857_v1  ;;  %v1086_v7 = vmul.f32 %v1054_v35, %v2591_v14  ;;  %v1933_v40 = vpop.eup %1932 }
 0x192   : > { %v1368_v56 = vmul.f32 %v1336_v50, %v2548_v2  ;;  %v1288_v24 = vsub.f32 0.0, %v1224_v12  ;;  %v1019_v18 = vmul.f32 %v2581_v39, %v987_v63  ;;  %v777_v58 = vmul.f32 1.0614054, %v2628_v53 }
 0x193   : > { %v686_v33 = vadd.f32 1.0, %v654_v30  ;;  %v971_v4 = vmul.f32 %v2600_v44, %v939_v15  ;;  %v921_v28 = vadd.f32 -0.28449672, %v889_v9  ;;  %v2639_v2 = vadd.f32 %v2485_v17, %v2823_v41  ;;  %v2641_v42 = vpop.eup %1934 }
 0x194   : > { %v1400_v43 = vmul.f32 1.7015043, %v1368_v56  ;;  %v1320_v14 = vsel %vm1256_vm7, %v1224_v12, %v1288_v24  ;;  %v1179_v36 = vmul.f32 %v1933_v40, %v1019_v18  ;;  %v809_v39 = vadd.f32 -1.4531521, %v777_v58 }
 0x195   : > { %1942 = vrcp.f32 %v686_v33  ;;  %v1352_v6 = vadd.f32 1.0, %v1320_v14  ;;  %v1003_v34 = vadd.f32 0.2548296, %v971_v4  ;;  %v953_v29 = vmul.f32 %v2604_v26, %v921_v28  ;;  %v1937_v37 = vpop.eup %1936 }
 0x196   : > { %v1728_v52 = vpack.c.bf16 %v1400_v43, %v1400_v43  ;;  %v1211_v47 = vsub.f32 1.0, %v1179_v36  ;;  %vm1259_vm9 = vcmp.ge.f32.partialorder %v2531_v49, 0.0  ;;  %v841_v0 = vmul.f32 %v2628_v53, %v809_v39 }
 0x197   : > { %v766_v59 = vmul.f32 1.0614054, %v2641_v42  ;;  %v1132_v20 = vmul.f32 1.442695, %v1086_v7  ;;  %v1384_v57 = vmul.f32 %v1352_v6, %v2560_v54  ;;  %v1035_v23 = vmul.f32 %v2600_v44, %v1003_v34 }
 0x198   : > { %1561 = vst.msk [vmem:[%s2253_s29 + $0x20] sm:$0xf] %vm1552_vm6, %v1728_v52  ;;  %v985_v11 = vadd.f32 0.2548296, %v953_v29  ;;  %v2654_v5 = vmul.f32 0.70710677, %v2639_v2  ;;  %v1939_v50 = vpop.eup %1938  ;;  %v2677_v36 = vadd.f32 %v2485_v17, %v2229_v3 }
 0x199   : > { %v1275_v35 = vsub.f32 0.0, %v1211_v47  ;;  %v873_v21 = vadd.f32 1.4214138, %v841_v0  ;;  %v798_v13 = vadd.f32 -1.4531521, %v766_v59  ;;  %v1070_v22 = vsub.f32 0.0, %v2624_v38 }
 0x19a   : > { %v1416_v31 = vmul.f32 1.7015043, %v1384_v57  ;;  %v1195_v1 = vmul.f32 %v1937_v37, %v1035_v23  ;;  %v1017_v12 = vmul.f32 %v2604_v26, %v985_v11  ;;  %v2659_v63 = vand.u32 2147483647, %v2654_v5  ;;  %v1941_v54 = vpop.eup %1940 }
 0x19b   : > { %v1307_v44 = vsel %vm1243_vm8, %v1211_v47, %v1275_v35  ;;  %vm1241_vm10 = vcmp.ge.f32.partialorder %v2539_v60, 0.0  ;;  %v905_v30 = vmul.f32 %v2628_v53, %v873_v21  ;;  %v830_v56 = vmul.f32 %v2641_v42, %v798_v13 }
 0x19c   : > { %v1744_v15 = vpack.c.bf16 %v1416_v31, %v1416_v31  ;;  %v1339_v9 = vadd.f32 1.0, %v1307_v44  ;;  %v1227_v7 = vsub.f32 1.0, %v1195_v1  ;;  %v1177_v24 = vmul.f32 %v1939_v50, %v1017_v12 }
 0x19d   : > { %v937_v18 = vadd.f32 -0.28449672, %v905_v30  ;;  %v862_v58 = vadd.f32 1.4214138, %v830_v56  ;;  %1944 = vpow2.f32 %v1132_v20  ;;  %v636_v26 = vmul.f32 0.3275911, %v2659_v63 }
 0x19e   : > { %1577 = vst.msk [vmem:[%s2253_s29 + $0x60] sm:$0xf] %vm1552_vm6, %v1744_v15  ;;  %v1371_v32 = vmul.f32 %v1339_v9, %v2564_v55  ;;  %v1291_v33 = vsub.f32 0.0, %v1227_v7  ;;  %v1209_v40 = vsub.f32 1.0, %v1177_v24  ;;  %v1102_v43 = vmul.f32 %v1070_v22, %v2624_v38 }
 0x19f   : > { %v2671_v4 = vpop.eup %1942  ;;  %v969_v28 = vmul.f32 %v2628_v53, %v937_v18  ;;  %v894_v41 = vmul.f32 %v2641_v42, %v862_v58  ;;  %v668_v14 = vadd.f32 1.0, %v636_v26  ;;  %v2691_v11 = vmul.f32 0.70710677, %v2677_v36 }
 0x1a0   : > { %v1403_v39 = vmul.f32 1.7015043, %v1371_v32  ;;  %v1323_v55 = vsel %vm1259_vm9, %v1227_v7, %v1291_v33  ;;  %v1273_v52 = vsub.f32 0.0, %v1209_v40  ;;  %v782_v6 = vmul.f32 1.0614054, %v2671_v4 }
 0x1a1   : > { %v1355_v38 = vadd.f32 1.0, %v1323_v55  ;;  %v1001_v34 = vadd.f32 0.2548296, %v969_v28  ;;  %v926_v29 = vadd.f32 -0.28449672, %v894_v41  ;;  %1946 = vrcp.f32 %v668_v14 }
 0x1a2   : > { %v1731_v47 = vpack.c.bf16 %v1403_v39, %v1403_v39  ;;  %v1305_v0 = vsel %vm1241_vm10, %v1209_v40, %v1273_v52  ;;  %v814_v59 = vadd.f32 -1.4531521, %v782_v6  ;;  %v1164_v20 = vmul.f32 1.442695, %v1102_v43 }
 0x1a3   : > { %v1387_v3 = vmul.f32 %v1355_v38, %v2567_v45  ;;  %v1337_v37 = vadd.f32 1.0, %v1305_v0  ;;  %v1033_v49 = vmul.f32 %v2628_v53, %v1001_v34  ;;  %v958_v57 = vmul.f32 %v2641_v42, %v926_v29 }
 0x1a4   : > { %1564 = vst.msk [vmem:[%s2253_s29 + $0x2c] sm:$0xf] %vm1552_vm6, %v1731_v47  ;;  %v846_v23 = vmul.f32 %v2671_v4, %v814_v59  ;;  %v2695_v60 = vadd.f32 %v2485_v17, %v2264_v46  ;;  %1948 = vpow2.f32 %v1164_v20  ;;  %v1052_v22 = vsub.f32 0.0, %v2659_v63 }
 0x1a5   : > { %v1419_v35 = vmul.f32 1.7015043, %v1387_v3  ;;  %v1369_v45 = vmul.f32 %v1337_v37, %v2578_v51  ;;  %v1193_v21 = vmul.f32 %v1941_v54, %v1033_v49  ;;  %v990_v13 = vadd.f32 0.2548296, %v958_v57 }
 0x1a6   : > { %v878_v53 = vadd.f32 1.4214138, %v846_v23  ;;  %v620_v50 = vand.u32 2147483647, %v2691_v11  ;;  %v2705_v9 = vmul.f32 0.70710677, %v2695_v60  ;;  %v1084_v32 = vmul.f32 %v1052_v22, %v2659_v63 }
 0x1a7   : > { %v1945_v31 = vpop.eup %1944  ;;  %v1747_v1 = vpack.c.bf16 %v1419_v35, %v1419_v35  ;;  %v1401_v12 = vmul.f32 1.7015043, %v1369_v45  ;;  %v1225_v44 = vsub.f32 1.0, %v1193_v21  ;;  %v1022_v46 = vmul.f32 %v2641_v42, %v990_v13 }
 0x1a8   : > { %v910_v30 = vmul.f32 %v2671_v4, %v878_v53  ;;  %v652_v56 = vmul.f32 0.3275911, %v620_v50  ;;  %v553_v7 = vmul.f32 0.5, %v2553_v62  ;;  %vm1257_vm11 = vcmp.ge.f32.partialorder %v2570_v48, 0.0 }
 0x1a9   : > { %1580 = vst.msk [vmem:[%s2253_s29 + $0x6c] sm:$0xf] %vm1552_vm6, %v1747_v1  ;;  %v1729_v51 = vpack.c.bf16 %v1401_v12, %v1401_v12  ;;  %v1289_v54 = vsub.f32 0.0, %v1225_v44  ;;  %v1182_v15 = vmul.f32 %v1945_v31, %v1022_v46  ;;  %v607_v33 = vand.u32 2147483647, %v2705_v9 }
 0x1aa   : > { %v942_v24 = vadd.f32 -0.28449672, %v910_v30  ;;  %v684_v18 = vadd.f32 1.0, %v652_v56  ;;  %v2719_v41 = vadd.f32 %v2485_v17, %v2275_v27  ;;  %vm1246_vm12 = vcmp.ge.f32.partialorder %v2586_v10, 0.0 }
 0x1ab   : > { %v2709_v58 = vpop.eup %1946  ;;  %1562 = vst.msk [vmem:[%s2253_s29 + $0x24] sm:$0xf] %vm1552_vm6, %v1729_v51  ;;  %v1321_v42 = vsel %vm1257_vm11, %v1225_v44, %v1289_v54  ;;  %v1214_v26 = vsub.f32 1.0, %v1182_v15  ;;  %v639_v48 = vmul.f32 0.3275911, %v607_v33  ;;  %v542_v63 = vmul.f32 0.5, %v2574_v16 }
 0x1ac   : > { %v1353_v40 = vadd.f32 1.0, %v1321_v42  ;;  %v974_v43 = vmul.f32 %v2671_v4, %v942_v24  ;;  %v764_v28 = vmul.f32 1.0614054, %v2709_v58  ;;  %1950 = vrcp.f32 %v684_v18 }
 0x1ad   : > { %v1278_v62 = vsub.f32 0.0, %v1214_v26  ;;  %v1128_v6 = vmul.f32 1.442695, %v1084_v32  ;;  %v671_v38 = vadd.f32 1.0, %v639_v48  ;;  %v1068_v27 = vsub.f32 0.0, %v620_v50 }
 0x1ae   : > { %v1385_v14 = vmul.f32 %v1353_v40, %v553_v7  ;;  %v1006_v39 = vadd.f32 0.2548296, %v974_v43  ;;  %v796_v55 = vadd.f32 -1.4531521, %v764_v28  ;;  %v1949_v34 = vpop.eup %1948  ;;  %v2726_v20 = vmul.f32 0.70710677, %v2719_v41 }
 0x1af   : > { %v1310_v52 = vsel %vm1246_vm12, %v1214_v26, %v1278_v62  ;;  %1952 = vrcp.f32 %v671_v38  ;;  %v2730_v10 = vadd.f32 %v2485_v17, %v2308_v25  ;;  %v1100_v21 = vmul.f32 %v1068_v27, %v620_v50 }
 0x1b0   : > { %v1417_v29 = vmul.f32 1.7015043, %v1385_v14  ;;  %v1342_v47 = vadd.f32 1.0, %v1310_v52  ;;  %v1038_v0 = vmul.f32 %v2671_v4, %v1006_v39  ;;  %v828_v59 = vmul.f32 %v2709_v58, %v796_v55 }
 0x1b1   : > { %1954 = vpow2.f32 %v1128_v6  ;;  %v623_v57 = vand.u32 2147483647, %v2726_v20  ;;  %v2737_v45 = vmul.f32 0.70710677, %v2730_v10  ;;  %v1055_v25 = vsub.f32 0.0, %v607_v33 }
 0x1b2   : > { %v1745_v16 = vpack.c.bf16 %v1417_v29, %v1417_v29  ;;  %v1374_v3 = vmul.f32 %v1342_v47, %v542_v63  ;;  %v1198_v37 = vmul.f32 %v1949_v34, %v1038_v0  ;;  %v860_v49 = vadd.f32 1.4214138, %v828_v59 }
 0x1b3   : > { %v655_v13 = vmul.f32 0.3275911, %v623_v57  ;;  %v605_v12 = vand.u32 2147483647, %v2737_v45  ;;  %vm1262_vm13 = vcmp.ge.f32.partialorder %v2616_v61, 0.0  ;;  %v2746_v30 = vadd.f32 %v2485_v17, %v2318_v19 }
 0x1b4   : > { %1578 = vst.msk [vmem:[%s2253_s29 + $0x64] sm:$0xf] %vm1552_vm6, %v1745_v16  ;;  %v1406_v4 = vmul.f32 1.7015043, %v1374_v3  ;;  %v1230_v23 = vsub.f32 1.0, %v1198_v37  ;;  %v892_v35 = vmul.f32 %v2709_v58, %v860_v49  ;;  %v558_v54 = vmul.f32 0.5, %v2598_v8 }
 0x1b5   : > { %v687_v46 = vadd.f32 1.0, %v655_v13  ;;  %v637_v51 = vmul.f32 0.3275911, %v605_v12  ;;  %v1160_v61 = vmul.f32 1.442695, %v1100_v21  ;;  %v1087_v18 = vmul.f32 %v1055_v25, %v607_v33 }
 0x1b6   : > { %v2739_v53 = vpop.eup %1950  ;;  %v1734_v22 = vpack.c.bf16 %v1406_v4, %v1406_v4  ;;  %v1294_v31 = vsub.f32 0.0, %v1230_v23  ;;  %v924_v1 = vadd.f32 -0.28449672, %v892_v35  ;;  %v2754_v17 = vmul.f32 0.70710677, %v2746_v30 }
 0x1b7   : > { %v780_v44 = vmul.f32 1.0614054, %v2739_v53  ;;  %1956 = vrcp.f32 %v687_v46  ;;  %v669_v42 = vadd.f32 1.0, %v637_v51  ;;  %v1134_v39 = vmul.f32 1.442695, %v1087_v18 }
 0x1b8   : > { %1567 = vst.msk [vmem:[%s2253_s29 + $0x38] sm:$0xf] %vm1552_vm6, %v1734_v22  ;;  %v1326_v50 = vsel %vm1262_vm13, %v1230_v23, %v1294_v31  ;;  %v956_v56 = vmul.f32 %v2709_v58, %v924_v1  ;;  %v621_v48 = vand.u32 2147483647, %v2754_v17  ;;  %v1071_v52 = vsub.f32 0.0, %v623_v57 }
 0x1b9   : > { %v1358_v15 = vadd.f32 1.0, %v1326_v50  ;;  %v812_v7 = vadd.f32 -1.4531521, %v780_v44  ;;  %v1953_v26 = vpop.eup %1952  ;;  %1958 = vrcp.f32 %v669_v42  ;;  %v1053_v59 = vsub.f32 0.0, %v605_v12 }
 0x1ba   : > { %v988_v24 = vadd.f32 0.2548296, %v956_v56  ;;  %v767_v43 = vmul.f32 1.0614054, %v1953_v26  ;;  %1960 = vpow2.f32 %v1160_v61  ;;  %v653_v6 = vmul.f32 0.3275911, %v621_v48 }
 0x1bb   : > { %v1390_v32 = vmul.f32 %v1358_v15, %v558_v54  ;;  %v844_v19 = vmul.f32 %v2739_v53, %v812_v7  ;;  %v1955_v8 = vpop.eup %1954  ;;  %1962 = vpow2.f32 %v1134_v39  ;;  %vm1244_vm14 = vcmp.ge.f32.partialorder %v2654_v5, 0.0 }
 0x1bc   : > { %v1020_v40 = vmul.f32 %v2709_v58, %v988_v24  ;;  %v799_v33 = vadd.f32 -1.4531521, %v767_v43  ;;  %v685_v29 = vadd.f32 1.0, %v653_v6  ;;  %v1103_v3 = vmul.f32 %v1071_v52, %v623_v57 }
 0x1bd   : > { %v1422_v28 = vmul.f32 1.7015043, %v1390_v32  ;;  %v876_v62 = vadd.f32 1.4214138, %v844_v19  ;;  %v540_v23 = vmul.f32 0.5, %v2639_v2  ;;  %v1085_v31 = vmul.f32 %v1053_v59, %v605_v12 }
 0x1be   : > { %v1180_v14 = vmul.f32 %v1955_v8, %v1020_v40  ;;  %v831_v34 = vmul.f32 %v1953_v26, %v799_v33  ;;  %1964 = vrcp.f32 %v685_v29  ;;  %v1166_v44 = vmul.f32 1.442695, %v1103_v3 }
 0x1bf   : > { %v1750_v55 = vpack.c.bf16 %v1422_v28, %v1422_v28  ;;  %v908_v63 = vmul.f32 %v2739_v53, %v876_v62  ;;  %v1069_v15 = vsub.f32 0.0, %v621_v48  ;;  %v1130_v61 = vmul.f32 1.442695, %v1085_v31 }
 0x1c0   : > { %v1212_v38 = vsub.f32 1.0, %v1180_v14  ;;  %v863_v0 = vadd.f32 1.4214138, %v831_v34  ;;  %1966 = vpow2.f32 %v1166_v44  ;;  %vm1260_vm15 = vcmp.ge.f32.partialorder %v2691_v11, 0.0 }
 0x1c1   : > { %1583 = vst.msk [vmem:[%s2253_s29 + $0x78] sm:$0xf] %vm1552_vm6, %v1750_v55  ;;  %v940_v58 = vadd.f32 -0.28449672, %v908_v63  ;;  %v2761_v27 = vpop.eup %1956  ;;  %v1101_v28 = vmul.f32 %v1069_v15, %v621_v48  ;;  %1968 = vpow2.f32 %v1130_v61  ;;  %v556_v39 = vmul.f32 0.5, %v2677_v36 }
 0x1c2   : > { %v1276_v47 = vsub.f32 0.0, %v1212_v38  ;;  %v895_v49 = vmul.f32 %v1953_v26, %v863_v0  ;;  %v783_v4 = vmul.f32 1.0614054, %v2761_v27  ;;  %vm1247_vm0 = vcmp.ge.f32.partialorder %v2705_v9, 0.0 }
 0x1c3   : > { %v972_v16 = vmul.f32 %v2739_v53, %v940_v58  ;;  %v2767_v25 = vpop.eup %1958  ;;  %v1162_v58 = vmul.f32 1.442695, %v1101_v28  ;;  %vm1263_vm1 = vcmp.ge.f32.partialorder %v2726_v20, 0.0  ;;  %vm1245_vm2 = vcmp.ge.f32.partialorder %v2737_v45, 0.0 }
 0x1c4   : > { %v1308_v37 = vsel %vm1244_vm14, %v1212_v38, %v1276_v47  ;;  %v927_v13 = vadd.f32 -0.28449672, %v895_v49  ;;  %v815_v22 = vadd.f32 -1.4531521, %v783_v4  ;;  %v765_v57 = vmul.f32 1.0614054, %v2767_v25  ;;  %v1961_v46 = vpop.eup %1960 }
 0x1c5   : > { %v1340_v35 = vadd.f32 1.0, %v1308_v37  ;;  %v1004_v21 = vadd.f32 0.2548296, %v972_v16  ;;  %v1963_v42 = vpop.eup %1962  ;;  %v543_v49 = vmul.f32 0.5, %v2695_v60  ;;  %1970 = vpow2.f32 %v1162_v58 }
 0x1c6   : > { %v959_v50 = vmul.f32 %v1953_v26, %v927_v13  ;;  %v847_v56 = vmul.f32 %v2761_v27, %v815_v22  ;;  %v797_v54 = vadd.f32 -1.4531521, %v765_v57  ;;  %vm1261_vm3 = vcmp.ge.f32.partialorder %v2754_v17, 0.0 }
 0x1c7   : > { %v1372_v1 = vmul.f32 %v1340_v35, %v540_v23  ;;  %v1036_v5 = vmul.f32 %v2739_v53, %v1004_v21 }
 0x1c8   : > { %v991_v7 = vadd.f32 0.2548296, %v959_v50  ;;  %v879_v24 = vadd.f32 1.4214138, %v847_v56  ;;  %v829_v53 = vmul.f32 %v2767_v25, %v797_v54  ;;  %v1965_v40 = vpop.eup %1964 }
 0x1c9   : > { %v1404_v51 = vmul.f32 1.7015043, %v1372_v1  ;;  %v1196_v2 = vmul.f32 %v1961_v46, %v1036_v5  ;;  %v781_v33 = vmul.f32 1.0614054, %v1965_v40 }
 0x1ca   : > { %v1023_v32 = vmul.f32 %v1953_v26, %v991_v7  ;;  %v911_v19 = vmul.f32 %v2761_v27, %v879_v24  ;;  %v861_v8 = vadd.f32 1.4214138, %v829_v53  ;;  %v1967_v37 = vpop.eup %1966 }
 0x1cb   : > { %v1732_v18 = vpack.c.bf16 %v1404_v51, %v1404_v51  ;;  %v1228_v12 = vsub.f32 1.0, %v1196_v2  ;;  %v813_v38 = vadd.f32 -1.4531521, %v781_v33  ;;  %v1969_v31 = vpop.eup %1968  ;;  %v559_v2 = vmul.f32 0.5, %v2719_v41 }
 0x1cc   : > { %v1183_v62 = vmul.f32 %v1963_v42, %v1023_v32  ;;  %v943_v14 = vadd.f32 -0.28449672, %v911_v19  ;;  %v893_v63 = vmul.f32 %v2767_v25, %v861_v8  ;;  %v557_v8 = vmul.f32 0.5, %v2746_v30 }
 0x1cd   : > { %1565 = vst.msk [vmem:[%s2253_s29 + $0x30] sm:$0xf] %vm1552_vm6, %v1732_v18  ;;  %v1292_v43 = vsub.f32 0.0, %v1228_v12  ;;  %v845_v48 = vmul.f32 %v1965_v40, %v813_v38  ;;  %v541_v18 = vmul.f32 0.5, %v2730_v10 }
 0x1ce   : > { %v1215_v52 = vsub.f32 1.0, %v1183_v62  ;;  %v975_v6 = vmul.f32 %v2761_v27, %v943_v14  ;;  %v925_v34 = vadd.f32 -0.28449672, %v893_v63 }
 0x1cf   : > { %v1324_v55 = vsel %vm1260_vm15, %v1228_v12, %v1292_v43  ;;  %v877_v3 = vadd.f32 1.4214138, %v845_v48  ;;  %v1971_v7 = vpop.eup %1970 }
 0x1d0   : > { %v1356_v26 = vadd.f32 1.0, %v1324_v55  ;;  %v1279_v29 = vsub.f32 0.0, %v1215_v52  ;;  %v1007_v47 = vadd.f32 0.2548296, %v975_v6  ;;  %v957_v0 = vmul.f32 %v2767_v25, %v925_v34 }
 0x1d1   : > { %v909_v13 = vmul.f32 %v1965_v40, %v877_v3 }
 0x1d2   : > { %v1388_v11 = vmul.f32 %v1356_v26, %v556_v39  ;;  %v1311_v59 = vsel %vm1247_vm0, %v1215_v52, %v1279_v29  ;;  %v1039_v16 = vmul.f32 %v2761_v27, %v1007_v47  ;;  %v989_v23 = vadd.f32 0.2548296, %v957_v0 }
 0x1d3   : > { %v1343_v4 = vadd.f32 1.0, %v1311_v59  ;;  %v941_v5 = vadd.f32 -0.28449672, %v909_v13 }
 0x1d4   : > { %v1420_v36 = vmul.f32 1.7015043, %v1388_v11  ;;  %v1199_v21 = vmul.f32 %v1967_v37, %v1039_v16  ;;  %v1021_v9 = vmul.f32 %v2767_v25, %v989_v23 }
 0x1d5   : > { %v1375_v22 = vmul.f32 %v1343_v4, %v543_v49  ;;  %v973_v46 = vmul.f32 %v1965_v40, %v941_v5 }
 0x1d6   : > { %v1748_v35 = vpack.c.bf16 %v1420_v36, %v1420_v36  ;;  %v1231_v1 = vsub.f32 1.0, %v1199_v21  ;;  %v1181_v44 = vmul.f32 %v1969_v31, %v1021_v9 }
 0x1d7   : > { %v1407_v27 = vmul.f32 1.7015043, %v1375_v22  ;;  %v1005_v51 = vadd.f32 0.2548296, %v973_v46 }
 0x1d8   : > { %1581 = vst.msk [vmem:[%s2253_s29 + $0x70] sm:$0xf] %vm1552_vm6, %v1748_v35  ;;  %v1295_v57 = vsub.f32 0.0, %v1231_v1  ;;  %v1213_v50 = vsub.f32 1.0, %v1181_v44 }
 0x1d9   : > { %v1735_v60 = vpack.c.bf16 %v1407_v27, %v1407_v27  ;;  %v1037_v15 = vmul.f32 %v1965_v40, %v1005_v51 }
 0x1da   : > { %v1327_v56 = vsel %vm1263_vm1, %v1231_v1, %v1295_v57  ;;  %v1277_v54 = vsub.f32 0.0, %v1213_v50 }
 0x1db   : > { %1568 = vst.msk [vmem:[%s2253_s29 + $0x3c] sm:$0xf] %vm1552_vm6, %v1735_v60  ;;  %v1359_v25 = vadd.f32 1.0, %v1327_v56  ;;  %v1197_v12 = vmul.f32 %v1971_v7, %v1037_v15 }
 0x1dc   : > { %v1309_v61 = vsel %vm1245_vm2, %v1213_v50, %v1277_v54 }
 0x1dd   : > { %v1391_v24 = vmul.f32 %v1359_v25, %v559_v2  ;;  %v1341_v20 = vadd.f32 1.0, %v1309_v61  ;;  %v1229_v32 = vsub.f32 1.0, %v1197_v12 }
 0x1df   : > { %v1423_v53 = vmul.f32 1.7015043, %v1391_v24  ;;  %v1373_v42 = vmul.f32 %v1341_v20, %v541_v18  ;;  %v1293_v43 = vsub.f32 0.0, %v1229_v32 }
 0x1e1   : > { %v1751_v19 = vpack.c.bf16 %v1423_v53, %v1423_v53  ;;  %v1405_v41 = vmul.f32 1.7015043, %v1373_v42  ;;  %v1325_v40 = vsel %vm1261_vm3, %v1229_v32, %v1293_v43 }
 0x1e2   : > { %v1357_v28 = vadd.f32 1.0, %v1325_v40 }
 0x1e3   : > { %1584 = vst.msk [vmem:[%s2253_s29 + $0x7c] sm:$0xf] %vm1552_vm6, %v1751_v19  ;;  %v1733_v45 = vpack.c.bf16 %v1405_v41, %v1405_v41 }
 0x1e4   : > { %v1389_v10 = vmul.f32 %v1357_v28, %v557_v8 }
 0x1e5   : > { %1566 = vst.msk [vmem:[%s2253_s29 + $0x34] sm:$0xf] %vm1552_vm6, %v1733_v45 }
 0x1e6   : > { %v1421_v62 = vmul.f32 1.7015043, %v1389_v10 }
 0x1e8   : > { %v1749_v14 = vpack.c.bf16 %v1421_v62, %v1421_v62 }
 0x1ea   : > { %1582 = vst.msk [vmem:[%s2253_s29 + $0x74] sm:$0xf] %vm1552_vm6, %v1749_v14 }
 0x1eb PF: > { %s13_s12 = sadd.s32 1, %s1979_s12  }
 0x1ec   : > { %p10_p4 = scmp.ge.s32.totalorder %s13_s12, 4  }
 0x1ee   :  { %12 = sbr.rel (!%p10_p4) target bundleno = 1 (0x1), region = 62 }

// kernel: model_injection_forward.5
= control target key start
LH: loop header
LB: loop body
LE: loop exit
PB: predicated region body
PF: predicated region fallthrough
CT: control target
= control target key end

     0   :  { %s3257_s1 = inlined_call_operand.vmem [shape: bf16[1024,128], index: 1, kind: input, shape index: {}]   ;;  %s3258_s0 = inlined_call_operand.vmem [shape: bf16[128,1024], index: 0, kind: input, shape index: {}]   ;;  %s3259_s2 = inlined_call_operand.vmem [shape: f32[1,128], index: 2, kind: input, shape index: {}]   ;;  %s3260_s3 = inlined_call_operand.vmem [shape: bf16[128,128], index: 3, kind: output, shape index: {}]  }
   0x1   :  { %v2302_v0 = vld [vmem:[%s3257_s1 + $0x40] sm:$0xff]   ;;  %v2306_v4 = vld [vmem:[%s3257_s1 + $0x48] sm:$0xff]   ;;  %v2310_v8 = vld [vmem:[%s3257_s1 + $0x50] sm:$0xff]  }
   0x2   :  { %v2303_v1 = vld [vmem:[%s3257_s1 + $0xc0] sm:$0xff]   ;;  %2046 = vmatprep.subr.bf16.mxu0 %v2302_v0  ;;  %v2307_v5 = vld [vmem:[%s3257_s1 + $0xc8] sm:$0xff]   ;;  %v2311_v9 = vld [vmem:[%s3257_s1 + $0xd0] sm:$0xff]  }
   0x3   :  { %v2304_v2 = vld [vmem:[%s3257_s1] sm:$0xff]   ;;  %2110 = vmatprep.subr.bf16.mxu1 %v2303_v1  ;;  %v2308_v6 = vld [vmem:[%s3257_s1 + $0x8] sm:$0xff]   ;;  %v2312_v10 = vld [vmem:[%s3257_s1 + $0x10] sm:$0xff]  }
   0x4   :  { %v2305_v3 = vld [vmem:[%s3257_s1 + $0x80] sm:$0xff]   ;;  %2047 = vmatpush3.bf16.msra.mxu0 %v2304_v2  ;;  %v2309_v7 = vld [vmem:[%s3257_s1 + $0x88] sm:$0xff]   ;;  %v2313_v11 = vld [vmem:[%s3257_s1 + $0x90] sm:$0xff]  }
   0x5   :  { %2111 = vmatpush3.bf16.msra.mxu1 %v2305_v3  ;;  %2048 = vmatprep.subr.bf16.mxu0 %v2306_v4  ;;  %v2314_v12 = vld [vmem:[%s3257_s1 + $0x58] sm:$0xff]   ;;  %v2318_v16 = vld [vmem:[%s3257_s1 + $0x60] sm:$0xff]   ;;  %v2322_v20 = vld [vmem:[%s3257_s1 + $0x68] sm:$0xff]  }
   0x6   :  { %2112 = vmatprep.subr.bf16.mxu1 %v2307_v5  ;;  %v2315_v13 = vld [vmem:[%s3257_s1 + $0xd8] sm:$0xff]   ;;  %v2319_v17 = vld [vmem:[%s3257_s1 + $0xe0] sm:$0xff]   ;;  %v2323_v21 = vld [vmem:[%s3257_s1 + $0xe8] sm:$0xff]  }
   0x7   :  { %v2316_v14 = vld [vmem:[%s3257_s1 + $0x18] sm:$0xff]   ;;  %v2320_v18 = vld [vmem:[%s3257_s1 + $0x20] sm:$0xff]   ;;  %v2324_v22 = vld [vmem:[%s3257_s1 + $0x28] sm:$0xff]  }
   0x8   :  { %2049 = vmatpush3.bf16.msra.mxu0 %v2308_v6  ;;  %v2317_v15 = vld [vmem:[%s3257_s1 + $0x98] sm:$0xff]   ;;  %v2321_v19 = vld [vmem:[%s3257_s1 + $0xa0] sm:$0xff]   ;;  %v2325_v23 = vld [vmem:[%s3257_s1 + $0xa8] sm:$0xff]  }
   0x9   :  { %2113 = vmatpush3.bf16.msra.mxu1 %v2309_v7  ;;  %2050 = vmatprep.subr.bf16.mxu0 %v2310_v8  ;;  %v2326_v24 = vld [vmem:[%s3257_s1 + $0x70] sm:$0xff]   ;;  %v2330_v28 = vld [vmem:[%s3257_s1 + $0x78] sm:$0xff]   ;;  %v15_v32 = vld [vmem:[%s3258_s0] sm:$0xff] }
   0xa   :  { %2114 = vmatprep.subr.bf16.mxu1 %v2311_v9  ;;  %v2327_v25 = vld [vmem:[%s3257_s1 + $0xf0] sm:$0xff]   ;;  %v2331_v29 = vld [vmem:[%s3257_s1 + $0xf8] sm:$0xff]   ;;  %v19_v33 = vld [vmem:[%s3258_s0 + $0x20] sm:$0xff] }
   0xb   :  { %v2328_v26 = vld [vmem:[%s3257_s1 + $0x30] sm:$0xff]   ;;  %v2332_v30 = vld [vmem:[%s3257_s1 + $0x38] sm:$0xff]   ;;  %v16_v34 = vld [vmem:[%s3258_s0 + $0x8] sm:$0xff]  ;;  %v1839_v35 = vcombine.low %v15_v32, %v19_v33  ;;  %v1840_v36 = vcombine.high %v15_v32, %v19_v33 }
   0xc   :  { %2051 = vmatpush3.bf16.msra.mxu0 %v2312_v10  ;;  %v2329_v27 = vld [vmem:[%s3257_s1 + $0xb0] sm:$0xff]   ;;  %v2333_v31 = vld [vmem:[%s3257_s1 + $0xb8] sm:$0xff]   ;;  %v20_v37 = vld [vmem:[%s3258_s0 + $0x28] sm:$0xff] }
   0xd   :  { %2115 = vmatpush3.bf16.msra.mxu1 %v2313_v11  ;;  %2052 = vmatprep.subr.bf16.mxu0 %v2314_v12  ;;  %v1841_v38 = vcombine.low %v16_v34, %v20_v37  ;;  %v1842_v39 = vcombine.high %v16_v34, %v20_v37  ;;  %v2334_v40 = vld [vmem:[%s3257_s1 + $0x140] sm:$0xff]   ;;  %v24_v47 = vld [vmem:[%s3258_s0 + $0x48] sm:$0xff]  ;;  %v2342_v62 = vld [vmem:[%s3257_s1 + $0x150] sm:$0xff]  }
   0xe   :  { %2116 = vmatprep.subr.bf16.mxu1 %v2315_v13  ;;  %950 = vmatprep.mubr.bf16.mxu0 %v1840_v36  ;;  %v2335_v41 = vld [vmem:[%s3257_s1 + $0x100] sm:$0xff]   ;;  %v28_v48 = vld [vmem:[%s3258_s0 + $0x68] sm:$0xff]  ;;  %v2343_v63 = vld [vmem:[%s3257_s1 + $0x110] sm:$0xff]  }
   0xf   :  { %1047 = vmatprep.mubr.bf16.mxu1 %v1842_v39  ;;  %v2336_v42 = vld [vmem:[%s3257_s1 + $0x1c0] sm:$0xff]   ;;  %v1850_v49 = vcombine.high %v24_v47, %v28_v48  ;;  %v2338_v50 = vld [vmem:[%s3257_s1 + $0x148] sm:$0xff]   ;;  %v1849_v53 = vcombine.low %v24_v47, %v28_v48  ;;  %v2344_v0 = vld [vmem:[%s3257_s1 + $0x1d0] sm:$0xff]  }
  0x10   :  { %2053 = vmatpush3.bf16.msra.mxu0 %v2316_v14  ;;  %v2337_v43 = vld [vmem:[%s3257_s1 + $0x180] sm:$0xff]   ;;  %v2339_v52 = vld [vmem:[%s3257_s1 + $0x108] sm:$0xff]   ;;  %v2345_v1 = vld [vmem:[%s3257_s1 + $0x190] sm:$0xff]  }
  0x11   :  { %2117 = vmatpush3.bf16.msra.mxu1 %v2317_v15  ;;  %2054 = vmatprep.subr.bf16.mxu0 %v2318_v16  ;;  %v23_v44 = vld [vmem:[%s3258_s0 + $0x40] sm:$0xff]  ;;  %v2340_v54 = vld [vmem:[%s3257_s1 + $0x1c8] sm:$0xff]   ;;  %v2346_v10 = vld [vmem:[%s3257_s1 + $0x158] sm:$0xff]  }
  0x12   :  { %2118 = vmatprep.subr.bf16.mxu1 %v2319_v17  ;;  %v27_v45 = vld [vmem:[%s3258_s0 + $0x60] sm:$0xff]  ;;  %v2341_v55 = vld [vmem:[%s3257_s1 + $0x188] sm:$0xff]   ;;  %v2347_v11 = vld [vmem:[%s3257_s1 + $0x118] sm:$0xff]  }
  0x13   :  { %v1848_v46 = vcombine.high %v23_v44, %v27_v45  ;;  %v1847_v51 = vcombine.low %v23_v44, %v27_v45  ;;  %v31_v56 = vld [vmem:[%s3258_s0 + $0x80] sm:$0xff]  ;;  %v32_v58 = vld [vmem:[%s3258_s0 + $0x88] sm:$0xff]  ;;  %v2348_v12 = vld [vmem:[%s3257_s1 + $0x1d8] sm:$0xff]  }
  0x14   :  { %2055 = vmatpush3.bf16.msra.mxu0 %v2320_v18  ;;  %v35_v57 = vld [vmem:[%s3258_s0 + $0xa0] sm:$0xff]  ;;  %v36_v59 = vld [vmem:[%s3258_s0 + $0xa8] sm:$0xff]  ;;  %v2349_v13 = vld [vmem:[%s3257_s1 + $0x198] sm:$0xff]  }
  0x15   :  { %2119 = vmatpush3.bf16.msra.mxu1 %v2321_v19  ;;  %2056 = vmatprep.subr.bf16.mxu0 %v2322_v20  ;;  %v1856_v60 = vcombine.high %v31_v56, %v35_v57  ;;  %v1858_v61 = vcombine.high %v32_v58, %v36_v59  ;;  %v1855_v2 = vcombine.low %v31_v56, %v35_v57  ;;  %v39_v3 = vld [vmem:[%s3258_s0 + $0xc0] sm:$0xff]  ;;  %v40_v5 = vld [vmem:[%s3258_s0 + $0xc8] sm:$0xff]  ;;  %v2359_v39 = vld [vmem:[%s3257_s1 + $0x130] sm:$0xff]  }
  0x16   :  { %2120 = vmatprep.subr.bf16.mxu1 %v2323_v21  ;;  %v43_v4 = vld [vmem:[%s3258_s0 + $0xe0] sm:$0xff]  ;;  %v1857_v6 = vcombine.low %v32_v58, %v36_v59  ;;  %v44_v8 = vld [vmem:[%s3258_s0 + $0xe8] sm:$0xff]  ;;  %v2363_v48 = vld [vmem:[%s3257_s1 + $0x138] sm:$0xff]  }
  0x17   :  { %v1864_v7 = vcombine.high %v39_v3, %v43_v4  ;;  %v1866_v9 = vcombine.high %v40_v5, %v44_v8  ;;  %v47_v14 = vld [vmem:[%s3258_s0 + $0x100] sm:$0xff]  ;;  %v48_v16 = vld [vmem:[%s3258_s0 + $0x108] sm:$0xff]  ;;  %v1863_v19 = vcombine.low %v39_v3, %v43_v4  ;;  %v1865_v21 = vcombine.low %v40_v5, %v44_v8  ;;  %v26_v8 = vld [vmem:[%s3258_s0 + $0x58] sm:$0xff] }
  0x18   :  { %2057 = vmatpush3.bf16.msra.mxu0 %v2324_v22  ;;  %v51_v15 = vld [vmem:[%s3258_s0 + $0x120] sm:$0xff]  ;;  %v52_v17 = vld [vmem:[%s3258_s0 + $0x128] sm:$0xff] }
  0x19   :  { %2121 = vmatpush3.bf16.msra.mxu1 %v2325_v23  ;;  %2058 = vmatprep.subr.bf16.mxu0 %v2326_v24  ;;  %v2350_v18 = vld [vmem:[%s3257_s1 + $0x160] sm:$0xff]   ;;  %v1872_v22 = vcombine.high %v47_v14, %v51_v15  ;;  %v1874_v24 = vcombine.high %v48_v16, %v52_v17  ;;  %v2356_v32 = vld [vmem:[%s3257_s1 + $0x1e8] sm:$0xff]   ;;  %v1871_v34 = vcombine.low %v47_v14, %v51_v15  ;;  %v33_v14 = vld [vmem:[%s3258_s0 + $0x90] sm:$0xff] }
  0x1a   :  { %2122 = vmatprep.subr.bf16.mxu1 %v2327_v25  ;;  %v2351_v20 = vld [vmem:[%s3257_s1 + $0x120] sm:$0xff]   ;;  %v2357_v33 = vld [vmem:[%s3257_s1 + $0x1a8] sm:$0xff]   ;;  %v37_v15 = vld [vmem:[%s3258_s0 + $0xb0] sm:$0xff] }
  0x1b   :  { %v2352_v23 = vld [vmem:[%s3257_s1 + $0x1e0] sm:$0xff]   ;;  %v64_v44 = vld [vmem:[%s3258_s0 + $0x188] sm:$0xff] }
  0x1c   :  { %2059 = vmatpush3.bf16.msra.mxu0 %v2328_v26  ;;  %v2353_v25 = vld [vmem:[%s3257_s1 + $0x1a0] sm:$0xff]   ;;  %v68_v45 = vld [vmem:[%s3258_s0 + $0x1a8] sm:$0xff] }
  0x1d   :  { %2123 = vmatpush3.bf16.msra.mxu1 %v2329_v27  ;;  %2060 = vmatprep.subr.bf16.mxu0 %v2330_v28  ;;  %v55_v26 = vld [vmem:[%s3258_s0 + $0x140] sm:$0xff]  ;;  %v2354_v28 = vld [vmem:[%s3257_s1 + $0x168] sm:$0xff]   ;;  %v1889_v59 = vcombine.low %v64_v44, %v68_v45 }
  0x1e   :  { %2124 = vmatprep.subr.bf16.mxu1 %v2331_v29  ;;  %v59_v27 = vld [vmem:[%s3258_s0 + $0x160] sm:$0xff]  ;;  %v56_v29 = vld [vmem:[%s3258_s0 + $0x148] sm:$0xff] }
  0x1f   :  { %v1880_v36 = vcombine.high %v55_v26, %v59_v27  ;;  %v1879_v47 = vcombine.low %v55_v26, %v59_v27  ;;  %v72_v56 = vld [vmem:[%s3258_s0 + $0x1c8] sm:$0xff]  ;;  %v1859_v26 = vcombine.low %v33_v14, %v37_v15 }
  0x20   :  { %2061 = vmatpush3.bf16.msra.mxu0 %v2332_v30  ;;  %v60_v30 = vld [vmem:[%s3258_s0 + $0x168] sm:$0xff] }
  0x21   :  { %2125 = vmatpush3.bf16.msra.mxu1 %v2333_v31  ;;  %2174 = vmatprep.subr.bf16.mxu0 %v2334_v40  ;;  %v2355_v31 = vld [vmem:[%s3257_s1 + $0x128] sm:$0xff]   ;;  %v1882_v37 = vcombine.high %v56_v29, %v60_v30  ;;  %v2360_v40 = vld [vmem:[%s3257_s1 + $0x1f0] sm:$0xff]  }
  0x22   :  { %2238 = vmatprep.subr.bf16.mxu1 %v2336_v42  ;;  %v67_v42 = vld [vmem:[%s3258_s0 + $0x1a0] sm:$0xff]  ;;  %v76_v57 = vld [vmem:[%s3258_s0 + $0x1e8] sm:$0xff] }
  0x23   :  { %951 = vmatmul.mubr.bf16.vlgmr.msra.gmra.mrb[0].mxu0 %v1839_v35  ;;  %v1873_v35 = vcombine.low %v48_v16, %v52_v17  ;;  %v1897_v3 = vcombine.low %v72_v56, %v76_v57  ;;  %v34_v16 = vld [vmem:[%s3258_s0 + $0x98] sm:$0xff] }
  0x24   :  { %1048 = vmatmul.mubr.bf16.vlgmr.msra.gmra.mrb[0].mxu1 %v1841_v38  ;;  %2175 = vmatpush3.bf16.msra.mxu0 %v2335_v41  ;;  %v2358_v38 = vld [vmem:[%s3257_s1 + $0x170] sm:$0xff]   ;;  %v63_v41 = vld [vmem:[%s3258_s0 + $0x180] sm:$0xff]  ;;  %v38_v17 = vld [vmem:[%s3258_s0 + $0xb8] sm:$0xff] }
  0x25   :  { %2239 = vmatpush3.bf16.msra.mxu1 %v2337_v43  ;;  %958 = vmatprep.mubr.bf16.mxu0 %v1848_v46  ;;  %v2361_v43 = vld [vmem:[%s3257_s1 + $0x1b0] sm:$0xff]   ;;  %v2362_v46 = vld [vmem:[%s3257_s1 + $0x178] sm:$0xff]   ;;  %v1887_v58 = vcombine.low %v63_v41, %v67_v42  ;;  %v1861_v27 = vcombine.low %v34_v16, %v38_v17 }
  0x26   :  { %1055 = vmatprep.mubr.bf16.mxu1 %v1850_v49  ;;  %2176 = vmatprep.subr.bf16.mxu0 %v2338_v50  ;;  %v1881_v49 = vcombine.low %v56_v29, %v60_v30  ;;  %v1888_v50 = vcombine.high %v63_v41, %v67_v42  ;;  %v49_v30 = vld [vmem:[%s3258_s0 + $0x110] sm:$0xff]  ;;  %v62_v41 = vld [vmem:[%s3258_s0 + $0x178] sm:$0xff] }
  0x27   :  { %2240 = vmatprep.subr.bf16.mxu1 %v2340_v54  ;;  %v71_v54 = vld [vmem:[%s3258_s0 + $0x1c0] sm:$0xff] }
  0x28   :  { %2177 = vmatpush3.bf16.msra.mxu0 %v2339_v52  ;;  %v1890_v52 = vcombine.high %v64_v44, %v68_v45 }
  0x29   :  { %2241 = vmatpush3.bf16.msra.mxu1 %v2341_v55  ;;  %2178 = vmatprep.subr.bf16.mxu0 %v2342_v62  ;;  %v75_v55 = vld [vmem:[%s3258_s0 + $0x1e0] sm:$0xff]  ;;  %v17_v62 = vld [vmem:[%s3258_s0 + $0x10] sm:$0xff] }
  0x2a   :  { %2242 = vmatprep.subr.bf16.mxu1 %v2344_v0  ;;  %v18_v0 = vld [vmem:[%s3258_s0 + $0x18] sm:$0xff] }
  0x2b   :  { %959 = vmatmul.mubr.bf16.gmra.mrb[4].mxu0 %v1847_v51  ;;  %v2364_v51 = vld [vmem:[%s3257_s1 + $0x1f8] sm:$0xff]  }
  0x2c   :  { %1056 = vmatmul.mubr.bf16.gmra.mrb[4].mxu1 %v1849_v53  ;;  %966 = vmatprep.mubr.bf16.mxu0 %v1856_v60  ;;  %v2365_v53 = vld [vmem:[%s3257_s1 + $0x1b8] sm:$0xff]   ;;  %v1896_v60 = vcombine.high %v71_v54, %v75_v55 }
  0x2d   :  { %1063 = vmatprep.mubr.bf16.mxu1 %v1858_v61  ;;  %2179 = vmatpush3.bf16.msra.mxu0 %v2343_v63  ;;  %v1898_v61 = vcombine.high %v72_v56, %v76_v57  ;;  %v21_v63 = vld [vmem:[%s3258_s0 + $0x30] sm:$0xff]  ;;  %v74_v56 = vld [vmem:[%s3258_s0 + $0x1d8] sm:$0xff] }
  0x2e   :  { %2243 = vmatpush3.bf16.msra.mxu1 %v2345_v1  ;;  %2180 = vmatprep.subr.bf16.mxu0 %v2346_v10  ;;  %v22_v1 = vld [vmem:[%s3258_s0 + $0x38] sm:$0xff]  ;;  %v1844_v4 = vcombine.high %v17_v62, %v21_v63  ;;  %v1843_v10 = vcombine.low %v17_v62, %v21_v63 }
  0x2f   :  { %2244 = vmatprep.subr.bf16.mxu1 %v2348_v12  ;;  %v1846_v5 = vcombine.high %v18_v0, %v22_v1  ;;  %v78_v57 = vld [vmem:[%s3258_s0 + $0x1f8] sm:$0xff] }
  0x30   :  { %v1901_v63 = vcombine.low %v74_v56, %v78_v57 }
  0x31   :  { %2181 = vmatpush3.bf16.msra.mxu0 %v2347_v11  ;;  %v1845_v11 = vcombine.low %v18_v0, %v22_v1 }
  0x32   :  { %2245 = vmatpush3.bf16.msra.mxu1 %v2349_v13  ;;  %2182 = vmatprep.subr.bf16.mxu0 %v2350_v18 }
  0x33   :  { %967 = vmatmul.mubr.bf16.gmra.mrb[8].mxu0 %v1855_v2  ;;  %2246 = vmatprep.subr.bf16.mxu1 %v2352_v23  ;;  %v1895_v2 = vcombine.low %v71_v54, %v75_v55  ;;  %v45_v23 = vld [vmem:[%s3258_s0 + $0xf0] sm:$0xff] }
  0x34   :  { %1064 = vmatmul.mubr.bf16.gmra.mrb[8].mxu1 %v1857_v6  ;;  %974 = vmatprep.mubr.bf16.mxu0 %v1864_v7  ;;  %v25_v6 = vld [vmem:[%s3258_s0 + $0x50] sm:$0xff] }
  0x35   :  { %1071 = vmatprep.mubr.bf16.mxu1 %v1866_v9  ;;  %2183 = vmatpush3.bf16.msra.mxu0 %v2351_v20  ;;  %v29_v7 = vld [vmem:[%s3258_s0 + $0x70] sm:$0xff]  ;;  %v30_v9 = vld [vmem:[%s3258_s0 + $0x78] sm:$0xff]  ;;  %v1860_v20 = vcombine.high %v33_v14, %v37_v15 }
  0x36   :  { %2247 = vmatpush3.bf16.msra.mxu1 %v2353_v25  ;;  %2184 = vmatprep.subr.bf16.mxu0 %v2354_v28  ;;  %v1852_v12 = vcombine.high %v25_v6, %v29_v7  ;;  %v1854_v13 = vcombine.high %v26_v8, %v30_v9  ;;  %v1851_v18 = vcombine.low %v25_v6, %v29_v7  ;;  %v46_v25 = vld [vmem:[%s3258_s0 + $0xf8] sm:$0xff]  ;;  %v73_v54 = vld [vmem:[%s3258_s0 + $0x1d0] sm:$0xff] }
  0x37   :  { %2248 = vmatprep.subr.bf16.mxu1 %v2356_v32  ;;  %v50_v32 = vld [vmem:[%s3258_s0 + $0x118] sm:$0xff]  ;;  %v77_v55 = vld [vmem:[%s3258_s0 + $0x1f0] sm:$0xff] }
  0x38   :  { %v1899_v62 = vcombine.low %v73_v54, %v77_v55 }
  0x39   :  { %2185 = vmatpush3.bf16.msra.mxu0 %v2355_v31  ;;  %v53_v31 = vld [vmem:[%s3258_s0 + $0x130] sm:$0xff] }
  0x3a   :  { %2249 = vmatpush3.bf16.msra.mxu1 %v2357_v33  ;;  %2186 = vmatprep.subr.bf16.mxu0 %v2358_v38  ;;  %v54_v33 = vld [vmem:[%s3258_s0 + $0x138] sm:$0xff]  ;;  %v57_v38 = vld [vmem:[%s3258_s0 + $0x150] sm:$0xff]  ;;  %v1875_v42 = vcombine.low %v49_v30, %v53_v31 }
  0x3b   :  { %975 = vmatmul.mubr.bf16.gmra.mrb[12].mxu0 %v1863_v19  ;;  %2250 = vmatprep.subr.bf16.mxu1 %v2360_v40  ;;  %v1853_v19 = vcombine.low %v26_v8, %v30_v9  ;;  %v58_v40 = vld [vmem:[%s3258_s0 + $0x158] sm:$0xff] }
  0x3c   :  { %1072 = vmatmul.mubr.bf16.gmra.mrb[12].mxu1 %v1865_v21  ;;  %982 = vmatprep.mubr.bf16.mxu0 %v1872_v22  ;;  %v1862_v21 = vcombine.high %v34_v16, %v38_v17  ;;  %v41_v22 = vld [vmem:[%s3258_s0 + $0xd0] sm:$0xff]  ;;  %v1886_v45 = vcombine.high %v58_v40, %v62_v41 }
  0x3d   :  { %1079 = vmatprep.mubr.bf16.mxu1 %v1874_v24  ;;  %2187 = vmatpush3.bf16.msra.mxu0 %v2359_v39  ;;  %v42_v24 = vld [vmem:[%s3258_s0 + $0xd8] sm:$0xff]  ;;  %v1868_v28 = vcombine.high %v41_v22, %v45_v23  ;;  %v61_v39 = vld [vmem:[%s3258_s0 + $0x170] sm:$0xff] }
  0x3e   :  { %2251 = vmatpush3.bf16.msra.mxu1 %v2361_v43  ;;  %2188 = vmatprep.subr.bf16.mxu0 %v2362_v46  ;;  %v1870_v29 = vcombine.high %v42_v24, %v46_v25  ;;  %v1877_v43 = vcombine.low %v50_v32, %v54_v33  ;;  %v1884_v44 = vcombine.high %v57_v38, %v61_v39  ;;  %v65_v46 = vld [vmem:[%s3258_s0 + $0x190] sm:$0xff] }
  0x3f   :  { %2252 = vmatprep.subr.bf16.mxu1 %v2364_v51  ;;  %v1885_v51 = vcombine.low %v58_v40, %v62_v41 }
  0x41   :  { %2189 = vmatpush3.bf16.msra.mxu0 %v2363_v48  ;;  %v66_v48 = vld [vmem:[%s3258_s0 + $0x198] sm:$0xff] }
  0x42   :  { %2253 = vmatpush3.bf16.msra.mxu1 %v2365_v53 }
  0x43   :  { %983 = vmatmul.mubr.bf16.gmra.mrb[16].mxu0 %v1871_v34  ;;  %v1867_v34 = vcombine.low %v41_v22, %v45_v23 }
  0x44   :  { %1080 = vmatmul.mubr.bf16.gmra.mrb[16].mxu1 %v1873_v35  ;;  %990 = vmatprep.mubr.bf16.mxu0 %v1880_v36  ;;  %v1869_v35 = vcombine.low %v42_v24, %v46_v25  ;;  %v1876_v36 = vcombine.high %v49_v30, %v53_v31 }
  0x45   :  { %1087 = vmatprep.mubr.bf16.mxu1 %v1882_v37  ;;  %v1878_v37 = vcombine.high %v50_v32, %v54_v33 }
  0x4b   :  { %991 = vmatmul.mubr.bf16.gmra.mrb[20].mxu0 %v1879_v47  ;;  %v69_v47 = vld [vmem:[%s3258_s0 + $0x1b0] sm:$0xff] }
  0x4c   :  { %1088 = vmatmul.mubr.bf16.gmra.mrb[20].mxu1 %v1881_v49  ;;  %998 = vmatprep.mubr.bf16.mxu0 %v1888_v50  ;;  %v70_v49 = vld [vmem:[%s3258_s0 + $0x1b8] sm:$0xff]  ;;  %v1883_v50 = vcombine.low %v57_v38, %v61_v39 }
  0x4d   :  { %1095 = vmatprep.mubr.bf16.mxu1 %v1890_v52  ;;  %v1892_v52 = vcombine.high %v65_v46, %v69_v47  ;;  %v1894_v53 = vcombine.high %v66_v48, %v70_v49 }
  0x53   :  { %999 = vmatmul.mubr.bf16.gmra.mrb[24].mxu0 %v1887_v58  ;;  %v1891_v58 = vcombine.low %v65_v46, %v69_v47 }
  0x54   :  { %1096 = vmatmul.mubr.bf16.gmra.mrb[24].mxu1 %v1889_v59  ;;  %1006 = vmatprep.mubr.bf16.mxu0 %v1896_v60  ;;  %v1893_v59 = vcombine.low %v66_v48, %v70_v49  ;;  %v1900_v60 = vcombine.high %v73_v54, %v77_v55 }
  0x55   :  { %1103 = vmatprep.mubr.bf16.mxu1 %v1898_v61  ;;  %v1902_v61 = vcombine.high %v74_v56, %v78_v57 }
  0x5b   :  { %1007 = vmatmul.mubr.bf16.gmra.mrb[28].mxu0 %v1895_v2  ;;  %v2837_v2 = vld [vmem:[%s3259_s2] ss:$0 sm:$0xff] }
  0x5c   :  { %1104 = vmatmul.mubr.bf16.gmra.mrb[28].mxu1 %v1897_v3  ;;  %1144 = vmatprep.mubr.bf16.mxu0 %v1844_v4 }
  0x5d   :  { %1241 = vmatprep.mubr.bf16.mxu1 %v1846_v5 }
  0x63   :  { %1145 = vmatmul.mubr.bf16.vlgmr.msra.gmra.mrb[32].mxu0 %v1843_v10 }
  0x64   :  { %1242 = vmatmul.mubr.bf16.vlgmr.msra.gmra.mrb[32].mxu1 %v1845_v11  ;;  %1152 = vmatprep.mubr.bf16.mxu0 %v1852_v12 }
  0x65   :  { %1249 = vmatprep.mubr.bf16.mxu1 %v1854_v13 }
  0x6b   :  { %1153 = vmatmul.mubr.bf16.gmra.mrb[36].mxu0 %v1851_v18 }
  0x6c   :  { %1250 = vmatmul.mubr.bf16.gmra.mrb[36].mxu1 %v1853_v19  ;;  %1160 = vmatprep.mubr.bf16.mxu0 %v1860_v20 }
  0x6d   :  { %1257 = vmatprep.mubr.bf16.mxu1 %v1862_v21 }
  0x73   :  { %1161 = vmatmul.mubr.bf16.gmra.mrb[40].mxu0 %v1859_v26 }
  0x74   :  { %1258 = vmatmul.mubr.bf16.gmra.mrb[40].mxu1 %v1861_v27  ;;  %1168 = vmatprep.mubr.bf16.mxu0 %v1868_v28 }
  0x75   :  { %1265 = vmatprep.mubr.bf16.mxu1 %v1870_v29 }
  0x7b   :  { %1169 = vmatmul.mubr.bf16.gmra.mrb[44].mxu0 %v1867_v34 }
  0x7c   :  { %1266 = vmatmul.mubr.bf16.gmra.mrb[44].mxu1 %v1869_v35  ;;  %1176 = vmatprep.mubr.bf16.mxu0 %v1876_v36 }
  0x7d   :  { %1273 = vmatprep.mubr.bf16.mxu1 %v1878_v37 }
  0x83   :  { %1177 = vmatmul.mubr.bf16.gmra.mrb[48].mxu0 %v1875_v42 }
  0x84   :  { %1274 = vmatmul.mubr.bf16.gmra.mrb[48].mxu1 %v1877_v43  ;;  %1184 = vmatprep.mubr.bf16.mxu0 %v1884_v44 }
  0x85   :  { %1281 = vmatprep.mubr.bf16.mxu1 %v1886_v45 }
  0x8b   :  { %1185 = vmatmul.mubr.bf16.gmra.mrb[52].mxu0 %v1883_v50 }
  0x8c   :  { %1282 = vmatmul.mubr.bf16.gmra.mrb[52].mxu1 %v1885_v51  ;;  %1192 = vmatprep.mubr.bf16.mxu0 %v1892_v52 }
  0x8d   :  { %1289 = vmatprep.mubr.bf16.mxu1 %v1894_v53 }
  0x93   :  { %1193 = vmatmul.mubr.bf16.gmra.mrb[56].mxu0 %v1891_v58 }
  0x94   :  { %1290 = vmatmul.mubr.bf16.gmra.mrb[56].mxu1 %v1893_v59  ;;  %1200 = vmatprep.mubr.bf16.mxu0 %v1900_v60 }
  0x95   :  { %1297 = vmatprep.mubr.bf16.mxu1 %v1902_v61 }
  0x9b   :  { %1201 = vmatmul.mubr.bf16.gmra.mrb[60].mxu0 %v1899_v62 }
  0x9c   :  { %1298 = vmatmul.mubr.bf16.gmra.mrb[60].mxu1 %v1901_v63 }
  0xf6   :  { %v2062_v0 = vpop.f32.mrb[0].mxu0 }
  0xf7   :  { %v2126_v1 = vpop.f32.mrb[0].mxu1  ;;  %v2063_v3 = vpop.f32.mrb[1].mxu0 }
  0xf8   :  { %v2064_v4 = vadd.f32 %v2063_v3, %v2062_v0  ;;  %v2127_v5 = vpop.f32.mrb[1].mxu1  ;;  %v2065_v6 = vpop.f32.mrb[2].mxu0 }
  0xf9   :  { %v2128_v7 = vadd.f32 %v2127_v5, %v2126_v1  ;;  %v2129_v8 = vpop.f32.mrb[2].mxu1  ;;  %v2066_v9 = vpop.f32.mrb[3].mxu0 }
  0xfa   :  { %v953_v10 = vadd.f32 %v2064_v4, %v2837_v2  ;;  %v2067_v11 = vadd.f32 %v2066_v9, %v2065_v6  ;;  %v2130_v12 = vpop.f32.mrb[3].mxu1 }
  0xfb   :  { %v2131_v13 = vadd.f32 %v2130_v12, %v2129_v8 }
  0xfc   :  { %v2840_v14 = vadd.f32 %v2128_v7, %v953_v10  ;;  %v956_v15 = vadd.f32 %v2067_v11, %v2837_v2 }
  0xfe   :  { %v2843_v16 = vadd.f32 %v2131_v13, %v956_v15  ;;  %v2068_v17 = vpop.f32.mrb[4].mxu0 }
  0xff   :  { %v2132_v18 = vpop.f32.mrb[4].mxu1  ;;  %v2069_v19 = vpop.f32.mrb[5].mxu0 }
 0x100   :  { %v2070_v20 = vadd.f32 %v2069_v19, %v2068_v17  ;;  %v2133_v21 = vpop.f32.mrb[5].mxu1  ;;  %v2071_v22 = vpop.f32.mrb[6].mxu0 }
 0x101   :  { %v2134_v23 = vadd.f32 %v2133_v21, %v2132_v18  ;;  %v2135_v24 = vpop.f32.mrb[6].mxu1  ;;  %v2072_v25 = vpop.f32.mrb[7].mxu0 }
 0x102   :  { %v961_v26 = vadd.f32 %v2070_v20, %v2837_v2  ;;  %v2073_v27 = vadd.f32 %v2072_v25, %v2071_v22  ;;  %v2136_v28 = vpop.f32.mrb[7].mxu1 }
 0x103   :  { %v2137_v29 = vadd.f32 %v2136_v28, %v2135_v24 }
 0x104   :  { %v2846_v30 = vadd.f32 %v2134_v23, %v961_v26  ;;  %v964_v31 = vadd.f32 %v2073_v27, %v2837_v2 }
 0x106   :  { %v2849_v32 = vadd.f32 %v2137_v29, %v964_v31  ;;  %v2074_v33 = vpop.f32.mrb[8].mxu0 }
 0x107   :  { %v2138_v34 = vpop.f32.mrb[8].mxu1  ;;  %v2075_v35 = vpop.f32.mrb[9].mxu0 }
 0x108   :  { %v2076_v36 = vadd.f32 %v2075_v35, %v2074_v33  ;;  %v2139_v37 = vpop.f32.mrb[9].mxu1  ;;  %v2077_v38 = vpop.f32.mrb[10].mxu0 }
 0x109   :  { %v2140_v39 = vadd.f32 %v2139_v37, %v2138_v34  ;;  %v2141_v40 = vpop.f32.mrb[10].mxu1  ;;  %v2078_v41 = vpop.f32.mrb[11].mxu0 }
 0x10a   :  { %v969_v42 = vadd.f32 %v2076_v36, %v2837_v2  ;;  %v2079_v43 = vadd.f32 %v2078_v41, %v2077_v38  ;;  %v2142_v44 = vpop.f32.mrb[11].mxu1 }
 0x10b   :  { %v2143_v45 = vadd.f32 %v2142_v44, %v2141_v40 }
 0x10c   :  { %v2852_v46 = vadd.f32 %v2140_v39, %v969_v42  ;;  %v972_v47 = vadd.f32 %v2079_v43, %v2837_v2 }
 0x10e   :  { %v2855_v48 = vadd.f32 %v2143_v45, %v972_v47  ;;  %v2080_v49 = vpop.f32.mrb[12].mxu0 }
 0x10f   :  { %v2144_v50 = vpop.f32.mrb[12].mxu1  ;;  %v2081_v51 = vpop.f32.mrb[13].mxu0 }
 0x110   :  { %v2082_v52 = vadd.f32 %v2081_v51, %v2080_v49  ;;  %v2145_v53 = vpop.f32.mrb[13].mxu1  ;;  %v2083_v54 = vpop.f32.mrb[14].mxu0 }
 0x111   :  { %v2146_v55 = vadd.f32 %v2145_v53, %v2144_v50  ;;  %v2147_v56 = vpop.f32.mrb[14].mxu1  ;;  %v2084_v57 = vpop.f32.mrb[15].mxu0 }
 0x112   :  { %v977_v58 = vadd.f32 %v2082_v52, %v2837_v2  ;;  %v2085_v59 = vadd.f32 %v2084_v57, %v2083_v54  ;;  %v2148_v60 = vpop.f32.mrb[15].mxu1 }
 0x113   :  { %v2149_v61 = vadd.f32 %v2148_v60, %v2147_v56 }
 0x114   :  { %v2858_v62 = vadd.f32 %v2146_v55, %v977_v58  ;;  %v980_v63 = vadd.f32 %v2085_v59, %v2837_v2 }
 0x116   :  { %v2861_v0 = vadd.f32 %v2149_v61, %v980_v63  ;;  %v2086_v1 = vpop.f32.mrb[16].mxu0 }
 0x117   :  { %v2150_v3 = vpop.f32.mrb[16].mxu1  ;;  %v2087_v4 = vpop.f32.mrb[17].mxu0 }
 0x118   :  { %v2088_v5 = vadd.f32 %v2087_v4, %v2086_v1  ;;  %v2151_v6 = vpop.f32.mrb[17].mxu1  ;;  %v2089_v7 = vpop.f32.mrb[18].mxu0 }
 0x119   :  { %v2152_v8 = vadd.f32 %v2151_v6, %v2150_v3  ;;  %v2153_v9 = vpop.f32.mrb[18].mxu1  ;;  %v2090_v10 = vpop.f32.mrb[19].mxu0 }
 0x11a   :  { %v985_v11 = vadd.f32 %v2088_v5, %v2837_v2  ;;  %v2091_v12 = vadd.f32 %v2090_v10, %v2089_v7  ;;  %v2154_v13 = vpop.f32.mrb[19].mxu1 }
 0x11b   :  { %v2155_v15 = vadd.f32 %v2154_v13, %v2153_v9 }
 0x11c   :  { %v2864_v17 = vadd.f32 %v2152_v8, %v985_v11  ;;  %v988_v18 = vadd.f32 %v2091_v12, %v2837_v2 }
 0x11e   :  { %v2867_v19 = vadd.f32 %v2155_v15, %v988_v18  ;;  %v2092_v20 = vpop.f32.mrb[20].mxu0 }
 0x11f   :  { %v2156_v21 = vpop.f32.mrb[20].mxu1  ;;  %v2093_v22 = vpop.f32.mrb[21].mxu0 }
 0x120   :  { %v2094_v23 = vadd.f32 %v2093_v22, %v2092_v20  ;;  %v2157_v24 = vpop.f32.mrb[21].mxu1  ;;  %v2095_v25 = vpop.f32.mrb[22].mxu0 }
 0x121   :  { %v2158_v26 = vadd.f32 %v2157_v24, %v2156_v21  ;;  %v2159_v27 = vpop.f32.mrb[22].mxu1  ;;  %v2096_v28 = vpop.f32.mrb[23].mxu0 }
 0x122   :  { %v993_v29 = vadd.f32 %v2094_v23, %v2837_v2  ;;  %v2097_v31 = vadd.f32 %v2096_v28, %v2095_v25  ;;  %v2160_v33 = vpop.f32.mrb[23].mxu1 }
 0x123   :  { %v2161_v34 = vadd.f32 %v2160_v33, %v2159_v27 }
 0x124   :  { %v2870_v35 = vadd.f32 %v2158_v26, %v993_v29  ;;  %v996_v36 = vadd.f32 %v2097_v31, %v2837_v2 }
 0x126   :  { %v2873_v37 = vadd.f32 %v2161_v34, %v996_v36  ;;  %v2098_v38 = vpop.f32.mrb[24].mxu0 }
 0x127   :  { %v2162_v39 = vpop.f32.mrb[24].mxu1  ;;  %v2099_v40 = vpop.f32.mrb[25].mxu0 }
 0x128   :  { %v2100_v41 = vadd.f32 %v2099_v40, %v2098_v38  ;;  %v2163_v42 = vpop.f32.mrb[25].mxu1  ;;  %v2101_v43 = vpop.f32.mrb[26].mxu0 }
 0x129   :  { %v2164_v44 = vadd.f32 %v2163_v42, %v2162_v39  ;;  %v2165_v45 = vpop.f32.mrb[26].mxu1  ;;  %v2102_v47 = vpop.f32.mrb[27].mxu0 }
 0x12a   :  { %v1001_v49 = vadd.f32 %v2100_v41, %v2837_v2  ;;  %v2103_v50 = vadd.f32 %v2102_v47, %v2101_v43  ;;  %v2166_v51 = vpop.f32.mrb[27].mxu1 }
 0x12b   :  { %v2167_v52 = vadd.f32 %v2166_v51, %v2165_v45 }
 0x12c   :  { %v2876_v53 = vadd.f32 %v2164_v44, %v1001_v49  ;;  %v1004_v54 = vadd.f32 %v2103_v50, %v2837_v2 }
 0x12e   :  { %v2879_v55 = vadd.f32 %v2167_v52, %v1004_v54  ;;  %v2104_v56 = vpop.f32.mrb[28].mxu0 }
 0x12f   :  { %v2168_v57 = vpop.f32.mrb[28].mxu1  ;;  %v2105_v58 = vpop.f32.mrb[29].mxu0 }
 0x130   :  { %3263 = vst [vmem:[#allocation2_spill] sm:$0xff] %v2879_v55  ;;  %v2106_v59 = vadd.f32 %v2105_v58, %v2104_v56  ;;  %v2169_v60 = vpop.f32.mrb[29].mxu1  ;;  %v2107_v61 = vpop.f32.mrb[30].mxu0 }
 0x131   :  { %v2170_v63 = vadd.f32 %v2169_v60, %v2168_v57  ;;  %v2171_v1 = vpop.f32.mrb[30].mxu1  ;;  %v2108_v3 = vpop.f32.mrb[31].mxu0 }
 0x132   :  { %v1009_v4 = vadd.f32 %v2106_v59, %v2837_v2  ;;  %v2109_v5 = vadd.f32 %v2108_v3, %v2107_v61  ;;  %v2172_v6 = vpop.f32.mrb[31].mxu1 }
 0x133   :  { %v2173_v7 = vadd.f32 %v2172_v6, %v2171_v1 }
 0x134   :  { %v2882_v8 = vadd.f32 %v2170_v63, %v1009_v4  ;;  %v1012_v9 = vadd.f32 %v2109_v5, %v2837_v2 }
 0x136   :  { %3264 = vst [vmem:[#allocation3_spill] sm:$0xff] %v2882_v8  ;;  %v2885_v10 = vadd.f32 %v2173_v7, %v1012_v9  ;;  %v2190_v11 = vpop.f32.mrb[32].mxu0 }
 0x137   :  { %v2254_v12 = vpop.f32.mrb[32].mxu1  ;;  %v2191_v13 = vpop.f32.mrb[33].mxu0 }
 0x138   :  { %3265 = vst [vmem:[#allocation4_spill] sm:$0xff] %v2885_v10  ;;  %v2192_v15 = vadd.f32 %v2191_v13, %v2190_v11  ;;  %v2255_v18 = vpop.f32.mrb[33].mxu1  ;;  %v2193_v20 = vpop.f32.mrb[34].mxu0 }
 0x139   :  { %v2256_v21 = vadd.f32 %v2255_v18, %v2254_v12  ;;  %v2257_v22 = vpop.f32.mrb[34].mxu1  ;;  %v2194_v23 = vpop.f32.mrb[35].mxu0 }
 0x13a   :  { %v1147_v24 = vadd.f32 %v2192_v15, %v2840_v14  ;;  %v2195_v25 = vadd.f32 %v2194_v23, %v2193_v20  ;;  %v2258_v26 = vpop.f32.mrb[35].mxu1 }
 0x13b   :  { %v2259_v27 = vadd.f32 %v2258_v26, %v2257_v22 }
 0x13c   :  { %v1244_v28 = vadd.f32 %v2256_v21, %v1147_v24  ;;  %v1150_v29 = vadd.f32 %v2195_v25, %v2843_v16 }
 0x13e   :  { %v2889_v2 = vmul.f32 0.70710677, %v1244_v28  ;;  %v2891_v31 = vadd.f32 %v2259_v27, %v1150_v29  ;;  %v2196_v33 = vpop.f32.mrb[36].mxu0 }
 0x13f   :  { %v2260_v34 = vpop.f32.mrb[36].mxu1  ;;  %v2197_v36 = vpop.f32.mrb[37].mxu0 }
 0x140   :  { %v1338_v38 = vand.u32 2147483647, %v2889_v2  ;;  %v2895_v39 = vmul.f32 0.70710677, %v2891_v31  ;;  %v2198_v40 = vadd.f32 %v2197_v36, %v2196_v33  ;;  %v2261_v14 = vpop.f32.mrb[37].mxu1  ;;  %v2199_v41 = vpop.f32.mrb[38].mxu0 }
 0x141   :  { %v2262_v44 = vadd.f32 %v2261_v14, %v2260_v34  ;;  %v2263_v45 = vpop.f32.mrb[38].mxu1  ;;  %v2200_v47 = vpop.f32.mrb[39].mxu0  ;;  %vm1658_vm0 = vcmp.ge.f32.partialorder %v2889_v2, 0.0 }
 0x142   :  { %v1354_v42 = vmul.f32 0.3275911, %v1338_v38  ;;  %v1339_v43 = vand.u32 2147483647, %v2895_v39  ;;  %v1155_v16 = vadd.f32 %v2198_v40, %v2846_v30  ;;  %v1562_v50 = vsub.f32 0.0, %v1338_v38  ;;  %v2264_v52 = vpop.f32.mrb[39].mxu1 }
 0x143   :  { %v2201_v57 = vadd.f32 %v2200_v47, %v2199_v41  ;;  %v2265_v58 = vadd.f32 %v2264_v52, %v2263_v45  ;;  %v2918_v40 = vmul.f32 0.5, %v1244_v28  ;;  %v2928_v45 = vmul.f32 0.5, %v2891_v31 }
 0x144   :  { %v1370_v49 = vadd.f32 1.0, %v1354_v42  ;;  %v1355_v51 = vmul.f32 0.3275911, %v1339_v43  ;;  %v1563_v54 = vsub.f32 0.0, %v1339_v43  ;;  %v1252_v56 = vadd.f32 %v2262_v44, %v1155_v16 }
 0x145   :  { %v1158_v63 = vadd.f32 %v2201_v57, %v2849_v32  ;;  %v1578_v3 = vmul.f32 %v1562_v50, %v1338_v38  ;;  %vm1659_vm1 = vcmp.ge.f32.partialorder %v2895_v39, 0.0 }
 0x146   :  { %2366 = vrcp.f32 %v1370_v49  ;;  %v1371_v59 = vadd.f32 1.0, %v1355_v51  ;;  %v2202_v60 = vpop.f32.mrb[40].mxu0  ;;  %v2899_v61 = vmul.f32 0.70710677, %v1252_v56  ;;  %v1579_v7 = vmul.f32 %v1563_v54, %v1339_v43 }
 0x147   :  { %v2266_v1 = vpop.f32.mrb[40].mxu1  ;;  %v2203_v30 = vpop.f32.mrb[41].mxu0  ;;  %v2903_v11 = vadd.f32 %v2265_v58, %v1158_v63  ;;  %v1594_v23 = vmul.f32 1.442695, %v1578_v3 }
 0x148   :  { %v2204_v4 = vadd.f32 %v2203_v30, %v2202_v60  ;;  %v2267_v5 = vpop.f32.mrb[41].mxu1  ;;  %v2205_v6 = vpop.f32.mrb[42].mxu0  ;;  %2368 = vrcp.f32 %v1371_v59  ;;  %v1340_v9 = vand.u32 2147483647, %v2899_v61  ;;  %v1596_v27 = vmul.f32 1.442695, %v1579_v7 }
 0x149   :  { %v2269_v12 = vpop.f32.mrb[42].mxu1  ;;  %v2206_v13 = vpop.f32.mrb[43].mxu0  ;;  %v2268_v18 = vadd.f32 %v2267_v5, %v2266_v1  ;;  %v2907_v22 = vmul.f32 0.70710677, %v2903_v11  ;;  %v2933_v59 = vmul.f32 0.5, %v1252_v56  ;;  %vm1660_vm2 = vcmp.ge.f32.partialorder %v2899_v61, 0.0 }
 0x14a   :  { %v1163_v15 = vadd.f32 %v2204_v4, %v2852_v46  ;;  %v2207_v20 = vadd.f32 %v2206_v13, %v2205_v6  ;;  %v2270_v21 = vpop.f32.mrb[43].mxu1  ;;  %v1356_v32 = vmul.f32 0.3275911, %v1340_v9  ;;  %v1564_v34 = vsub.f32 0.0, %v1340_v9 }
 0x14b   :  { %v2271_v26 = vadd.f32 %v2270_v21, %v2269_v12  ;;  %v1341_v33 = vand.u32 2147483647, %v2907_v22  ;;  %vm1661_vm3 = vcmp.ge.f32.partialorder %v2907_v22, 0.0 }
 0x14c   :  { %v2909_v24 = vadd.f32 %v2268_v18, %v1163_v15  ;;  %v1166_v25 = vadd.f32 %v2207_v20, %v2855_v48  ;;  %v1372_v29 = vadd.f32 1.0, %v1356_v32  ;;  %v1580_v50 = vmul.f32 %v1564_v34, %v1340_v9 }
 0x14d   :  { %v1357_v14 = vmul.f32 0.3275911, %v1341_v33  ;;  %v1565_v48 = vsub.f32 0.0, %v1341_v33 }
 0x14e   :  { %v2914_v46 = vmul.f32 0.70710677, %v2909_v24  ;;  %v2916_v36 = vadd.f32 %v2271_v26, %v1166_v25  ;;  %v2208_v38 = vpop.f32.mrb[44].mxu0  ;;  %2370 = vrcp.f32 %v1372_v29  ;;  %v1598_v56 = vmul.f32 1.442695, %v1580_v50 }
 0x14f   :  { %v2272_v41 = vpop.f32.mrb[44].mxu1  ;;  %2372 = vpow2.f32 %v1594_v23  ;;  %v1373_v28 = vadd.f32 1.0, %v1357_v14  ;;  %v2209_v47 = vpop.f32.mrb[45].mxu0  ;;  %v1581_v30 = vmul.f32 %v1565_v48, %v1341_v33 }
 0x150   :  { %v2920_v42 = vpop.eup %2366  ;;  %v1342_v43 = vand.u32 2147483647, %v2914_v46  ;;  %v2924_v16 = vmul.f32 0.70710677, %v2916_v36  ;;  %2374 = vpow2.f32 %v1596_v27  ;;  %v2273_v49 = vpop.f32.mrb[45].mxu1  ;;  %v2210_v60 = vadd.f32 %v2209_v47, %v2208_v38 }
 0x151   :  { %v1418_v44 = vmul.f32 1.0614054, %v2920_v42  ;;  %2376 = vrcp.f32 %v1373_v28  ;;  %v2211_v63 = vpop.f32.mrb[46].mxu0  ;;  %v2275_v1 = vpop.f32.mrb[46].mxu1  ;;  %v2274_v23 = vadd.f32 %v2273_v49, %v2272_v41  ;;  %v1600_v33 = vmul.f32 1.442695, %v1581_v30 }
 0x152   :  { %v1358_v51 = vmul.f32 0.3275911, %v1342_v43  ;;  %v1566_v52 = vsub.f32 0.0, %v1342_v43  ;;  %v1343_v54 = vand.u32 2147483647, %v2924_v16  ;;  %v2931_v57 = vpop.eup %2368  ;;  %v2212_v5 = vpop.f32.mrb[47].mxu0  ;;  %v1171_v12 = vadd.f32 %v2210_v60, %v2858_v62 }
 0x153   :  { %v1434_v58 = vadd.f32 -1.4531521, %v1418_v44  ;;  %v1419_v31 = vmul.f32 1.0614054, %v2931_v57  ;;  %v2276_v13 = vpop.f32.mrb[47].mxu1  ;;  %v2213_v25 = vadd.f32 %v2212_v5, %v2211_v63  ;;  %vm1662_vm4 = vcmp.ge.f32.partialorder %v2914_v46, 0.0 }
 0x154   :  { %v1374_v3 = vadd.f32 1.0, %v1358_v51  ;;  %v1359_v4 = vmul.f32 0.3275911, %v1343_v54  ;;  %v1582_v7 = vmul.f32 %v1566_v52, %v1342_v43  ;;  %v1567_v9 = vsub.f32 0.0, %v1343_v54 }
 0x155   :  { %v1450_v6 = vmul.f32 %v2920_v42, %v1434_v58  ;;  %v1435_v15 = vadd.f32 -1.4531521, %v1419_v31  ;;  %v2277_v34 = vadd.f32 %v2276_v13, %v2275_v1  ;;  %v2942_v28 = vadd.f32 %v2274_v23, %v1171_v12 }
 0x156   :  { %2378 = vrcp.f32 %v1374_v3  ;;  %v1375_v18 = vadd.f32 1.0, %v1359_v4  ;;  %v2214_v20 = vpop.f32.mrb[48].mxu0  ;;  %v1583_v32 = vmul.f32 %v1567_v9, %v1343_v54  ;;  %v1602_v44 = vmul.f32 1.442695, %v1582_v7 }
 0x157   :  { %v1466_v21 = vadd.f32 1.4214138, %v1450_v6  ;;  %v2278_v26 = vpop.f32.mrb[48].mxu1  ;;  %v2215_v27 = vpop.f32.mrb[49].mxu0  ;;  %v1451_v29 = vmul.f32 %v2931_v57, %v1435_v15  ;;  %v1174_v52 = vadd.f32 %v2213_v25, %v2861_v0  ;;  %v2952_v31 = vmul.f32 0.70710677, %v2942_v28 }
 0x158   :  { %v2216_v38 = vadd.f32 %v2215_v27, %v2214_v20  ;;  %v2279_v14 = vpop.f32.mrb[49].mxu1  ;;  %v2217_v48 = vpop.f32.mrb[50].mxu0  ;;  %2380 = vrcp.f32 %v1375_v18  ;;  %v1604_v1 = vmul.f32 1.442695, %v1583_v32  ;;  %vm1663_vm5 = vcmp.ge.f32.partialorder %v2924_v16, 0.0 }
 0x159   :  { %v2939_v62 = vpop.eup %2370  ;;  %v1482_v43 = vmul.f32 %v2920_v42, %v1466_v21  ;;  %v2944_v47 = vpop.f32.mrb[50].mxu1  ;;  %v1467_v50 = vadd.f32 1.4214138, %v1451_v29  ;;  %2382 = vpow2.f32 %v1598_v56  ;;  %v2955_v4 = vadd.f32 %v2277_v34, %v1174_v52 }
 0x15a   :  { %v2218_v41 = vpop.f32.mrb[51].mxu0  ;;  %v2373_v49 = vpop.eup %2372  ;;  %v1420_v51 = vmul.f32 1.0614054, %v2939_v62  ;;  %v1179_v54 = vadd.f32 %v2216_v38, %v2864_v17  ;;  %v2280_v5 = vadd.f32 %v2279_v14, %v2278_v26  ;;  %2384 = vpow2.f32 %v1600_v33 }
 0x15b   :  { %v2949_v58 = vpop.f32.mrb[51].mxu1  ;;  %v2375_v60 = vpop.eup %2374  ;;  %v1498_v63 = vadd.f32 -0.28449672, %v1482_v43  ;;  %v1483_v30 = vmul.f32 %v2931_v57, %v1467_v50  ;;  %v1344_v17 = vand.u32 2147483647, %v2952_v31  ;;  %v2961_v7 = vadd.f32 %v2218_v41, %v2217_v48 }
 0x15c   :  { %v1436_v3 = vadd.f32 -1.4531521, %v1420_v51  ;;  %v2957_v6 = vpop.eup %2376  ;;  %2386 = vpow2.f32 %v1602_v44  ;;  %v2967_v20 = vadd.f32 %v2280_v5, %v1179_v54  ;;  %v2976_v27 = vmul.f32 0.70710677, %v2955_v4 }
 0x15d   :  { %v1514_v0 = vmul.f32 %v2920_v42, %v1498_v63  ;;  %v1499_v9 = vadd.f32 -0.28449672, %v1483_v30  ;;  %v1421_v13 = vmul.f32 1.0614054, %v2957_v6  ;;  %2388 = vpow2.f32 %v1604_v1 }
 0x15e   :  { %v1452_v12 = vmul.f32 %v2939_v62, %v1436_v3  ;;  %v2965_v15 = vpop.f32.mrb[52].mxu0  ;;  %v1360_v18 = vmul.f32 0.3275911, %v1344_v17  ;;  %3266 = vst [vmem:[#allocation5_spill] sm:$0xff] %v2967_v20  ;;  %3267 = vst [vmem:[#allocation6_spill] sm:$0xff] %v2976_v27  ;;  %v1568_v38 = vsub.f32 0.0, %v1344_v17 }
 0x15f   :  { %v1530_v56 = vadd.f32 0.2548296, %v1514_v0  ;;  %v2969_v21 = vpop.f32.mrb[52].mxu1  ;;  %v1515_v23 = vmul.f32 %v2931_v57, %v1499_v9  ;;  %v1437_v26 = vadd.f32 -1.4531521, %v1421_v13  ;;  %v2980_v14 = vpop.f32.mrb[53].mxu0 }
 0x160   :  { %v2971_v32 = vpop.eup %2378  ;;  %v1468_v25 = vadd.f32 1.4214138, %v1452_v12  ;;  %v1376_v34 = vadd.f32 1.0, %v1360_v18  ;;  %v2982_v48 = vpop.f32.mrb[53].mxu1  ;;  %v1345_v50 = vand.u32 2147483647, %v2976_v27  ;;  %v1584_v18 = vmul.f32 %v1568_v38, %v1344_v17 }
 0x161   :  { %v1546_v29 = vmul.f32 %v2920_v42, %v1530_v56  ;;  %v1422_v33 = vmul.f32 1.0614054, %v2971_v32  ;;  %v1531_v43 = vadd.f32 0.2548296, %v1515_v23  ;;  %v1453_v41 = vmul.f32 %v2957_v6, %v1437_v26  ;;  %v2987_v51 = vpop.f32.mrb[54].mxu0  ;;  %v2989_v52 = vpop.f32.mrb[54].mxu1 }
 0x162   :  { %v1484_v44 = vmul.f32 %v2939_v62, %v1468_v25  ;;  %v2991_v42 = vpop.eup %2380  ;;  %v2995_v63 = vmul.f32 0.5, %v2903_v11  ;;  %2390 = vrcp.f32 %v1376_v34  ;;  %v2997_v30 = vpop.f32.mrb[55].mxu0  ;;  %v1361_v23 = vmul.f32 0.3275911, %v1345_v50 }
 0x163   :  { %v1626_v54 = vmul.f32 %v2373_v49, %v1546_v29  ;;  %v1438_v1 = vadd.f32 -1.4531521, %v1422_v33  ;;  %v2999_v3 = vpop.f32.mrb[55].mxu1  ;;  %v1547_v5 = vmul.f32 %v2931_v57, %v1531_v43  ;;  %v1469_v9 = vadd.f32 1.4214138, %v1453_v41  ;;  %v2383_v13 = vpop.eup %2382 }
 0x164   :  { %v1500_v0 = vadd.f32 -0.28449672, %v1484_v44  ;;  %v1423_v12 = vmul.f32 1.0614054, %v2991_v42  ;;  %v2385_v34 = vpop.eup %2384  ;;  %v1377_v44 = vadd.f32 1.0, %v1361_v23  ;;  %v1569_v41 = vsub.f32 0.0, %v1345_v50 }
 0x165   :  { %v1642_v56 = vsub.f32 1.0, %v1626_v54  ;;  %v1454_v49 = vmul.f32 %v2971_v32, %v1438_v1  ;;  %v1627_v11 = vmul.f32 %v2375_v60, %v1547_v5  ;;  %v1485_v26 = vmul.f32 %v2957_v6, %v1469_v9 }
 0x166   :  { %v1516_v25 = vmul.f32 %v2939_v62, %v1500_v0  ;;  %v1439_v29 = vadd.f32 -1.4531521, %v1423_v12  ;;  %v3006_v33 = vpop.f32.mrb[56].mxu0  ;;  %v3010_v54 = vpop.eup %2386  ;;  %2392 = vrcp.f32 %v1377_v44  ;;  %v1606_v27 = vmul.f32 1.442695, %v1584_v18 }
 0x167   :  { %v1674_v57 = vsub.f32 0.0, %v1642_v56  ;;  %v1470_v43 = vadd.f32 1.4214138, %v1454_v49  ;;  %v3008_v10 = vpop.f32.mrb[56].mxu1  ;;  %v1643_v1 = vsub.f32 1.0, %v1627_v11  ;;  %v3013_v5 = vpop.f32.mrb[57].mxu0  ;;  %v1585_v49 = vmul.f32 %v1569_v41, %v1345_v50 }
 0x168   :  { %v1532_v17 = vadd.f32 0.2548296, %v1516_v25  ;;  %v1501_v38 = vadd.f32 -0.28449672, %v1485_v26  ;;  %v1455_v60 = vmul.f32 %v2991_v42, %v1439_v29  ;;  %v3015_v0 = vpop.eup %2388  ;;  %v3021_v23 = vpop.f32.mrb[57].mxu1  ;;  %v1182_v50 = vadd.f32 %v2961_v7, %v2867_v19 }
 0x169   :  { %v1690_v9 = vsel %vm1658_vm0, %v1642_v56, %v1674_v57  ;;  %v1486_v12 = vmul.f32 %v2971_v32, %v1470_v43  ;;  %v3023_v11 = vpop.f32.mrb[58].mxu0  ;;  %v1675_v26 = vsub.f32 0.0, %v1643_v1  ;;  %v3027_v55 = vpop.f32.mrb[58].mxu1  ;;  %v1608_v18 = vmul.f32 1.442695, %v1585_v49 }
 0x16a   :  { %v1706_v25 = vadd.f32 1.0, %v1690_v9  ;;  %v1548_v29 = vmul.f32 %v2939_v62, %v1532_v17  ;;  %v1517_v8 = vmul.f32 %v2957_v6, %v1501_v38  ;;  %3268 = vst [vmem:[#allocation7_spill] sm:$0xff] %v3027_v55  ;;  %v3029_v2 = vpop.f32.mrb[59].mxu0  ;;  %v1471_v57 = vadd.f32 1.4214138, %v1455_v60  ;;  %v3036_v62 = vpop.f32.mrb[59].mxu1 }
 0x16b   :  { %3269 = vst [vmem:[#allocation8_spill] sm:$0xff] %v3029_v2  ;;  %v1502_v56 = vadd.f32 -0.28449672, %v1486_v12  ;;  %v1691_v44 = vsel %vm1659_vm1, %v1643_v1, %v1675_v26  ;;  %v1310_v49 = vmul.f32 0.5, %v2909_v24  ;;  %2394 = vpow2.f32 %v1606_v27 }
 0x16c   :  { %v1722_v43 = vmul.f32 %v1706_v25, %v2918_v40  ;;  %v1628_v41 = vmul.f32 %v2383_v13, %v1548_v29  ;;  %v1533_v9 = vadd.f32 0.2548296, %v1517_v8  ;;  %v3038_v17 = vpop.eup %2390  ;;  %v1707_v38 = vadd.f32 1.0, %v1691_v44 }
 0x16d   :  { %v1518_v55 = vmul.f32 %v2971_v32, %v1502_v56  ;;  %v1487_v60 = vmul.f32 %v2991_v42, %v1471_v57  ;;  %v1424_v40 = vmul.f32 1.0614054, %v3038_v17  ;;  %v3058_v44 = vmul.f32 0.70710677, %v2967_v20 }
 0x16e   :  { %v1738_v12 = vmul.f32 1.7015043, %v1722_v43  ;;  %v1644_v2 = vsub.f32 1.0, %v1628_v41  ;;  %v1549_v19 = vmul.f32 %v2957_v6, %v1533_v9  ;;  %v3044_v39 = vpop.f32.mrb[60].mxu0  ;;  %v1723_v8 = vmul.f32 %v1707_v38, %v2928_v45 }
 0x16f   :  { %v1534_v7 = vadd.f32 0.2548296, %v1518_v55  ;;  %v1503_v13 = vadd.f32 -0.28449672, %v1487_v60  ;;  %v3048_v1 = vpop.f32.mrb[60].mxu1  ;;  %v3051_v56 = vpop.f32.mrb[61].mxu0  ;;  %v2283_v38 = vadd.f32 %v2949_v58, %v2944_v47  ;;  %2396 = vpow2.f32 %v1608_v18 }
 0x170   :  { %v1676_v25 = vsub.f32 0.0, %v1644_v2  ;;  %v1629_v26 = vmul.f32 %v2385_v34, %v1549_v19  ;;  %v1440_v29 = vadd.f32 -1.4531521, %v1424_v40  ;;  %v3053_v6 = vpop.f32.mrb[61].mxu1  ;;  %v1739_v57 = vmul.f32 1.7015043, %v1723_v8  ;;  %v3073_v19 = vpop.eup %2392 }
 0x171   :  { %v1550_v43 = vmul.f32 %v2971_v32, %v1534_v7  ;;  %v1519_v45 = vmul.f32 %v2991_v42, %v1503_v13  ;;  %v3060_v55 = vpop.f32.mrb[62].mxu0  ;;  %v3062_v41 = vpop.f32.mrb[62].mxu1  ;;  %v3086_v27 = vadd.f32 %v2283_v38, %v1182_v50  ;;  %vm1664_vm6 = vcmp.ge.f32.partialorder %v2952_v31, 0.0 }
 0x172   :  { %v1692_v24 = vsel %vm1660_vm2, %v1644_v2, %v1676_v25  ;;  %v1645_v34 = vsub.f32 1.0, %v1629_v26  ;;  %v1456_v9 = vmul.f32 %v3038_v17, %v1440_v29  ;;  %v3069_v60 = vpop.f32.mrb[63].mxu0  ;;  %v3071_v32 = vpop.f32.mrb[63].mxu1  ;;  %v2002_v40 = vpack.c.bf16 %v1739_v57, %v1738_v12 }
 0x173   :  { %v1708_v8 = vadd.f32 1.0, %v1692_v24  ;;  %v1630_v7 = vmul.f32 %v3010_v54, %v1550_v43  ;;  %v1535_v13 = vadd.f32 0.2548296, %v1519_v45  ;;  %v1425_v2 = vmul.f32 1.0614054, %v3073_v19 }
 0x174   :  { %v1677_v20 = vsub.f32 0.0, %v1645_v34  ;;  %v1472_v61 = vadd.f32 1.4214138, %v1456_v9  ;;  %2003 = vst [vmem:[%s3260_s3] sm:$0xff] %v2002_v40   ;;  %v1346_v12 = vand.u32 2147483647, %v3058_v44  ;;  %vm1666_vm8 = vcmp.ge.f32.partialorder %v3058_v44, 0.0 }
 0x175   :  { %v1724_v47 = vmul.f32 %v1708_v8, %v2933_v59  ;;  %v1646_v58 = vsub.f32 1.0, %v1630_v7  ;;  %v1551_v25 = vmul.f32 %v2991_v42, %v1535_v13  ;;  %v1441_v29 = vadd.f32 -1.4531521, %v1425_v2 }
 0x176   :  { %v1693_v54 = vsel %vm1661_vm3, %v1645_v34, %v1677_v20  ;;  %v1488_v26 = vmul.f32 %v3038_v17, %v1472_v61  ;;  %v1362_v42 = vmul.f32 0.3275911, %v1346_v12  ;;  %v1570_v13 = vsub.f32 0.0, %v1346_v12 }
 0x177   :  { %v1709_v57 = vadd.f32 1.0, %v1693_v54  ;;  %v1678_v43 = vsub.f32 0.0, %v1646_v58  ;;  %v1631_v45 = vmul.f32 %v3015_v0, %v1551_v25  ;;  %v1457_v24 = vmul.f32 %v3073_v19, %v1441_v29  ;;  %v2395_v25 = vpop.eup %2394 }
 0x178   :  { %v1504_v59 = vadd.f32 -0.28449672, %v1488_v26  ;;  %v1740_v9 = vmul.f32 1.7015043, %v1724_v47  ;;  %v1378_v8 = vadd.f32 1.0, %v1362_v42  ;;  %v1311_v54 = vmul.f32 0.5, %v2916_v36 }
 0x179   :  { %v1725_v22 = vmul.f32 %v1709_v57, %v2995_v63  ;;  %v1694_v20 = vsel %vm1662_vm4, %v1646_v58, %v1678_v43  ;;  %v1647_v34 = vsub.f32 1.0, %v1631_v45  ;;  %v1473_v38 = vadd.f32 1.4214138, %v1457_v24 }
 0x17a   :  { %v1710_v40 = vadd.f32 1.0, %v1694_v20  ;;  %v1520_v50 = vmul.f32 %v3038_v17, %v1504_v59  ;;  %v3094_v0 = vmul.f32 0.70710677, %v3086_v27  ;;  %2398 = vrcp.f32 %v1378_v8 }
 0x17b   :  { %v1741_v7 = vmul.f32 1.7015043, %v1725_v22  ;;  %v1679_v46 = vsub.f32 0.0, %v1647_v34  ;;  %v1489_v61 = vmul.f32 %v3073_v19, %v1473_v38  ;;  %v1586_v16 = vmul.f32 %v1570_v13, %v1346_v12  ;;  %v2397_v22 = vpop.eup %2396 }
 0x17c   :  { %v1536_v18 = vadd.f32 0.2548296, %v1520_v50  ;;  %v1726_v2 = vmul.f32 %v1710_v40, %v1310_v49  ;;  %v1347_v58 = vand.u32 2147483647, %v3094_v0  ;;  %v2222_v24 = vadd.f32 %v2980_v14, %v2965_v15 }
 0x17d   :  { %v2007_v63 = vpack.c.bf16 %v1741_v7, %v1740_v9  ;;  %v1695_v47 = vsel %vm1663_vm5, %v1647_v34, %v1679_v46  ;;  %v1505_v57 = vadd.f32 -0.28449672, %v1489_v61  ;;  %v2286_v36 = vadd.f32 %v2982_v48, %v2969_v21 }
 0x17e   :  { %v1711_v26 = vadd.f32 1.0, %v1695_v47  ;;  %v1552_v29 = vmul.f32 %v3038_v17, %v1536_v18  ;;  %v1363_v43 = vmul.f32 0.3275911, %v1347_v58  ;;  %v1742_v42 = vmul.f32 1.7015043, %v1726_v2 }
 0x17f   :  { %2039 = vst [vmem:[%s3260_s3 + $0x8] sm:$0xff] %v2007_v63   ;;  %v1521_v49 = vmul.f32 %v3073_v19, %v1505_v57  ;;  %v2225_v17 = vadd.f32 %v2997_v30, %v2987_v51  ;;  %v1187_v40 = vadd.f32 %v2222_v24, %v2870_v35  ;;  %v1571_v50 = vsub.f32 0.0, %v1347_v58 }
 0x180   :  { %v1727_v45 = vmul.f32 %v1711_v26, %v1311_v54  ;;  %v1632_v59 = vmul.f32 %v2395_v25, %v1552_v29  ;;  %v1379_v9 = vadd.f32 1.0, %v1363_v43  ;;  %v2289_v15 = vadd.f32 %v2999_v3, %v2989_v52  ;;  %v3270_v26 = vld [vmem:[#allocation6_spill] sm:$0xff] }
 0x181   :  { %v1537_v12 = vadd.f32 0.2548296, %v1521_v49  ;;  %v1190_v38 = vadd.f32 %v2225_v17, %v2873_v37  ;;  %v3116_v48 = vadd.f32 %v2286_v36, %v1187_v40  ;;  %v2228_v35 = vadd.f32 %v3013_v5, %v3006_v33 }
 0x182   :  { %v1743_v20 = vmul.f32 1.7015043, %v1727_v45  ;;  %v1648_v34 = vsub.f32 1.0, %v1632_v59  ;;  %2400 = vrcp.f32 %v1379_v9  ;;  %v2292_v30 = vadd.f32 %v3021_v23, %v3008_v10 }
 0x183   :  { %v1553_v21 = vmul.f32 %v3073_v19, %v1537_v12  ;;  %v3119_v51 = vadd.f32 %v2289_v15, %v1190_v38  ;;  %v3131_v19 = vmul.f32 0.70710677, %v3116_v48  ;;  %v1610_v7 = vmul.f32 1.442695, %v1586_v16  ;;  %v3271_v12 = vld [vmem:[#allocation8_spill] sm:$0xff] }
 0x184   :  { %v2012_v14 = vpack.c.bf16 %v1743_v20, %v1742_v42  ;;  %v1680_v8 = vsub.f32 0.0, %v1648_v34  ;;  %v3125_v37 = vpop.eup %2398  ;;  %v1587_v5 = vmul.f32 %v1571_v50, %v1347_v58  ;;  %v1195_v23 = vadd.f32 %v2228_v35, %v2876_v53 }
 0x185   :  { %v1633_v3 = vmul.f32 %v2397_v22, %v1553_v21  ;;  %v1426_v31 = vmul.f32 1.0614054, %v3125_v37  ;;  %v3135_v46 = vmul.f32 0.70710677, %v3119_v51  ;;  %v1348_v10 = vand.u32 2147483647, %v3131_v19 }
 0x186   :  { %2040 = vst [vmem:[%s3260_s3 + $0x10] sm:$0xff] %v2012_v14   ;;  %v1696_v52 = vsel %vm1664_vm6, %v1648_v34, %v1680_v8  ;;  %v1312_v63 = vmul.f32 0.5, %v2942_v28  ;;  %v3141_v25 = vadd.f32 %v2292_v30, %v1195_v23  ;;  %v1313_v54 = vmul.f32 0.5, %v2955_v4  ;;  %v3272_v14 = vld [vmem:[#allocation7_spill] sm:$0xff]  ;;  %v3273_v30 = vld [vmem:[#allocation2_spill] sm:$0xff] }
 0x187   :  { %v1649_v33 = vsub.f32 1.0, %v1633_v3  ;;  %v1712_v13 = vadd.f32 1.0, %v1696_v52  ;;  %v1442_v18 = vadd.f32 -1.4531521, %v1426_v31  ;;  %v1349_v61 = vand.u32 2147483647, %v3135_v46 }
 0x188   :  { %v1364_v47 = vmul.f32 0.3275911, %v1348_v10  ;;  %vm1665_vm7 = vcmp.ge.f32.partialorder %v3270_v26, 0.0  ;;  %2402 = vpow2.f32 %v1610_v7  ;;  %v1612_v53 = vmul.f32 1.442695, %v1587_v5  ;;  %v3274_v23 = vld [vmem:[#allocation3_spill] sm:$0xff] }
 0x189   :  { %v1681_v2 = vsub.f32 0.0, %v1649_v33  ;;  %v1458_v58 = vmul.f32 %v3125_v37, %v1442_v18  ;;  %v1365_v29 = vmul.f32 0.3275911, %v1349_v61  ;;  %v1728_v45 = vmul.f32 %v1712_v13, %v1312_v63 }
 0x18a   :  { %v1380_v16 = vadd.f32 1.0, %v1364_v47  ;;  %v3150_v4 = vmul.f32 0.70710677, %v3141_v25  ;;  %v2231_v40 = vadd.f32 %v3271_v12, %v3023_v11  ;;  %v1572_v38 = vsub.f32 0.0, %v1348_v10 }
 0x18b   :  { %v1697_v57 = vsel %vm1665_vm7, %v1649_v33, %v1681_v2  ;;  %v1474_v28 = vadd.f32 1.4214138, %v1458_v58  ;;  %v1381_v49 = vadd.f32 1.0, %v1365_v29  ;;  %v1744_v22 = vmul.f32 1.7015043, %v1728_v45  ;;  %v3275_v58 = vld [vmem:[#allocation4_spill] sm:$0xff] }
 0x18c   :  { %v3146_v43 = vpop.eup %2400  ;;  %v1713_v59 = vadd.f32 1.0, %v1697_v57  ;;  %2404 = vrcp.f32 %v1380_v16  ;;  %v1350_v17 = vand.u32 2147483647, %v3150_v4  ;;  %v2295_v8 = vadd.f32 %v3036_v62, %v3272_v14 }
 0x18d   :  { %v1427_v24 = vmul.f32 1.0614054, %v3146_v43  ;;  %v1490_v9 = vmul.f32 %v3125_v37, %v1474_v28  ;;  %2406 = vrcp.f32 %v1381_v49  ;;  %v1198_v52 = vadd.f32 %v2231_v40, %v3273_v30 }
 0x18e   :  { %v1729_v42 = vmul.f32 %v1713_v59, %v1313_v54  ;;  %2408 = vpow2.f32 %v1612_v53  ;;  %v1366_v15 = vmul.f32 0.3275911, %v1350_v17  ;;  %v2234_v3 = vadd.f32 %v3051_v56, %v3044_v39 }
 0x18f   :  { %v1443_v36 = vadd.f32 -1.4531521, %v1427_v24  ;;  %v1506_v34 = vadd.f32 -0.28449672, %v1490_v9  ;;  %v1573_v7 = vsub.f32 0.0, %v1349_v61  ;;  %v2298_v11 = vadd.f32 %v3053_v6, %v3048_v1 }
 0x190   :  { %v1745_v20 = vmul.f32 1.7015043, %v1729_v42  ;;  %v1382_v33 = vadd.f32 1.0, %v1366_v15  ;;  %v3168_v62 = vadd.f32 %v2295_v8, %v1198_v52  ;;  %v1203_v13 = vadd.f32 %v2234_v3, %v3274_v23 }
 0x191   :  { %v1459_v50 = vmul.f32 %v3146_v43, %v1443_v36  ;;  %v1522_v35 = vmul.f32 %v3125_v37, %v1506_v34  ;;  %v2237_v18 = vadd.f32 %v3069_v60, %v3060_v55  ;;  %v1588_v56 = vmul.f32 %v1572_v38, %v1348_v10 }
 0x192   :  { %v2017_v21 = vpack.c.bf16 %v1745_v20, %v1744_v22  ;;  %v2403_v63 = vpop.eup %2402  ;;  %2410 = vrcp.f32 %v1382_v33  ;;  %v2301_v1 = vadd.f32 %v3071_v32, %v3062_v41  ;;  %v3178_v2 = vmul.f32 0.70710677, %v3168_v62 }
 0x193   :  { %v1475_v31 = vadd.f32 1.4214138, %v1459_v50  ;;  %v1538_v5 = vadd.f32 0.2548296, %v1522_v35  ;;  %v3180_v47 = vadd.f32 %v2298_v11, %v1203_v13  ;;  %v1206_v55 = vadd.f32 %v2237_v18, %v3275_v58 }
 0x194   :  { %2041 = vst [vmem:[%s3260_s3 + $0x18] sm:$0xff] %v2017_v21   ;;  %v1589_v57 = vmul.f32 %v1573_v7, %v1349_v61  ;;  %v1351_v41 = vand.u32 2147483647, %v3178_v2  ;;  %v1614_v53 = vmul.f32 1.442695, %v1588_v56  ;;  %v1574_v49 = vsub.f32 0.0, %v1350_v17 }
 0x195   :  { %v1491_v39 = vmul.f32 %v3146_v43, %v1475_v31  ;;  %v1554_v6 = vmul.f32 %v3125_v37, %v1538_v5  ;;  %v3192_v45 = vmul.f32 0.70710677, %v3180_v47  ;;  %v3197_v61 = vadd.f32 %v2301_v1, %v1206_v55  ;;  %v3276_v5 = vld [vmem:[#allocation5_spill] sm:$0xff] }
 0x196   :  { %v3182_v54 = vpop.eup %2404  ;;  %v1367_v24 = vmul.f32 0.3275911, %v1351_v41  ;;  %v1616_v34 = vmul.f32 1.442695, %v1589_v57  ;;  %2412 = vpow2.f32 %v1614_v53  ;;  %v1590_v14 = vmul.f32 %v1574_v49, %v1350_v17 }
 0x197   :  { %v1507_v26 = vadd.f32 -0.28449672, %v1491_v39  ;;  %v3185_v60 = vpop.eup %2406  ;;  %v1634_v29 = vmul.f32 %v2403_v63, %v1554_v6  ;;  %v1428_v10 = vmul.f32 1.0614054, %v3182_v54  ;;  %v3195_v36 = vand.u32 2147483647, %v3192_v45 }
 0x198   :  { %v2409_v32 = vpop.eup %2408  ;;  %v1429_v16 = vmul.f32 1.0614054, %v3185_v60  ;;  %v1383_v12 = vadd.f32 1.0, %v1367_v24  ;;  %v1575_v33 = vsub.f32 0.0, %v1351_v41  ;;  %v1314_v23 = vmul.f32 0.5, %v3276_v5 }
 0x199   :  { %v1523_v37 = vmul.f32 %v3146_v43, %v1507_v26  ;;  %v1650_v59 = vsub.f32 1.0, %v1634_v29  ;;  %v1444_v28 = vadd.f32 -1.4531521, %v1428_v10  ;;  %v1368_v38 = vmul.f32 0.3275911, %v3195_v36 }
 0x19a   :  { %v1445_v9 = vadd.f32 -1.4531521, %v1429_v16  ;;  %2414 = vrcp.f32 %v1383_v12  ;;  %v1618_v63 = vmul.f32 1.442695, %v1590_v14  ;;  %v1315_v39 = vmul.f32 0.5, %v3086_v27 }
 0x19b   :  { %v1539_v42 = vadd.f32 0.2548296, %v1523_v37  ;;  %v1682_v22 = vsub.f32 0.0, %v1650_v59  ;;  %v1460_v20 = vmul.f32 %v3182_v54, %v1444_v28  ;;  %v1384_v52 = vadd.f32 1.0, %v1368_v38 }
 0x19c   :  { %v1461_v50 = vmul.f32 %v3185_v60, %v1445_v9  ;;  %v3204_v8 = vpop.eup %2410  ;;  %2416 = vpow2.f32 %v1616_v34  ;;  %vm1667_vm9 = vcmp.ge.f32.partialorder %v3094_v0, 0.0  ;;  %v1591_v58 = vmul.f32 %v1575_v33, %v1351_v41 }
 0x19d   :  { %v1555_v40 = vmul.f32 %v3146_v43, %v1539_v42  ;;  %v1476_v15 = vadd.f32 1.4214138, %v1460_v20  ;;  %v1698_v21 = vsel %vm1666_vm8, %v1650_v59, %v1682_v22  ;;  %v1430_v43 = vmul.f32 1.0614054, %v3204_v8 }
 0x19e   :  { %v1477_v30 = vadd.f32 1.4214138, %v1461_v50  ;;  %2418 = vrcp.f32 %v1384_v52  ;;  %v1714_v44 = vadd.f32 1.0, %v1698_v21  ;;  %v3216_v55 = vmul.f32 0.70710677, %v3197_v61 }
 0x19f   :  { %v1635_v35 = vmul.f32 %v2409_v32, %v1555_v40  ;;  %v1492_v3 = vmul.f32 %v3182_v54, %v1476_v15  ;;  %v1446_v17 = vadd.f32 -1.4531521, %v1430_v43  ;;  %2420 = vpow2.f32 %v1618_v63 }
 0x1a0   :  { %v1493_v7 = vmul.f32 %v3185_v60, %v1477_v30  ;;  %v1730_v29 = vmul.f32 %v1714_v44, %v1314_v23  ;;  %v2413_v37 = vpop.eup %2412  ;;  %v1576_v27 = vsub.f32 0.0, %v3195_v36  ;;  %v1353_v0 = vand.u32 2147483647, %v3216_v55 }
 0x1a1   :  { %v1651_v31 = vsub.f32 1.0, %v1635_v35  ;;  %v1508_v11 = vadd.f32 -0.28449672, %v1492_v3  ;;  %v1462_v1 = vmul.f32 %v3204_v8, %v1446_v17  ;;  %v1620_v42 = vmul.f32 1.442695, %v1591_v58 }
 0x1a2   :  { %v1509_v18 = vadd.f32 -0.28449672, %v1493_v7  ;;  %v1369_v9 = vmul.f32 0.3275911, %v1353_v0  ;;  %v1746_v20 = vmul.f32 1.7015043, %v1730_v29  ;;  %v1592_v14 = vmul.f32 %v1576_v27, %v3195_v36 }
 0x1a3   :  { %v1683_v13 = vsub.f32 0.0, %v1651_v31  ;;  %v1524_v56 = vmul.f32 %v3182_v54, %v1508_v11  ;;  %v1478_v32 = vadd.f32 1.4214138, %v1462_v1  ;;  %vm1668_vm10 = vcmp.ge.f32.partialorder %v3131_v19, 0.0 }
 0x1a4   :  { %v1525_v26 = vmul.f32 %v3185_v60, %v1509_v18  ;;  %v3220_v16 = vpop.eup %2414  ;;  %v1385_v21 = vadd.f32 1.0, %v1369_v9  ;;  %vm1669_vm11 = vcmp.ge.f32.partialorder %v3135_v46, 0.0  ;;  %v1622_v44 = vmul.f32 1.442695, %v1592_v14 }
 0x1a5   :  { %v1699_v6 = vsel %vm1667_vm9, %v1651_v31, %v1683_v13  ;;  %v1540_v57 = vadd.f32 0.2548296, %v1524_v56  ;;  %v1494_v41 = vmul.f32 %v3204_v8, %v1478_v32  ;;  %v1431_v24 = vmul.f32 1.0614054, %v3220_v16 }
 0x1a6   :  { %v1715_v10 = vadd.f32 1.0, %v1699_v6  ;;  %v1541_v53 = vadd.f32 0.2548296, %v1525_v26  ;;  %v2417_v22 = vpop.eup %2416  ;;  %2422 = vrcp.f32 %v1385_v21  ;;  %v1316_v13 = vmul.f32 0.5, %v3116_v48 }
 0x1a7   :  { %v1556_v28 = vmul.f32 %v3182_v54, %v1540_v57  ;;  %v1510_v40 = vadd.f32 -0.28449672, %v1494_v41  ;;  %v1447_v15 = vadd.f32 -1.4531521, %v1431_v24  ;;  %2424 = vpow2.f32 %v1620_v42 }
 0x1a8   :  { %v1731_v59 = vmul.f32 %v1715_v10, %v1315_v39  ;;  %v1557_v49 = vmul.f32 %v3185_v60, %v1541_v53  ;;  %v2419_v50 = vpop.eup %2418  ;;  %v1317_v39 = vmul.f32 0.5, %v3119_v51  ;;  %2426 = vpow2.f32 %v1622_v44 }
 0x1a9   :  { %v1636_v12 = vmul.f32 %v2413_v37, %v1556_v28  ;;  %v1526_v30 = vmul.f32 %v3204_v8, %v1510_v40  ;;  %v1432_v60 = vmul.f32 1.0614054, %v2419_v50  ;;  %v1463_v3 = vmul.f32 %v3220_v16, %v1447_v15  ;;  %v2421_v23 = vpop.eup %2420 }
 0x1aa   :  { %v1747_v34 = vmul.f32 1.7015043, %v1731_v59  ;;  %v1637_v38 = vmul.f32 %v2417_v22, %v1557_v49  ;;  %v1577_v58 = vsub.f32 0.0, %v1353_v0  ;;  %vm1670_vm12 = vcmp.ge.f32.partialorder %v3150_v4, 0.0 }
 0x1ab   :  { %v1652_v35 = vsub.f32 1.0, %v1636_v12  ;;  %v1542_v31 = vadd.f32 0.2548296, %v1526_v30  ;;  %v1448_v7 = vadd.f32 -1.4531521, %v1432_v60  ;;  %v1318_v4 = vmul.f32 0.5, %v3141_v25 }
 0x1ac   :  { %v2022_v54 = vpack.c.bf16 %v1747_v34, %v1746_v20  ;;  %v1653_v52 = vsub.f32 1.0, %v1637_v38  ;;  %v1479_v33 = vadd.f32 1.4214138, %v1463_v3  ;;  %v1593_v28 = vmul.f32 %v1577_v58, %v1353_v0 }
 0x1ad   :  { %v1684_v43 = vsub.f32 0.0, %v1652_v35  ;;  %v1558_v17 = vmul.f32 %v3204_v8, %v1542_v31  ;;  %v1464_v5 = vmul.f32 %v2419_v50, %v1448_v7  ;;  %vm1671_vm13 = vcmp.ge.f32.partialorder %v3178_v2, 0.0 }
 0x1ae   :  { %2042 = vst [vmem:[%s3260_s3 + $0x20] sm:$0xff] %v2022_v54   ;;  %v1685_v36 = vsub.f32 0.0, %v1653_v52  ;;  %v1495_v19 = vmul.f32 %v3220_v16, %v1479_v33  ;;  %v1624_v12 = vmul.f32 1.442695, %v1593_v28  ;;  %vm1672_vm14 = vcmp.ge.f32.partialorder %v3192_v45, 0.0 }
 0x1af   :  { %v1700_v11 = vsel %vm1668_vm10, %v1652_v35, %v1684_v43  ;;  %v1638_v1 = vmul.f32 %v2421_v23, %v1558_v17  ;;  %v1480_v46 = vadd.f32 1.4214138, %v1464_v5  ;;  %vm1673_vm15 = vcmp.ge.f32.partialorder %v3216_v55, 0.0 }
 0x1b0   :  { %v1716_v18 = vadd.f32 1.0, %v1700_v11  ;;  %v1701_v63 = vsel %vm1669_vm11, %v1653_v52, %v1685_v36  ;;  %v1511_v26 = vadd.f32 -0.28449672, %v1495_v19  ;;  %v2423_v27 = vpop.eup %2422  ;;  %2428 = vpow2.f32 %v1624_v12 }
 0x1b1   :  { %v1717_v56 = vadd.f32 1.0, %v1701_v63  ;;  %v1654_v8 = vsub.f32 1.0, %v1638_v1  ;;  %v1496_v10 = vmul.f32 %v2419_v50, %v1480_v46  ;;  %v1433_v49 = vmul.f32 1.0614054, %v2423_v27  ;;  %v2425_v42 = vpop.eup %2424 }
 0x1b2   :  { %v1732_v6 = vmul.f32 %v1716_v18, %v1316_v13  ;;  %v1527_v32 = vmul.f32 %v3220_v16, %v1511_v26  ;;  %v2427_v0 = vpop.eup %2426  ;;  %v1319_v52 = vmul.f32 0.5, %v3168_v62  ;;  %v1320_v63 = vmul.f32 0.5, %v3180_v47 }
 0x1b3   :  { %v1733_v29 = vmul.f32 %v1717_v56, %v1317_v39  ;;  %v1686_v37 = vsub.f32 0.0, %v1654_v8  ;;  %v1512_v53 = vadd.f32 -0.28449672, %v1496_v10  ;;  %v1449_v20 = vadd.f32 -1.4531521, %v1433_v49 }
 0x1b4   :  { %v1748_v57 = vmul.f32 1.7015043, %v1732_v6  ;;  %v1543_v59 = vadd.f32 0.2548296, %v1527_v32  ;;  %v1321_v56 = vmul.f32 0.5, %v3197_v61 }
 0x1b5   :  { %v1749_v48 = vmul.f32 1.7015043, %v1733_v29  ;;  %v1528_v41 = vmul.f32 %v2419_v50, %v1512_v53  ;;  %v1702_v9 = vsel %vm1670_vm12, %v1654_v8, %v1686_v37  ;;  %v1465_v38 = vmul.f32 %v2423_v27, %v1449_v20 }
 0x1b6   :  { %v1559_v24 = vmul.f32 %v3220_v16, %v1543_v59  ;;  %v1718_v15 = vadd.f32 1.0, %v1702_v9 }
 0x1b7   :  { %v2027_v51 = vpack.c.bf16 %v1749_v48, %v1748_v57  ;;  %v1544_v22 = vadd.f32 0.2548296, %v1528_v41  ;;  %v1481_v54 = vadd.f32 1.4214138, %v1465_v38 }
 0x1b8   :  { %v1639_v34 = vmul.f32 %v2425_v42, %v1559_v24  ;;  %v1734_v30 = vmul.f32 %v1718_v15, %v1318_v4 }
 0x1b9   :  { %2043 = vst [vmem:[%s3260_s3 + $0x28] sm:$0xff] %v2027_v51   ;;  %v1560_v40 = vmul.f32 %v2419_v50, %v1544_v22  ;;  %v1497_v35 = vmul.f32 %v2423_v27, %v1481_v54 }
 0x1ba   :  { %v1655_v14 = vsub.f32 1.0, %v1639_v34  ;;  %v1750_v36 = vmul.f32 1.7015043, %v1734_v30  ;;  %v2429_v5 = vpop.eup %2428 }
 0x1bb   :  { %v1640_v21 = vmul.f32 %v2427_v0, %v1560_v40  ;;  %v1513_v50 = vadd.f32 -0.28449672, %v1497_v35 }
 0x1bc   :  { %v1687_v16 = vsub.f32 0.0, %v1655_v14 }
 0x1bd   :  { %v1656_v43 = vsub.f32 1.0, %v1640_v21  ;;  %v1529_v7 = vmul.f32 %v2423_v27, %v1513_v50 }
 0x1be   :  { %v1703_v60 = vsel %vm1671_vm13, %v1655_v14, %v1687_v16 }
 0x1bf   :  { %v1719_v3 = vadd.f32 1.0, %v1703_v60  ;;  %v1688_v44 = vsub.f32 0.0, %v1656_v43  ;;  %v1545_v11 = vadd.f32 0.2548296, %v1529_v7 }
 0x1c1   :  { %v1735_v31 = vmul.f32 %v1719_v3, %v1319_v52  ;;  %v1561_v25 = vmul.f32 %v2423_v27, %v1545_v11  ;;  %v1704_v2 = vsel %vm1672_vm14, %v1656_v43, %v1688_v44 }
 0x1c2   :  { %v1720_v13 = vadd.f32 1.0, %v1704_v2 }
 0x1c3   :  { %v1751_v33 = vmul.f32 1.7015043, %v1735_v31  ;;  %v1641_v62 = vmul.f32 %v2429_v5, %v1561_v25 }
 0x1c4   :  { %v1736_v39 = vmul.f32 %v1720_v13, %v1320_v63 }
 0x1c5   :  { %v2032_v17 = vpack.c.bf16 %v1751_v33, %v1750_v36  ;;  %v1657_v23 = vsub.f32 1.0, %v1641_v62 }
 0x1c6   :  { %v1752_v45 = vmul.f32 1.7015043, %v1736_v39 }
 0x1c7   :  { %2044 = vst [vmem:[%s3260_s3 + $0x30] sm:$0xff] %v2032_v17   ;;  %v1689_v18 = vsub.f32 0.0, %v1657_v23 }
 0x1c9   :  { %v1705_v19 = vsel %vm1673_vm15, %v1657_v23, %v1689_v18 }
 0x1ca   :  { %v1721_v1 = vadd.f32 1.0, %v1705_v19 }
 0x1cc   :  { %v1737_v46 = vmul.f32 %v1721_v1, %v1321_v56 }
 0x1ce   :  { %v1753_v6 = vmul.f32 1.7015043, %v1737_v46 }
 0x1d0   :  { %v2037_v26 = vpack.c.bf16 %v1753_v6, %v1752_v45 }
 0x1d2   :  { %2045 = vst [vmem:[%s3260_s3 + $0x38] sm:$0xff] %v2037_v26  }

// kernel: model_injection_forward.6
= control target key start
LH: loop header
LB: loop body
LE: loop exit
PB: predicated region body
PF: predicated region fallthrough
CT: control target
= control target key end

     0   :  { %s4304_s1 = inlined_call_operand.vmem [shape: bf16[2048,256], index: 1, kind: input, shape index: {}]   ;;  %s4305_s0 = inlined_call_operand.vmem [shape: bf16[32,2048], index: 0, kind: input, shape index: {}]   ;;  %s4306_s2 = inlined_call_operand.vmem [shape: f32[1,256], index: 2, kind: input, shape index: {}]   ;;  %s4307_s3 = inlined_call_operand.vmem [shape: bf16[32,256], index: 3, kind: output, shape index: {}]  }
   0x1   :  { %v2794_v0 = vld [vmem:[%s4304_s1 + $0x4] ss:$8 sps:$4 sm:$0xff]   ;;  %v2798_v2 = vld [vmem:[%s4304_s1] ss:$8 sps:$4 sm:$0xff]   ;;  %v2800_v4 = vld [vmem:[%s4304_s1 + $0x14] ss:$8 sps:$4 sm:$0xff]  }
   0x2   :  { %v2796_v1 = vld [vmem:[%s4304_s1 + $0x404] ss:$8 sps:$4 sm:$0xff]   ;;  %1754 = vmatprep.subr.bf16.mxu1 %v2794_v0  ;;  %v2799_v3 = vld [vmem:[%s4304_s1 + $0x400] ss:$8 sps:$4 sm:$0xff]   ;;  %v2802_v5 = vld [vmem:[%s4304_s1 + $0x414] ss:$8 sps:$4 sm:$0xff]  }
   0x3   :  { %1966 = vmatprep.subr.bf16.mxu0 %v2796_v1  ;;  %1755 = vmatpush1.bf16.msra.mxu1 %v2798_v2  ;;  %v2804_v6 = vld [vmem:[%s4304_s1 + $0x10] ss:$8 sps:$4 sm:$0xff]   ;;  %v2806_v8 = vld [vmem:[%s4304_s1 + $0x24] ss:$8 sps:$4 sm:$0xff]   ;;  %v2810_v10 = vld [vmem:[%s4304_s1 + $0x20] ss:$8 sps:$4 sm:$0xff]  }
   0x4   :  { %1967 = vmatpush1.bf16.msra.mxu0 %v2799_v3  ;;  %1756 = vmatprep.subr.bf16.mxu1 %v2800_v4  ;;  %v2805_v7 = vld [vmem:[%s4304_s1 + $0x410] ss:$8 sps:$4 sm:$0xff]   ;;  %v2808_v9 = vld [vmem:[%s4304_s1 + $0x424] ss:$8 sps:$4 sm:$0xff]   ;;  %v2811_v11 = vld [vmem:[%s4304_s1 + $0x420] ss:$8 sps:$4 sm:$0xff]  }
   0x5   :  { %1968 = vmatprep.subr.bf16.mxu0 %v2802_v5  ;;  %v2812_v12 = vld [vmem:[%s4304_s1 + $0x34] ss:$8 sps:$4 sm:$0xff]   ;;  %v2816_v14 = vld [vmem:[%s4304_s1 + $0x30] ss:$8 sps:$4 sm:$0xff]   ;;  %v2818_v16 = vld [vmem:[%s4304_s1 + $0x44] ss:$8 sps:$4 sm:$0xff]  }
   0x6   :  { %v2814_v13 = vld [vmem:[%s4304_s1 + $0x434] ss:$8 sps:$4 sm:$0xff]   ;;  %v2817_v15 = vld [vmem:[%s4304_s1 + $0x430] ss:$8 sps:$4 sm:$0xff]   ;;  %v2820_v17 = vld [vmem:[%s4304_s1 + $0x444] ss:$8 sps:$4 sm:$0xff]  }
   0x7   :  { %1757 = vmatpush1.bf16.msra.mxu1 %v2804_v6  ;;  %v2822_v18 = vld [vmem:[%s4304_s1 + $0x40] ss:$8 sps:$4 sm:$0xff]   ;;  %v2824_v20 = vld [vmem:[%s4304_s1 + $0x54] ss:$8 sps:$4 sm:$0xff]   ;;  %v2828_v22 = vld [vmem:[%s4304_s1 + $0x50] ss:$8 sps:$4 sm:$0xff]  }
   0x8   :  { %1969 = vmatpush1.bf16.msra.mxu0 %v2805_v7  ;;  %1758 = vmatprep.subr.bf16.mxu1 %v2806_v8  ;;  %v2823_v19 = vld [vmem:[%s4304_s1 + $0x440] ss:$8 sps:$4 sm:$0xff]   ;;  %v2826_v21 = vld [vmem:[%s4304_s1 + $0x454] ss:$8 sps:$4 sm:$0xff]   ;;  %v2829_v23 = vld [vmem:[%s4304_s1 + $0x450] ss:$8 sps:$4 sm:$0xff]  }
   0x9   :  { %1970 = vmatprep.subr.bf16.mxu0 %v2808_v9  ;;  %v2830_v24 = vld [vmem:[%s4304_s1 + $0x64] ss:$8 sps:$4 sm:$0xff]   ;;  %v2834_v26 = vld [vmem:[%s4304_s1 + $0x60] ss:$8 sps:$4 sm:$0xff]   ;;  %v2836_v28 = vld [vmem:[%s4304_s1 + $0x74] ss:$8 sps:$4 sm:$0xff]  }
   0xa   :  { %v2832_v25 = vld [vmem:[%s4304_s1 + $0x464] ss:$8 sps:$4 sm:$0xff]   ;;  %v2835_v27 = vld [vmem:[%s4304_s1 + $0x460] ss:$8 sps:$4 sm:$0xff]   ;;  %v2838_v29 = vld [vmem:[%s4304_s1 + $0x474] ss:$8 sps:$4 sm:$0xff]  }
   0xb   :  { %1759 = vmatpush1.bf16.msra.mxu1 %v2810_v10  ;;  %v2840_v30 = vld [vmem:[%s4304_s1 + $0x70] ss:$8 sps:$4 sm:$0xff]   ;;  %v2842_v32 = vld [vmem:[%s4304_s1 + $0x84] ss:$8 sps:$4 sm:$0xff]   ;;  %v2846_v34 = vld [vmem:[%s4304_s1 + $0x80] ss:$8 sps:$4 sm:$0xff]  }
   0xc   :  { %1971 = vmatpush1.bf16.msra.mxu0 %v2811_v11  ;;  %1760 = vmatprep.subr.bf16.mxu1 %v2812_v12  ;;  %v2841_v31 = vld [vmem:[%s4304_s1 + $0x470] ss:$8 sps:$4 sm:$0xff]   ;;  %v2844_v33 = vld [vmem:[%s4304_s1 + $0x484] ss:$8 sps:$4 sm:$0xff]   ;;  %v2847_v35 = vld [vmem:[%s4304_s1 + $0x480] ss:$8 sps:$4 sm:$0xff]  }
   0xd   :  { %1972 = vmatprep.subr.bf16.mxu0 %v2814_v13  ;;  %v2848_v36 = vld [vmem:[%s4304_s1 + $0x94] ss:$8 sps:$4 sm:$0xff]   ;;  %v2852_v38 = vld [vmem:[%s4304_s1 + $0x90] ss:$8 sps:$4 sm:$0xff]   ;;  %v2854_v40 = vld [vmem:[%s4304_s1 + $0xa4] ss:$8 sps:$4 sm:$0xff]  }
   0xe   :  { %v2850_v37 = vld [vmem:[%s4304_s1 + $0x494] ss:$8 sps:$4 sm:$0xff]   ;;  %v2853_v39 = vld [vmem:[%s4304_s1 + $0x490] ss:$8 sps:$4 sm:$0xff]   ;;  %v2856_v41 = vld [vmem:[%s4304_s1 + $0x4a4] ss:$8 sps:$4 sm:$0xff]  }
   0xf   :  { %1761 = vmatpush1.bf16.msra.mxu1 %v2816_v14  ;;  %v2858_v42 = vld [vmem:[%s4304_s1 + $0xa0] ss:$8 sps:$4 sm:$0xff]   ;;  %v2860_v44 = vld [vmem:[%s4304_s1 + $0xb4] ss:$8 sps:$4 sm:$0xff]   ;;  %v2864_v46 = vld [vmem:[%s4304_s1 + $0xb0] ss:$8 sps:$4 sm:$0xff]  }
  0x10   :  { %1973 = vmatpush1.bf16.msra.mxu0 %v2817_v15  ;;  %1762 = vmatprep.subr.bf16.mxu1 %v2818_v16  ;;  %v2859_v43 = vld [vmem:[%s4304_s1 + $0x4a0] ss:$8 sps:$4 sm:$0xff]   ;;  %v2862_v45 = vld [vmem:[%s4304_s1 + $0x4b4] ss:$8 sps:$4 sm:$0xff]   ;;  %v2865_v47 = vld [vmem:[%s4304_s1 + $0x4b0] ss:$8 sps:$4 sm:$0xff]  }
  0x11   :  { %1974 = vmatprep.subr.bf16.mxu0 %v2820_v17  ;;  %v14_v48 = vld [vmem:[%s4305_s0] sm:$0xff]  ;;  %v2872_v58 = vld [vmem:[%s4304_s1 + $0xd4] ss:$8 sps:$4 sm:$0xff]   ;;  %v2876_v60 = vld [vmem:[%s4304_s1 + $0xd0] ss:$8 sps:$4 sm:$0xff]  }
  0x12   :  { %v22_v49 = vld [vmem:[%s4305_s0 + $0x40] sm:$0xff]  ;;  %v2874_v59 = vld [vmem:[%s4304_s1 + $0x4d4] ss:$8 sps:$4 sm:$0xff]   ;;  %v2877_v61 = vld [vmem:[%s4304_s1 + $0x4d0] ss:$8 sps:$4 sm:$0xff]  }
  0x13   :  { %1763 = vmatpush1.bf16.msra.mxu1 %v2822_v18  ;;  %v2866_v50 = vld [vmem:[%s4304_s1 + $0xc4] ss:$8 sps:$4 sm:$0xff]   ;;  %v2435_v52 = vcombine.high %v14_v48, %v22_v49  ;;  %v2870_v56 = vld [vmem:[%s4304_s1 + $0xc0] ss:$8 sps:$4 sm:$0xff]   ;;  %v2884_v2 = vld [vmem:[%s4304_s1 + $0xf4] ss:$8 sps:$4 sm:$0xff]   ;;  %v2434_v8 = vcombine.low %v14_v48, %v22_v49 }
  0x14   :  { %1975 = vmatpush1.bf16.msra.mxu0 %v2823_v19  ;;  %1764 = vmatprep.subr.bf16.mxu1 %v2824_v20  ;;  %v2868_v51 = vld [vmem:[%s4304_s1 + $0x4c4] ss:$8 sps:$4 sm:$0xff]   ;;  %v2871_v57 = vld [vmem:[%s4304_s1 + $0x4c0] ss:$8 sps:$4 sm:$0xff]   ;;  %v2886_v3 = vld [vmem:[%s4304_s1 + $0x4f4] ss:$8 sps:$4 sm:$0xff]  }
  0x15   :  { %1976 = vmatprep.subr.bf16.mxu0 %v2826_v21  ;;  %v18_v53 = vld [vmem:[%s4305_s0 + $0x20] sm:$0xff]  ;;  %1786 = vmatprep.mubr.bf16.mxu1 %v2435_v52  ;;  %v2888_v4 = vld [vmem:[%s4304_s1 + $0xf0] ss:$8 sps:$4 sm:$0xff]   ;;  %v2898_v12 = vld [vmem:[%s4304_s1 + $0x114] ss:$8 sps:$4 sm:$0xff]  }
  0x16   :  { %v26_v54 = vld [vmem:[%s4305_s0 + $0x60] sm:$0xff]  ;;  %v2889_v5 = vld [vmem:[%s4304_s1 + $0x4f0] ss:$8 sps:$4 sm:$0xff]   ;;  %v2901_v13 = vld [vmem:[%s4304_s1 + $0x514] ss:$8 sps:$4 sm:$0xff]  }
  0x17   :  { %1765 = vmatpush1.bf16.msra.mxu1 %v2828_v22  ;;  %v2443_v55 = vcombine.high %v18_v53, %v26_v54  ;;  %v2878_v62 = vld [vmem:[%s4304_s1 + $0xe4] ss:$8 sps:$4 sm:$0xff]   ;;  %v2882_v0 = vld [vmem:[%s4304_s1 + $0xe0] ss:$8 sps:$4 sm:$0xff]   ;;  %v2442_v10 = vcombine.low %v18_v53, %v26_v54  ;;  %v2896_v14 = vld [vmem:[%s4304_s1 + $0x110] ss:$8 sps:$4 sm:$0xff]  }
  0x18   :  { %1977 = vmatpush1.bf16.msra.mxu0 %v2829_v23  ;;  %1766 = vmatprep.subr.bf16.mxu1 %v2830_v24  ;;  %v2880_v63 = vld [vmem:[%s4304_s1 + $0x4e4] ss:$8 sps:$4 sm:$0xff]   ;;  %v2883_v1 = vld [vmem:[%s4304_s1 + $0x4e0] ss:$8 sps:$4 sm:$0xff]   ;;  %v2899_v15 = vld [vmem:[%s4304_s1 + $0x510] ss:$8 sps:$4 sm:$0xff]  }
  0x19   :  { %1978 = vmatprep.subr.bf16.mxu0 %v2832_v25  ;;  %1998 = vmatprep.mubr.bf16.mxu0 %v2443_v55  ;;  %v2892_v6 = vld [vmem:[%s4304_s1 + $0x104] ss:$8 sps:$4 sm:$0xff]   ;;  %v2890_v9 = vld [vmem:[%s4304_s1 + $0x100] ss:$8 sps:$4 sm:$0xff]   ;;  %v2910_v20 = vld [vmem:[%s4304_s1 + $0x134] ss:$8 sps:$4 sm:$0xff]  }
  0x1a   :  { %v2895_v7 = vld [vmem:[%s4304_s1 + $0x504] ss:$8 sps:$4 sm:$0xff]   ;;  %v2893_v11 = vld [vmem:[%s4304_s1 + $0x500] ss:$8 sps:$4 sm:$0xff]   ;;  %v2913_v21 = vld [vmem:[%s4304_s1 + $0x534] ss:$8 sps:$4 sm:$0xff]  }
  0x1b   :  { %1767 = vmatpush1.bf16.msra.mxu1 %v2834_v26  ;;  %v2904_v16 = vld [vmem:[%s4304_s1 + $0x124] ss:$8 sps:$4 sm:$0xff]   ;;  %v2902_v18 = vld [vmem:[%s4304_s1 + $0x120] ss:$8 sps:$4 sm:$0xff]   ;;  %v2908_v22 = vld [vmem:[%s4304_s1 + $0x130] ss:$8 sps:$4 sm:$0xff]  }
  0x1c   :  { %1979 = vmatpush1.bf16.msra.mxu0 %v2835_v27  ;;  %1768 = vmatprep.subr.bf16.mxu1 %v2836_v28  ;;  %v2907_v17 = vld [vmem:[%s4304_s1 + $0x524] ss:$8 sps:$4 sm:$0xff]   ;;  %v2905_v19 = vld [vmem:[%s4304_s1 + $0x520] ss:$8 sps:$4 sm:$0xff]   ;;  %v2911_v23 = vld [vmem:[%s4304_s1 + $0x530] ss:$8 sps:$4 sm:$0xff]  }
  0x1d   :  { %1980 = vmatprep.subr.bf16.mxu0 %v2838_v29  ;;  %v2916_v24 = vld [vmem:[%s4304_s1 + $0x144] ss:$8 sps:$4 sm:$0xff]   ;;  %v2914_v26 = vld [vmem:[%s4304_s1 + $0x140] ss:$8 sps:$4 sm:$0xff]   ;;  %v2922_v28 = vld [vmem:[%s4304_s1 + $0x154] ss:$8 sps:$4 sm:$0xff]  }
  0x1e   :  { %v2919_v25 = vld [vmem:[%s4304_s1 + $0x544] ss:$8 sps:$4 sm:$0xff]   ;;  %v2917_v27 = vld [vmem:[%s4304_s1 + $0x540] ss:$8 sps:$4 sm:$0xff]   ;;  %v2925_v29 = vld [vmem:[%s4304_s1 + $0x554] ss:$8 sps:$4 sm:$0xff]  }
  0x1f   :  { %1769 = vmatpush1.bf16.msra.mxu1 %v2840_v30  ;;  %v30_v30 = vld [vmem:[%s4305_s0 + $0x80] sm:$0xff]  ;;  %v3551_v49 = vld [vmem:[%s4305_s0 + $0x28] sm:$0xff]  ;;  %v2935_v52 = vld [vmem:[%s4304_s1 + $0x570] ss:$8 sps:$4 sm:$0xff]  }
  0x20   :  { %1981 = vmatpush1.bf16.msra.mxu0 %v2841_v31  ;;  %1770 = vmatprep.subr.bf16.mxu1 %v2842_v32  ;;  %v38_v31 = vld [vmem:[%s4305_s0 + $0xc0] sm:$0xff]  ;;  %v2920_v32 = vld [vmem:[%s4304_s1 + $0x150] ss:$8 sps:$4 sm:$0xff]  }
  0x21   :  { %1982 = vmatprep.subr.bf16.mxu0 %v2844_v33  ;;  %v2451_v33 = vcombine.high %v30_v30, %v38_v31  ;;  %v2940_v54 = vld [vmem:[%s4304_s1 + $0x184] ss:$8 sps:$4 sm:$0xff]  }
  0x22   :  { %v2943_v55 = vld [vmem:[%s4304_s1 + $0x584] ss:$8 sps:$4 sm:$0xff]  }
  0x23   :  { %1771 = vmatpush1.bf16.msra.mxu1 %v2846_v34  ;;  %v2923_v34 = vld [vmem:[%s4304_s1 + $0x550] ss:$8 sps:$4 sm:$0xff]  }
  0x24   :  { %1983 = vmatpush1.bf16.msra.mxu0 %v2847_v35  ;;  %1772 = vmatprep.subr.bf16.mxu1 %v2848_v36  ;;  %v34_v35 = vld [vmem:[%s4305_s0 + $0xa0] sm:$0xff] }
  0x25   :  { %1984 = vmatprep.subr.bf16.mxu0 %v2850_v37  ;;  %v42_v36 = vld [vmem:[%s4305_s0 + $0xe0] sm:$0xff]  ;;  %v2450_v37 = vcombine.low %v30_v30, %v38_v31  ;;  %v2994_v30 = vld [vmem:[%s4304_s1 + $0x214] ss:$8 sps:$4 sm:$0xff]  }
  0x26   :  { %v2997_v31 = vld [vmem:[%s4304_s1 + $0x614] ss:$8 sps:$4 sm:$0xff]  }
  0x27   :  { %1773 = vmatpush1.bf16.msra.mxu1 %v2852_v38  ;;  %v2928_v38 = vld [vmem:[%s4304_s1 + $0x164] ss:$8 sps:$4 sm:$0xff]  }
  0x28   :  { %1985 = vmatpush1.bf16.msra.mxu0 %v2853_v39  ;;  %1774 = vmatprep.subr.bf16.mxu1 %v2854_v40  ;;  %v2459_v39 = vcombine.high %v34_v35, %v42_v36  ;;  %v2458_v40 = vcombine.low %v34_v35, %v42_v36  ;;  %v2992_v36 = vld [vmem:[%s4304_s1 + $0x210] ss:$8 sps:$4 sm:$0xff]  }
  0x29   :  { %1986 = vmatprep.subr.bf16.mxu0 %v2856_v41  ;;  %v2931_v41 = vld [vmem:[%s4304_s1 + $0x564] ss:$8 sps:$4 sm:$0xff]  }
  0x2b   :  { %1775 = vmatpush1.bf16.msra.mxu1 %v2858_v42  ;;  %v2926_v42 = vld [vmem:[%s4304_s1 + $0x160] ss:$8 sps:$4 sm:$0xff]  }
  0x2c   :  { %1987 = vmatpush1.bf16.msra.mxu0 %v2859_v43  ;;  %1776 = vmatprep.subr.bf16.mxu1 %v2860_v44  ;;  %v2929_v43 = vld [vmem:[%s4304_s1 + $0x560] ss:$8 sps:$4 sm:$0xff]  }
  0x2d   :  { %1988 = vmatprep.subr.bf16.mxu0 %v2862_v45  ;;  %v3533_v44 = vld [vmem:[%s4305_s0 + $0x8] sm:$0xff] }
  0x2e   :  { %v3538_v45 = vld [vmem:[%s4305_s0 + $0x48] sm:$0xff] }
  0x2f   :  { %1777 = vmatpush1.bf16.msra.mxu1 %v2864_v46  ;;  %v2934_v46 = vld [vmem:[%s4304_s1 + $0x174] ss:$8 sps:$4 sm:$0xff]   ;;  %v2437_v48 = vcombine.high %v3533_v44, %v3538_v45 }
  0x30   :  { %1989 = vmatpush1.bf16.msra.mxu0 %v2865_v47  ;;  %1778 = vmatprep.subr.bf16.mxu1 %v2866_v50  ;;  %v2937_v47 = vld [vmem:[%s4304_s1 + $0x574] ss:$8 sps:$4 sm:$0xff]   ;;  %v3556_v50 = vld [vmem:[%s4305_s0 + $0x68] sm:$0xff] }
  0x31   :  { %1990 = vmatprep.subr.bf16.mxu0 %v2868_v51  ;;  %v2932_v51 = vld [vmem:[%s4304_s1 + $0x170] ss:$8 sps:$4 sm:$0xff]   ;;  %v2445_v53 = vcombine.high %v3551_v49, %v3556_v50 }
  0x33   :  { %1779 = vmatpush1.bf16.msra.mxu1 %v2870_v56  ;;  %v2938_v56 = vld [vmem:[%s4304_s1 + $0x180] ss:$8 sps:$4 sm:$0xff]  }
  0x34   :  { %1991 = vmatpush1.bf16.msra.mxu0 %v2871_v57  ;;  %1780 = vmatprep.subr.bf16.mxu1 %v2872_v58  ;;  %v2941_v57 = vld [vmem:[%s4304_s1 + $0x580] ss:$8 sps:$4 sm:$0xff]   ;;  %v2946_v58 = vld [vmem:[%s4304_s1 + $0x194] ss:$8 sps:$4 sm:$0xff]  }
  0x35   :  { %1992 = vmatprep.subr.bf16.mxu0 %v2874_v59  ;;  %v2949_v59 = vld [vmem:[%s4304_s1 + $0x594] ss:$8 sps:$4 sm:$0xff]  }
  0x37   :  { %1781 = vmatpush1.bf16.msra.mxu1 %v2876_v60  ;;  %v2944_v60 = vld [vmem:[%s4304_s1 + $0x190] ss:$8 sps:$4 sm:$0xff]  }
  0x38   :  { %1993 = vmatpush1.bf16.msra.mxu0 %v2877_v61  ;;  %1782 = vmatprep.subr.bf16.mxu1 %v2878_v62  ;;  %v2947_v61 = vld [vmem:[%s4304_s1 + $0x590] ss:$8 sps:$4 sm:$0xff]   ;;  %v2952_v62 = vld [vmem:[%s4304_s1 + $0x1a4] ss:$8 sps:$4 sm:$0xff]  }
  0x39   :  { %1994 = vmatprep.subr.bf16.mxu0 %v2880_v63  ;;  %v2955_v63 = vld [vmem:[%s4304_s1 + $0x5a4] ss:$8 sps:$4 sm:$0xff]  }
  0x3b   :  { %1783 = vmatpush1.bf16.msra.mxu1 %v2882_v0  ;;  %v2950_v0 = vld [vmem:[%s4304_s1 + $0x1a0] ss:$8 sps:$4 sm:$0xff]  }
  0x3c   :  { %1995 = vmatpush1.bf16.msra.mxu0 %v2883_v1  ;;  %1784 = vmatprep.subr.bf16.mxu1 %v2884_v2  ;;  %v2953_v1 = vld [vmem:[%s4304_s1 + $0x5a0] ss:$8 sps:$4 sm:$0xff]   ;;  %v2958_v2 = vld [vmem:[%s4304_s1 + $0x1b4] ss:$8 sps:$4 sm:$0xff]  }
  0x3d   :  { %1996 = vmatprep.subr.bf16.mxu0 %v2886_v3  ;;  %v2961_v3 = vld [vmem:[%s4304_s1 + $0x5b4] ss:$8 sps:$4 sm:$0xff]  }
  0x3f   :  { %1785 = vmatpush1.bf16.msra.mxu1 %v2888_v4  ;;  %v2956_v4 = vld [vmem:[%s4304_s1 + $0x1b0] ss:$8 sps:$4 sm:$0xff]  }
  0x40   :  { %1997 = vmatpush1.bf16.msra.mxu0 %v2889_v5  ;;  %1807 = vmatprep.subr.bf16.mxu1 %v2892_v6  ;;  %v2959_v5 = vld [vmem:[%s4304_s1 + $0x5b0] ss:$8 sps:$4 sm:$0xff]   ;;  %v2964_v6 = vld [vmem:[%s4304_s1 + $0x1c4] ss:$8 sps:$4 sm:$0xff]  }
  0x41   :  { %2019 = vmatprep.subr.bf16.mxu0 %v2895_v7  ;;  %v2967_v7 = vld [vmem:[%s4304_s1 + $0x5c4] ss:$8 sps:$4 sm:$0xff]  }
  0x42   :  { %1787 = vmatmul.mubr.bf16.vlgmr.msra.gmra.mrb[0].mxu1 %v2434_v8  ;;  %v2962_v8 = vld [vmem:[%s4304_s1 + $0x1c0] ss:$8 sps:$4 sm:$0xff]  }
  0x43   :  { %1999 = vmatmul.mubr.bf16.vlgmr.msra.gmra.mrb[0].mxu0 %v2442_v10  ;;  %1808 = vmatpush1.bf16.msra.mxu1 %v2890_v9  ;;  %v2965_v9 = vld [vmem:[%s4304_s1 + $0x5c0] ss:$8 sps:$4 sm:$0xff]   ;;  %v2970_v10 = vld [vmem:[%s4304_s1 + $0x1d4] ss:$8 sps:$4 sm:$0xff]  }
  0x44   :  { %2020 = vmatpush1.bf16.msra.mxu0 %v2893_v11  ;;  %1809 = vmatprep.subr.bf16.mxu1 %v2898_v12  ;;  %v2973_v11 = vld [vmem:[%s4304_s1 + $0x5d4] ss:$8 sps:$4 sm:$0xff]   ;;  %v2968_v12 = vld [vmem:[%s4304_s1 + $0x1d0] ss:$8 sps:$4 sm:$0xff]  }
  0x45   :  { %2021 = vmatprep.subr.bf16.mxu0 %v2901_v13  ;;  %1796 = vmatprep.mubr.bf16.mxu1 %v2451_v33  ;;  %v2971_v13 = vld [vmem:[%s4304_s1 + $0x5d0] ss:$8 sps:$4 sm:$0xff]   ;;  %v43_v33 = vld [vmem:[%s4305_s0 + $0xe8] sm:$0xff] }
  0x46   :  { %2008 = vmatprep.mubr.bf16.mxu0 %v2459_v39  ;;  %v3003_v39 = vld [vmem:[%s4304_s1 + $0x624] ss:$8 sps:$4 sm:$0xff]  }
  0x47   :  { %1810 = vmatpush1.bf16.msra.mxu1 %v2896_v14  ;;  %v2976_v14 = vld [vmem:[%s4304_s1 + $0x1e4] ss:$8 sps:$4 sm:$0xff]  }
  0x48   :  { %2022 = vmatpush1.bf16.msra.mxu0 %v2899_v15  ;;  %1811 = vmatprep.subr.bf16.mxu1 %v2904_v16  ;;  %v2979_v15 = vld [vmem:[%s4304_s1 + $0x5e4] ss:$8 sps:$4 sm:$0xff]   ;;  %v2974_v16 = vld [vmem:[%s4304_s1 + $0x1e0] ss:$8 sps:$4 sm:$0xff]  }
  0x49   :  { %2023 = vmatprep.subr.bf16.mxu0 %v2907_v17  ;;  %v2977_v17 = vld [vmem:[%s4304_s1 + $0x5e0] ss:$8 sps:$4 sm:$0xff]  }
  0x4a   :  { %1797 = vmatmul.mubr.bf16.gmra.mrb[4].mxu1 %v2450_v37  ;;  %v2995_v37 = vld [vmem:[%s4304_s1 + $0x610] ss:$8 sps:$4 sm:$0xff]  }
  0x4b   :  { %1812 = vmatpush1.bf16.msra.mxu1 %v2902_v18  ;;  %2009 = vmatmul.mubr.bf16.gmra.mrb[4].mxu0 %v2458_v40  ;;  %v2982_v18 = vld [vmem:[%s4304_s1 + $0x1f4] ss:$8 sps:$4 sm:$0xff]   ;;  %v2998_v40 = vld [vmem:[%s4304_s1 + $0x220] ss:$8 sps:$4 sm:$0xff]  }
  0x4c   :  { %2024 = vmatpush1.bf16.msra.mxu0 %v2905_v19  ;;  %1813 = vmatprep.subr.bf16.mxu1 %v2910_v20  ;;  %v2985_v19 = vld [vmem:[%s4304_s1 + $0x5f4] ss:$8 sps:$4 sm:$0xff]   ;;  %v2980_v20 = vld [vmem:[%s4304_s1 + $0x1f0] ss:$8 sps:$4 sm:$0xff]  }
  0x4d   :  { %2025 = vmatprep.subr.bf16.mxu0 %v2913_v21  ;;  %1839 = vmatprep.mubr.bf16.mxu1 %v2437_v48  ;;  %v2983_v21 = vld [vmem:[%s4304_s1 + $0x5f0] ss:$8 sps:$4 sm:$0xff]   ;;  %v3006_v48 = vld [vmem:[%s4304_s1 + $0x234] ss:$8 sps:$4 sm:$0xff]  }
  0x4e   :  { %2051 = vmatprep.mubr.bf16.mxu0 %v2445_v53  ;;  %v3007_v53 = vld [vmem:[%s4304_s1 + $0x630] ss:$8 sps:$4 sm:$0xff]  }
  0x4f   :  { %1814 = vmatpush1.bf16.msra.mxu1 %v2908_v22  ;;  %v2988_v22 = vld [vmem:[%s4304_s1 + $0x204] ss:$8 sps:$4 sm:$0xff]  }
  0x50   :  { %2026 = vmatpush1.bf16.msra.mxu0 %v2911_v23  ;;  %1815 = vmatprep.subr.bf16.mxu1 %v2916_v24  ;;  %v2991_v23 = vld [vmem:[%s4304_s1 + $0x604] ss:$8 sps:$4 sm:$0xff]   ;;  %v2986_v24 = vld [vmem:[%s4304_s1 + $0x200] ss:$8 sps:$4 sm:$0xff]  }
  0x51   :  { %2027 = vmatprep.subr.bf16.mxu0 %v2919_v25  ;;  %v2989_v25 = vld [vmem:[%s4304_s1 + $0x600] ss:$8 sps:$4 sm:$0xff]  }
  0x53   :  { %1816 = vmatpush1.bf16.msra.mxu1 %v2914_v26  ;;  %v31_v26 = vld [vmem:[%s4305_s0 + $0x88] sm:$0xff] }
  0x54   :  { %2028 = vmatpush1.bf16.msra.mxu0 %v2917_v27  ;;  %1817 = vmatprep.subr.bf16.mxu1 %v2922_v28  ;;  %v2436_v27 = vcombine.low %v3533_v44, %v3538_v45  ;;  %v2444_v28 = vcombine.low %v3551_v49, %v3556_v50  ;;  %v3722_v45 = vld [vmem:[%s4305_s0 + $0x50] sm:$0xff] }
  0x55   :  { %2029 = vmatprep.subr.bf16.mxu0 %v2925_v29  ;;  %v39_v29 = vld [vmem:[%s4305_s0 + $0xc8] sm:$0xff]  ;;  %v3009_v49 = vld [vmem:[%s4304_s1 + $0x634] ss:$8 sps:$4 sm:$0xff]  }
  0x57   :  { %1818 = vmatpush1.bf16.msra.mxu1 %v2920_v32  ;;  %v35_v32 = vld [vmem:[%s4305_s0 + $0xa8] sm:$0xff] }
  0x58   :  { %2030 = vmatpush1.bf16.msra.mxu0 %v2923_v34  ;;  %1819 = vmatprep.subr.bf16.mxu1 %v2928_v38  ;;  %v2453_v34 = vcombine.high %v31_v26, %v39_v29  ;;  %v2461_v35 = vcombine.high %v35_v32, %v43_v33  ;;  %v3000_v38 = vld [vmem:[%s4304_s1 + $0x224] ss:$8 sps:$4 sm:$0xff]   ;;  %v2460_v44 = vcombine.low %v35_v32, %v43_v33  ;;  %v3070_v32 = vld [vmem:[%s4304_s1 + $0x2e0] ss:$8 sps:$4 sm:$0xff]  }
  0x59   :  { %2031 = vmatprep.subr.bf16.mxu0 %v2931_v41  ;;  %v3001_v41 = vld [vmem:[%s4304_s1 + $0x620] ss:$8 sps:$4 sm:$0xff]  }
  0x5a   :  { %v3073_v33 = vld [vmem:[%s4304_s1 + $0x6e0] ss:$8 sps:$4 sm:$0xff]  }
  0x5b   :  { %1820 = vmatpush1.bf16.msra.mxu1 %v2926_v42  ;;  %v3717_v42 = vld [vmem:[%s4305_s0 + $0x10] sm:$0xff] }
  0x5c   :  { %2032 = vmatpush1.bf16.msra.mxu0 %v2929_v43  ;;  %1821 = vmatprep.subr.bf16.mxu1 %v2934_v46  ;;  %v2452_v43 = vcombine.low %v31_v26, %v39_v29  ;;  %v3727_v46 = vld [vmem:[%s4305_s0 + $0x30] sm:$0xff]  ;;  %v2439_v50 = vcombine.high %v3717_v42, %v3722_v45 }
  0x5d   :  { %2033 = vmatprep.subr.bf16.mxu0 %v2937_v47  ;;  %v3732_v47 = vld [vmem:[%s4305_s0 + $0x70] sm:$0xff] }
  0x5e   :  { %v3066_v26 = vld [vmem:[%s4304_s1 + $0x2d4] ss:$8 sps:$4 sm:$0xff]   ;;  %v3067_v29 = vld [vmem:[%s4304_s1 + $0x6d0] ss:$8 sps:$4 sm:$0xff]  }
  0x5f   :  { %1822 = vmatpush1.bf16.msra.mxu1 %v2932_v51  ;;  %v2447_v51 = vcombine.high %v3727_v46, %v3732_v47 }
  0x60   :  { %2034 = vmatpush1.bf16.msra.mxu0 %v2935_v52  ;;  %1823 = vmatprep.subr.bf16.mxu1 %v2940_v54  ;;  %v3004_v52 = vld [vmem:[%s4304_s1 + $0x230] ss:$8 sps:$4 sm:$0xff]   ;;  %v3012_v54 = vld [vmem:[%s4304_s1 + $0x244] ss:$8 sps:$4 sm:$0xff]  }
  0x61   :  { %2035 = vmatprep.subr.bf16.mxu0 %v2943_v55  ;;  %v3015_v55 = vld [vmem:[%s4304_s1 + $0x644] ss:$8 sps:$4 sm:$0xff]  }
  0x63   :  { %1824 = vmatpush1.bf16.msra.mxu1 %v2938_v56  ;;  %v3010_v56 = vld [vmem:[%s4304_s1 + $0x240] ss:$8 sps:$4 sm:$0xff]  }
  0x64   :  { %2036 = vmatpush1.bf16.msra.mxu0 %v2941_v57  ;;  %1825 = vmatprep.subr.bf16.mxu1 %v2946_v58  ;;  %v3013_v57 = vld [vmem:[%s4304_s1 + $0x640] ss:$8 sps:$4 sm:$0xff]   ;;  %v3018_v58 = vld [vmem:[%s4304_s1 + $0x254] ss:$8 sps:$4 sm:$0xff]  }
  0x65   :  { %2037 = vmatprep.subr.bf16.mxu0 %v2949_v59  ;;  %v3021_v59 = vld [vmem:[%s4304_s1 + $0x654] ss:$8 sps:$4 sm:$0xff]  }
  0x67   :  { %1826 = vmatpush1.bf16.msra.mxu1 %v2944_v60  ;;  %v3016_v60 = vld [vmem:[%s4304_s1 + $0x250] ss:$8 sps:$4 sm:$0xff]  }
  0x68   :  { %2038 = vmatpush1.bf16.msra.mxu0 %v2947_v61  ;;  %1827 = vmatprep.subr.bf16.mxu1 %v2952_v62  ;;  %v3019_v61 = vld [vmem:[%s4304_s1 + $0x650] ss:$8 sps:$4 sm:$0xff]   ;;  %v3024_v62 = vld [vmem:[%s4304_s1 + $0x264] ss:$8 sps:$4 sm:$0xff]  }
  0x69   :  { %2039 = vmatprep.subr.bf16.mxu0 %v2955_v63  ;;  %v3027_v63 = vld [vmem:[%s4304_s1 + $0x664] ss:$8 sps:$4 sm:$0xff]  }
  0x6b   :  { %1828 = vmatpush1.bf16.msra.mxu1 %v2950_v0  ;;  %v3022_v0 = vld [vmem:[%s4304_s1 + $0x260] ss:$8 sps:$4 sm:$0xff]  }
  0x6c   :  { %2040 = vmatpush1.bf16.msra.mxu0 %v2953_v1  ;;  %1829 = vmatprep.subr.bf16.mxu1 %v2958_v2  ;;  %v3025_v1 = vld [vmem:[%s4304_s1 + $0x660] ss:$8 sps:$4 sm:$0xff]   ;;  %v3030_v2 = vld [vmem:[%s4304_s1 + $0x274] ss:$8 sps:$4 sm:$0xff]  }
  0x6d   :  { %2041 = vmatprep.subr.bf16.mxu0 %v2961_v3  ;;  %v3033_v3 = vld [vmem:[%s4304_s1 + $0x674] ss:$8 sps:$4 sm:$0xff]  }
  0x6f   :  { %1830 = vmatpush1.bf16.msra.mxu1 %v2956_v4  ;;  %v3028_v4 = vld [vmem:[%s4304_s1 + $0x270] ss:$8 sps:$4 sm:$0xff]  }
  0x70   :  { %2042 = vmatpush1.bf16.msra.mxu0 %v2959_v5  ;;  %1831 = vmatprep.subr.bf16.mxu1 %v2964_v6  ;;  %v3031_v5 = vld [vmem:[%s4304_s1 + $0x670] ss:$8 sps:$4 sm:$0xff]   ;;  %v3036_v6 = vld [vmem:[%s4304_s1 + $0x284] ss:$8 sps:$4 sm:$0xff]  }
  0x71   :  { %2043 = vmatprep.subr.bf16.mxu0 %v2967_v7  ;;  %v3039_v7 = vld [vmem:[%s4304_s1 + $0x684] ss:$8 sps:$4 sm:$0xff]  }
  0x73   :  { %1832 = vmatpush1.bf16.msra.mxu1 %v2962_v8  ;;  %v3034_v8 = vld [vmem:[%s4304_s1 + $0x280] ss:$8 sps:$4 sm:$0xff]  }
  0x74   :  { %2044 = vmatpush1.bf16.msra.mxu0 %v2965_v9  ;;  %1833 = vmatprep.subr.bf16.mxu1 %v2970_v10  ;;  %v3037_v9 = vld [vmem:[%s4304_s1 + $0x680] ss:$8 sps:$4 sm:$0xff]   ;;  %v3042_v10 = vld [vmem:[%s4304_s1 + $0x294] ss:$8 sps:$4 sm:$0xff]  }
  0x75   :  { %2045 = vmatprep.subr.bf16.mxu0 %v2973_v11  ;;  %v3045_v11 = vld [vmem:[%s4304_s1 + $0x694] ss:$8 sps:$4 sm:$0xff]  }
  0x77   :  { %1834 = vmatpush1.bf16.msra.mxu1 %v2968_v12  ;;  %v3040_v12 = vld [vmem:[%s4304_s1 + $0x290] ss:$8 sps:$4 sm:$0xff]  }
  0x78   :  { %2046 = vmatpush1.bf16.msra.mxu0 %v2971_v13  ;;  %1835 = vmatprep.subr.bf16.mxu1 %v2976_v14  ;;  %v3043_v13 = vld [vmem:[%s4304_s1 + $0x690] ss:$8 sps:$4 sm:$0xff]   ;;  %v3048_v14 = vld [vmem:[%s4304_s1 + $0x2a4] ss:$8 sps:$4 sm:$0xff]  }
  0x79   :  { %2047 = vmatprep.subr.bf16.mxu0 %v2979_v15  ;;  %v3051_v15 = vld [vmem:[%s4304_s1 + $0x6a4] ss:$8 sps:$4 sm:$0xff]  }
  0x7b   :  { %1836 = vmatpush1.bf16.msra.mxu1 %v2974_v16  ;;  %v3046_v16 = vld [vmem:[%s4304_s1 + $0x2a0] ss:$8 sps:$4 sm:$0xff]  }
  0x7c   :  { %2048 = vmatpush1.bf16.msra.mxu0 %v2977_v17  ;;  %1837 = vmatprep.subr.bf16.mxu1 %v2982_v18  ;;  %v3049_v17 = vld [vmem:[%s4304_s1 + $0x6a0] ss:$8 sps:$4 sm:$0xff]   ;;  %v3054_v18 = vld [vmem:[%s4304_s1 + $0x2b4] ss:$8 sps:$4 sm:$0xff]  }
  0x7d   :  { %2049 = vmatprep.subr.bf16.mxu0 %v2985_v19  ;;  %v3057_v19 = vld [vmem:[%s4304_s1 + $0x6b4] ss:$8 sps:$4 sm:$0xff]  }
  0x7f   :  { %1838 = vmatpush1.bf16.msra.mxu1 %v2980_v20  ;;  %v3052_v20 = vld [vmem:[%s4304_s1 + $0x2b0] ss:$8 sps:$4 sm:$0xff]  }
  0x80   :  { %2050 = vmatpush1.bf16.msra.mxu0 %v2983_v21  ;;  %1860 = vmatprep.subr.bf16.mxu1 %v2988_v22  ;;  %v3055_v21 = vld [vmem:[%s4304_s1 + $0x6b0] ss:$8 sps:$4 sm:$0xff]   ;;  %v3060_v22 = vld [vmem:[%s4304_s1 + $0x2c4] ss:$8 sps:$4 sm:$0xff]  }
  0x81   :  { %2072 = vmatprep.subr.bf16.mxu0 %v2991_v23  ;;  %v3063_v23 = vld [vmem:[%s4304_s1 + $0x6c4] ss:$8 sps:$4 sm:$0xff]  }
  0x82   :  { %1840 = vmatmul.mubr.bf16.vlgmr.msra.gmra.mrb[0].mxu1 %v2436_v27  ;;  %v3069_v27 = vld [vmem:[%s4304_s1 + $0x6d4] ss:$8 sps:$4 sm:$0xff]  }
  0x83   :  { %2052 = vmatmul.mubr.bf16.vlgmr.msra.gmra.mrb[0].mxu0 %v2444_v28  ;;  %1861 = vmatpush1.bf16.msra.mxu1 %v2986_v24  ;;  %v3058_v24 = vld [vmem:[%s4304_s1 + $0x2c0] ss:$8 sps:$4 sm:$0xff]   ;;  %v3064_v28 = vld [vmem:[%s4304_s1 + $0x2d0] ss:$8 sps:$4 sm:$0xff]  }
  0x84   :  { %2073 = vmatpush1.bf16.msra.mxu0 %v2989_v25  ;;  %1862 = vmatprep.subr.bf16.mxu1 %v2994_v30  ;;  %v3061_v25 = vld [vmem:[%s4304_s1 + $0x6c0] ss:$8 sps:$4 sm:$0xff]   ;;  %v3072_v30 = vld [vmem:[%s4304_s1 + $0x2e4] ss:$8 sps:$4 sm:$0xff]  }
  0x85   :  { %2074 = vmatprep.subr.bf16.mxu0 %v2997_v31  ;;  %1849 = vmatprep.mubr.bf16.mxu1 %v2453_v34  ;;  %v3075_v31 = vld [vmem:[%s4304_s1 + $0x6e4] ss:$8 sps:$4 sm:$0xff]   ;;  %v3078_v34 = vld [vmem:[%s4304_s1 + $0x2f4] ss:$8 sps:$4 sm:$0xff]  }
  0x86   :  { %2061 = vmatprep.mubr.bf16.mxu0 %v2461_v35  ;;  %v3081_v35 = vld [vmem:[%s4304_s1 + $0x6f4] ss:$8 sps:$4 sm:$0xff]  }
  0x87   :  { %1863 = vmatpush1.bf16.msra.mxu1 %v2992_v36  ;;  %v3076_v36 = vld [vmem:[%s4304_s1 + $0x2f0] ss:$8 sps:$4 sm:$0xff]  }
  0x88   :  { %2075 = vmatpush1.bf16.msra.mxu0 %v2995_v37  ;;  %1864 = vmatprep.subr.bf16.mxu1 %v3000_v38  ;;  %v3079_v37 = vld [vmem:[%s4304_s1 + $0x6f0] ss:$8 sps:$4 sm:$0xff]   ;;  %v3084_v38 = vld [vmem:[%s4304_s1 + $0x304] ss:$8 sps:$4 sm:$0xff]  }
  0x89   :  { %2076 = vmatprep.subr.bf16.mxu0 %v3003_v39  ;;  %v3087_v39 = vld [vmem:[%s4304_s1 + $0x704] ss:$8 sps:$4 sm:$0xff]  }
  0x8a   :  { %1850 = vmatmul.mubr.bf16.gmra.mrb[4].mxu1 %v2452_v43  ;;  %v2446_v43 = vcombine.low %v3727_v46, %v3732_v47  ;;  %v3090_v46 = vld [vmem:[%s4304_s1 + $0x314] ss:$8 sps:$4 sm:$0xff]  }
  0x8b   :  { %2062 = vmatmul.mubr.bf16.gmra.mrb[4].mxu0 %v2460_v44  ;;  %1865 = vmatpush1.bf16.msra.mxu1 %v2998_v40  ;;  %v32_v40 = vld [vmem:[%s4305_s0 + $0x90] sm:$0xff] }
  0x8c   :  { %2077 = vmatpush1.bf16.msra.mxu0 %v3001_v41  ;;  %1866 = vmatprep.subr.bf16.mxu1 %v3006_v48  ;;  %v2438_v41 = vcombine.low %v3717_v42, %v3722_v45  ;;  %v40_v44 = vld [vmem:[%s4305_s0 + $0xd0] sm:$0xff]  ;;  %v3082_v42 = vld [vmem:[%s4304_s1 + $0x300] ss:$8 sps:$4 sm:$0xff]  }
  0x8d   :  { %2078 = vmatprep.subr.bf16.mxu0 %v3009_v49  ;;  %1892 = vmatprep.mubr.bf16.mxu1 %v2439_v50  ;;  %v36_v48 = vld [vmem:[%s4305_s0 + $0xb0] sm:$0xff]  ;;  %v3085_v45 = vld [vmem:[%s4304_s1 + $0x700] ss:$8 sps:$4 sm:$0xff]   ;;  %v2455_v50 = vcombine.high %v32_v40, %v40_v44 }
  0x8e   :  { %2104 = vmatprep.mubr.bf16.mxu0 %v2447_v51  ;;  %v44_v49 = vld [vmem:[%s4305_s0 + $0xf0] sm:$0xff] }
  0x8f   :  { %1867 = vmatpush1.bf16.msra.mxu1 %v3004_v52  ;;  %v3093_v47 = vld [vmem:[%s4304_s1 + $0x714] ss:$8 sps:$4 sm:$0xff]   ;;  %v2463_v51 = vcombine.high %v36_v48, %v44_v49  ;;  %v3088_v52 = vld [vmem:[%s4304_s1 + $0x310] ss:$8 sps:$4 sm:$0xff]  }
  0x90   :  { %2079 = vmatpush1.bf16.msra.mxu0 %v3007_v53  ;;  %1868 = vmatprep.subr.bf16.mxu1 %v3012_v54  ;;  %v3091_v53 = vld [vmem:[%s4304_s1 + $0x710] ss:$8 sps:$4 sm:$0xff]   ;;  %v3096_v54 = vld [vmem:[%s4304_s1 + $0x324] ss:$8 sps:$4 sm:$0xff]  }
  0x91   :  { %2080 = vmatprep.subr.bf16.mxu0 %v3015_v55  ;;  %v3099_v55 = vld [vmem:[%s4304_s1 + $0x724] ss:$8 sps:$4 sm:$0xff]  }
  0x93   :  { %1869 = vmatpush1.bf16.msra.mxu1 %v3010_v56  ;;  %v3943_v56 = vld [vmem:[%s4305_s0 + $0x18] sm:$0xff] }
  0x94   :  { %2081 = vmatpush1.bf16.msra.mxu0 %v3013_v57  ;;  %1870 = vmatprep.subr.bf16.mxu1 %v3018_v58  ;;  %v2454_v57 = vcombine.low %v32_v40, %v40_v44  ;;  %v2462_v58 = vcombine.low %v36_v48, %v44_v49  ;;  %v3154_v40 = vld [vmem:[%s4304_s1 + $0x3c0] ss:$8 sps:$4 sm:$0xff]   ;;  %v3165_v44 = vld [vmem:[%s4304_s1 + $0x7d4] ss:$8 sps:$4 sm:$0xff]   ;;  %v3160_v48 = vld [vmem:[%s4304_s1 + $0x3d0] ss:$8 sps:$4 sm:$0xff]  }
  0x95   :  { %2082 = vmatprep.subr.bf16.mxu0 %v3021_v59  ;;  %v3948_v59 = vld [vmem:[%s4305_s0 + $0x58] sm:$0xff] }
  0x96   :  { %v3163_v49 = vld [vmem:[%s4304_s1 + $0x7d0] ss:$8 sps:$4 sm:$0xff]  }
  0x97   :  { %1871 = vmatpush1.bf16.msra.mxu1 %v3016_v60  ;;  %v3953_v60 = vld [vmem:[%s4305_s0 + $0x38] sm:$0xff] }
  0x98   :  { %2083 = vmatpush1.bf16.msra.mxu0 %v3019_v61  ;;  %1872 = vmatprep.subr.bf16.mxu1 %v3024_v62  ;;  %v3958_v61 = vld [vmem:[%s4305_s0 + $0x78] sm:$0xff]  ;;  %v3094_v62 = vld [vmem:[%s4304_s1 + $0x320] ss:$8 sps:$4 sm:$0xff]  }
  0x99   :  { %2084 = vmatprep.subr.bf16.mxu0 %v3027_v63  ;;  %v3097_v63 = vld [vmem:[%s4304_s1 + $0x720] ss:$8 sps:$4 sm:$0xff]  }
  0x9b   :  { %1873 = vmatpush1.bf16.msra.mxu1 %v3022_v0  ;;  %v3102_v0 = vld [vmem:[%s4304_s1 + $0x334] ss:$8 sps:$4 sm:$0xff]  }
  0x9c   :  { %2085 = vmatpush1.bf16.msra.mxu0 %v3025_v1  ;;  %1874 = vmatprep.subr.bf16.mxu1 %v3030_v2  ;;  %v3105_v1 = vld [vmem:[%s4304_s1 + $0x734] ss:$8 sps:$4 sm:$0xff]   ;;  %v2441_v2 = vcombine.high %v3943_v56, %v3948_v59 }
  0x9d   :  { %2086 = vmatprep.subr.bf16.mxu0 %v3033_v3  ;;  %v2449_v3 = vcombine.high %v3953_v60, %v3958_v61 }
  0x9f   :  { %1875 = vmatpush1.bf16.msra.mxu1 %v3028_v4  ;;  %v3100_v4 = vld [vmem:[%s4304_s1 + $0x330] ss:$8 sps:$4 sm:$0xff]  }
  0xa0   :  { %2087 = vmatpush1.bf16.msra.mxu0 %v3031_v5  ;;  %1876 = vmatprep.subr.bf16.mxu1 %v3036_v6  ;;  %v3103_v5 = vld [vmem:[%s4304_s1 + $0x730] ss:$8 sps:$4 sm:$0xff]   ;;  %v3108_v6 = vld [vmem:[%s4304_s1 + $0x344] ss:$8 sps:$4 sm:$0xff]  }
  0xa1   :  { %2088 = vmatprep.subr.bf16.mxu0 %v3039_v7  ;;  %v3111_v7 = vld [vmem:[%s4304_s1 + $0x744] ss:$8 sps:$4 sm:$0xff]  }
  0xa3   :  { %1877 = vmatpush1.bf16.msra.mxu1 %v3034_v8  ;;  %v3106_v8 = vld [vmem:[%s4304_s1 + $0x340] ss:$8 sps:$4 sm:$0xff]  }
  0xa4   :  { %2089 = vmatpush1.bf16.msra.mxu0 %v3037_v9  ;;  %1878 = vmatprep.subr.bf16.mxu1 %v3042_v10  ;;  %v3109_v9 = vld [vmem:[%s4304_s1 + $0x740] ss:$8 sps:$4 sm:$0xff]   ;;  %v3114_v10 = vld [vmem:[%s4304_s1 + $0x354] ss:$8 sps:$4 sm:$0xff]  }
  0xa5   :  { %2090 = vmatprep.subr.bf16.mxu0 %v3045_v11  ;;  %v3117_v11 = vld [vmem:[%s4304_s1 + $0x754] ss:$8 sps:$4 sm:$0xff]  }
  0xa7   :  { %1879 = vmatpush1.bf16.msra.mxu1 %v3040_v12  ;;  %v3112_v12 = vld [vmem:[%s4304_s1 + $0x350] ss:$8 sps:$4 sm:$0xff]  }
  0xa8   :  { %2091 = vmatpush1.bf16.msra.mxu0 %v3043_v13  ;;  %1880 = vmatprep.subr.bf16.mxu1 %v3048_v14  ;;  %v3115_v13 = vld [vmem:[%s4304_s1 + $0x750] ss:$8 sps:$4 sm:$0xff]   ;;  %v3120_v14 = vld [vmem:[%s4304_s1 + $0x364] ss:$8 sps:$4 sm:$0xff]  }
  0xa9   :  { %2092 = vmatprep.subr.bf16.mxu0 %v3051_v15  ;;  %v3123_v15 = vld [vmem:[%s4304_s1 + $0x764] ss:$8 sps:$4 sm:$0xff]  }
  0xab   :  { %1881 = vmatpush1.bf16.msra.mxu1 %v3046_v16  ;;  %v3118_v16 = vld [vmem:[%s4304_s1 + $0x360] ss:$8 sps:$4 sm:$0xff]  }
  0xac   :  { %2093 = vmatpush1.bf16.msra.mxu0 %v3049_v17  ;;  %1882 = vmatprep.subr.bf16.mxu1 %v3054_v18  ;;  %v3121_v17 = vld [vmem:[%s4304_s1 + $0x760] ss:$8 sps:$4 sm:$0xff]   ;;  %v3126_v18 = vld [vmem:[%s4304_s1 + $0x374] ss:$8 sps:$4 sm:$0xff]  }
  0xad   :  { %2094 = vmatprep.subr.bf16.mxu0 %v3057_v19  ;;  %v3129_v19 = vld [vmem:[%s4304_s1 + $0x774] ss:$8 sps:$4 sm:$0xff]  }
  0xaf   :  { %1883 = vmatpush1.bf16.msra.mxu1 %v3052_v20  ;;  %v3124_v20 = vld [vmem:[%s4304_s1 + $0x370] ss:$8 sps:$4 sm:$0xff]  }
  0xb0   :  { %2095 = vmatpush1.bf16.msra.mxu0 %v3055_v21  ;;  %1884 = vmatprep.subr.bf16.mxu1 %v3060_v22  ;;  %v3127_v21 = vld [vmem:[%s4304_s1 + $0x770] ss:$8 sps:$4 sm:$0xff]   ;;  %v3132_v22 = vld [vmem:[%s4304_s1 + $0x384] ss:$8 sps:$4 sm:$0xff]  }
  0xb1   :  { %2096 = vmatprep.subr.bf16.mxu0 %v3063_v23  ;;  %v3135_v23 = vld [vmem:[%s4304_s1 + $0x784] ss:$8 sps:$4 sm:$0xff]  }
  0xb3   :  { %1885 = vmatpush1.bf16.msra.mxu1 %v3058_v24  ;;  %v3130_v24 = vld [vmem:[%s4304_s1 + $0x380] ss:$8 sps:$4 sm:$0xff]  }
  0xb4   :  { %2097 = vmatpush1.bf16.msra.mxu0 %v3061_v25  ;;  %1886 = vmatprep.subr.bf16.mxu1 %v3066_v26  ;;  %v3133_v25 = vld [vmem:[%s4304_s1 + $0x780] ss:$8 sps:$4 sm:$0xff]   ;;  %v3138_v26 = vld [vmem:[%s4304_s1 + $0x394] ss:$8 sps:$4 sm:$0xff]  }
  0xb5   :  { %2098 = vmatprep.subr.bf16.mxu0 %v3069_v27  ;;  %v3141_v27 = vld [vmem:[%s4304_s1 + $0x794] ss:$8 sps:$4 sm:$0xff]  }
  0xb7   :  { %1887 = vmatpush1.bf16.msra.mxu1 %v3064_v28  ;;  %v3136_v28 = vld [vmem:[%s4304_s1 + $0x390] ss:$8 sps:$4 sm:$0xff]  }
  0xb8   :  { %2099 = vmatpush1.bf16.msra.mxu0 %v3067_v29  ;;  %1888 = vmatprep.subr.bf16.mxu1 %v3072_v30  ;;  %v3139_v29 = vld [vmem:[%s4304_s1 + $0x790] ss:$8 sps:$4 sm:$0xff]   ;;  %v3144_v30 = vld [vmem:[%s4304_s1 + $0x3a4] ss:$8 sps:$4 sm:$0xff]  }
  0xb9   :  { %2100 = vmatprep.subr.bf16.mxu0 %v3075_v31  ;;  %v3147_v31 = vld [vmem:[%s4304_s1 + $0x7a4] ss:$8 sps:$4 sm:$0xff]  }
  0xbb   :  { %1889 = vmatpush1.bf16.msra.mxu1 %v3070_v32  ;;  %v3142_v32 = vld [vmem:[%s4304_s1 + $0x3a0] ss:$8 sps:$4 sm:$0xff]  }
  0xbc   :  { %2101 = vmatpush1.bf16.msra.mxu0 %v3073_v33  ;;  %1890 = vmatprep.subr.bf16.mxu1 %v3078_v34  ;;  %v3145_v33 = vld [vmem:[%s4304_s1 + $0x7a0] ss:$8 sps:$4 sm:$0xff]   ;;  %v3150_v34 = vld [vmem:[%s4304_s1 + $0x3b4] ss:$8 sps:$4 sm:$0xff]  }
  0xbd   :  { %2102 = vmatprep.subr.bf16.mxu0 %v3081_v35  ;;  %v3153_v35 = vld [vmem:[%s4304_s1 + $0x7b4] ss:$8 sps:$4 sm:$0xff]  }
  0xbf   :  { %1891 = vmatpush1.bf16.msra.mxu1 %v3076_v36  ;;  %v3148_v36 = vld [vmem:[%s4304_s1 + $0x3b0] ss:$8 sps:$4 sm:$0xff]  }
  0xc0   :  { %2103 = vmatpush1.bf16.msra.mxu0 %v3079_v37  ;;  %1913 = vmatprep.subr.bf16.mxu1 %v3084_v38  ;;  %v3151_v37 = vld [vmem:[%s4304_s1 + $0x7b0] ss:$8 sps:$4 sm:$0xff]   ;;  %v3156_v38 = vld [vmem:[%s4304_s1 + $0x3c4] ss:$8 sps:$4 sm:$0xff]  }
  0xc1   :  { %2125 = vmatprep.subr.bf16.mxu0 %v3087_v39  ;;  %v3159_v39 = vld [vmem:[%s4304_s1 + $0x7c4] ss:$8 sps:$4 sm:$0xff]  }
  0xc2   :  { %1893 = vmatmul.mubr.bf16.vlgmr.msra.gmra.mrb[0].mxu1 %v2438_v41  ;;  %v3157_v41 = vld [vmem:[%s4304_s1 + $0x7c0] ss:$8 sps:$4 sm:$0xff]  }
  0xc3   :  { %2105 = vmatmul.mubr.bf16.vlgmr.msra.gmra.mrb[0].mxu0 %v2446_v43  ;;  %1914 = vmatpush1.bf16.msra.mxu1 %v3082_v42  ;;  %v3162_v43 = vld [vmem:[%s4304_s1 + $0x3d4] ss:$8 sps:$4 sm:$0xff]   ;;  %v3168_v42 = vld [vmem:[%s4304_s1 + $0x3e4] ss:$8 sps:$4 sm:$0xff]  }
  0xc4   :  { %2126 = vmatpush1.bf16.msra.mxu0 %v3085_v45  ;;  %1915 = vmatprep.subr.bf16.mxu1 %v3090_v46  ;;  %v3171_v45 = vld [vmem:[%s4304_s1 + $0x7e4] ss:$8 sps:$4 sm:$0xff]   ;;  %v3166_v46 = vld [vmem:[%s4304_s1 + $0x3e0] ss:$8 sps:$4 sm:$0xff]  }
  0xc5   :  { %2127 = vmatprep.subr.bf16.mxu0 %v3093_v47  ;;  %1902 = vmatprep.mubr.bf16.mxu1 %v2455_v50  ;;  %v3169_v47 = vld [vmem:[%s4304_s1 + $0x7e0] ss:$8 sps:$4 sm:$0xff]   ;;  %v3174_v50 = vld [vmem:[%s4304_s1 + $0x3f4] ss:$8 sps:$4 sm:$0xff]  }
  0xc6   :  { %2114 = vmatprep.mubr.bf16.mxu0 %v2463_v51  ;;  %v3177_v51 = vld [vmem:[%s4304_s1 + $0x7f4] ss:$8 sps:$4 sm:$0xff]  }
  0xc7   :  { %1916 = vmatpush1.bf16.msra.mxu1 %v3088_v52  ;;  %v3172_v52 = vld [vmem:[%s4304_s1 + $0x3f0] ss:$8 sps:$4 sm:$0xff]  }
  0xc8   :  { %2128 = vmatpush1.bf16.msra.mxu0 %v3091_v53  ;;  %1917 = vmatprep.subr.bf16.mxu1 %v3096_v54  ;;  %v3175_v53 = vld [vmem:[%s4304_s1 + $0x7f0] ss:$8 sps:$4 sm:$0xff]  }
  0xc9   :  { %2129 = vmatprep.subr.bf16.mxu0 %v3099_v55  ;;  %v33_v54 = vld [vmem:[%s4305_s0 + $0x98] sm:$0xff] }
  0xca   :  { %1903 = vmatmul.mubr.bf16.gmra.mrb[4].mxu1 %v2454_v57  ;;  %v41_v55 = vld [vmem:[%s4305_s0 + $0xd8] sm:$0xff] }
  0xcb   :  { %2115 = vmatmul.mubr.bf16.gmra.mrb[4].mxu0 %v2462_v58  ;;  %1918 = vmatpush1.bf16.msra.mxu1 %v3094_v62  ;;  %v37_v57 = vld [vmem:[%s4305_s0 + $0xb8] sm:$0xff]  ;;  %v2440_v62 = vcombine.low %v3943_v56, %v3948_v59  ;;  %v302_v56 = vld [vmem:[%s4306_s2] sm:$0x3] }
  0xcc   :  { %2130 = vmatpush1.bf16.msra.mxu0 %v3097_v63  ;;  %1919 = vmatprep.subr.bf16.mxu1 %v3102_v0  ;;  %v45_v58 = vld [vmem:[%s4305_s0 + $0xf8] sm:$0xff]  ;;  %v2448_v63 = vcombine.low %v3953_v60, %v3958_v61  ;;  %v2457_v0 = vcombine.high %v33_v54, %v41_v55 }
  0xcd   :  { %2131 = vmatprep.subr.bf16.mxu0 %v3105_v1  ;;  %1945 = vmatprep.mubr.bf16.mxu1 %v2441_v2  ;;  %v2465_v1 = vcombine.high %v37_v57, %v45_v58  ;;  %v2456_v2 = vcombine.low %v33_v54, %v41_v55 }
  0xce   :  { %2157 = vmatprep.mubr.bf16.mxu0 %v2449_v3  ;;  %v2464_v3 = vcombine.low %v37_v57, %v45_v58 }
  0xcf   :  { %1920 = vmatpush1.bf16.msra.mxu1 %v3100_v4  ;;  %v304_v4 = vlaneseq }
  0xd0   :  { %2132 = vmatpush1.bf16.msra.mxu0 %v3103_v5  ;;  %1921 = vmatprep.subr.bf16.mxu1 %v3108_v6 }
  0xd1   :  { %2133 = vmatprep.subr.bf16.mxu0 %v3111_v7  ;;  %v305_v5 = vshrl.u32 %v304_v4, 7 }
  0xd3   :  { %1922 = vmatpush1.bf16.msra.mxu1 %v3106_v8  ;;  %v306_v6 = vsub.s32 0, %v305_v5  ;;  %v310_v59 = vsub.s32 1, %v305_v5 }
  0xd4   :  { %2134 = vmatpush1.bf16.msra.mxu0 %v3109_v9  ;;  %1923 = vmatprep.subr.bf16.mxu1 %v3114_v10 }
  0xd5   :  { %2135 = vmatprep.subr.bf16.mxu0 %v3117_v11  ;;  %v307_v60 = vrot.slane %v302_v56, %v306_v6  ;;  %v311_v61 = vrot.slane %v302_v56, %v310_v59 }
  0xd7   :  { %1924 = vmatpush1.bf16.msra.mxu1 %v3112_v12 }
  0xd8   :  { %2136 = vmatpush1.bf16.msra.mxu0 %v3115_v13  ;;  %1925 = vmatprep.subr.bf16.mxu1 %v3120_v14 }
  0xd9   :  { %2137 = vmatprep.subr.bf16.mxu0 %v3123_v15 }
  0xdb   :  { %1926 = vmatpush1.bf16.msra.mxu1 %v3118_v16 }
  0xdc   :  { %2138 = vmatpush1.bf16.msra.mxu0 %v3121_v17  ;;  %1927 = vmatprep.subr.bf16.mxu1 %v3126_v18 }
  0xdd   :  { %2139 = vmatprep.subr.bf16.mxu0 %v3129_v19 }
  0xdf   :  { %1928 = vmatpush1.bf16.msra.mxu1 %v3124_v20 }
  0xe0   :  { %2140 = vmatpush1.bf16.msra.mxu0 %v3127_v21  ;;  %1929 = vmatprep.subr.bf16.mxu1 %v3132_v22 }
  0xe1   :  { %2141 = vmatprep.subr.bf16.mxu0 %v3135_v23 }
  0xe3   :  { %1930 = vmatpush1.bf16.msra.mxu1 %v3130_v24 }
  0xe4   :  { %2142 = vmatpush1.bf16.msra.mxu0 %v3133_v25  ;;  %1931 = vmatprep.subr.bf16.mxu1 %v3138_v26 }
  0xe5   :  { %2143 = vmatprep.subr.bf16.mxu0 %v3141_v27 }
  0xe7   :  { %1932 = vmatpush1.bf16.msra.mxu1 %v3136_v28 }
  0xe8   :  { %2144 = vmatpush1.bf16.msra.mxu0 %v3139_v29  ;;  %1933 = vmatprep.subr.bf16.mxu1 %v3144_v30 }
  0xe9   :  { %2145 = vmatprep.subr.bf16.mxu0 %v3147_v31 }
  0xeb   :  { %1934 = vmatpush1.bf16.msra.mxu1 %v3142_v32 }
  0xec   :  { %2146 = vmatpush1.bf16.msra.mxu0 %v3145_v33  ;;  %1935 = vmatprep.subr.bf16.mxu1 %v3150_v34 }
  0xed   :  { %2147 = vmatprep.subr.bf16.mxu0 %v3153_v35 }
  0xef   :  { %1936 = vmatpush1.bf16.msra.mxu1 %v3148_v36 }
  0xf0   :  { %2148 = vmatpush1.bf16.msra.mxu0 %v3151_v37  ;;  %1937 = vmatprep.subr.bf16.mxu1 %v3156_v38 }
  0xf1   :  { %2149 = vmatprep.subr.bf16.mxu0 %v3159_v39 }
  0xf3   :  { %1938 = vmatpush1.bf16.msra.mxu1 %v3154_v40 }
  0xf4   :  { %2150 = vmatpush1.bf16.msra.mxu0 %v3157_v41  ;;  %1939 = vmatprep.subr.bf16.mxu1 %v3162_v43 }
  0xf5   :  { %2151 = vmatprep.subr.bf16.mxu0 %v3165_v44 }
  0xf7   :  { %1940 = vmatpush1.bf16.msra.mxu1 %v3160_v48 }
  0xf8   :  { %2152 = vmatpush1.bf16.msra.mxu0 %v3163_v49  ;;  %1941 = vmatprep.subr.bf16.mxu1 %v3168_v42 }
  0xf9   :  { %2153 = vmatprep.subr.bf16.mxu0 %v3171_v45 }
  0xfb   :  { %1942 = vmatpush1.bf16.msra.mxu1 %v3166_v46 }
  0xfc   :  { %2154 = vmatpush1.bf16.msra.mxu0 %v3169_v47  ;;  %1943 = vmatprep.subr.bf16.mxu1 %v3174_v50 }
  0xfd   :  { %2155 = vmatprep.subr.bf16.mxu0 %v3177_v51 }
  0xff   :  { %1944 = vmatpush1.bf16.msra.mxu1 %v3172_v52 }
 0x100   :  { %2156 = vmatpush1.bf16.msra.mxu0 %v3175_v53 }
 0x102   :  { %1946 = vmatmul.mubr.bf16.vlgmr.msra.gmra.mrb[0].mxu1 %v2440_v62 }
 0x103   :  { %2158 = vmatmul.mubr.bf16.vlgmr.msra.gmra.mrb[0].mxu0 %v2448_v63  ;;  %1955 = vmatprep.mubr.bf16.mxu1 %v2457_v0 }
 0x104   :  { %2167 = vmatprep.mubr.bf16.mxu0 %v2465_v1 }
 0x10a   :  { %1956 = vmatmul.mubr.bf16.gmra.mrb[4].mxu1 %v2456_v2 }
 0x10b   :  { %2168 = vmatmul.mubr.bf16.gmra.mrb[4].mxu0 %v2464_v3 }
 0x1d5   :  { %v1947_v7 = vpop.f32.mrb[0].mxu1 }
 0x1d6   :  { %v2159_v8 = vpop.f32.mrb[0].mxu0  ;;  %v2730_v9 = vadd.f32 %v1947_v7, %v307_v60  ;;  %v1949_v10 = vpop.f32.mrb[1].mxu1 }
 0x1d7   :  { %v2161_v11 = vpop.f32.mrb[1].mxu0  ;;  %v2732_v12 = vadd.f32 %v1949_v10, %v311_v61  ;;  %v1951_v13 = vpop.f32.mrb[2].mxu1 }
 0x1d8   :  { %v2163_v14 = vpop.f32.mrb[2].mxu0  ;;  %v2731_v15 = vadd.f32 %v2730_v9, %v2159_v8  ;;  %v2734_v16 = vadd.f32 %v1951_v13, %v307_v60  ;;  %v1953_v17 = vpop.f32.mrb[3].mxu1 }
 0x1d9   :  { %v2165_v18 = vpop.f32.mrb[3].mxu0  ;;  %v2733_v19 = vadd.f32 %v2732_v12, %v2161_v11  ;;  %v2736_v20 = vadd.f32 %v1953_v17, %v311_v61 }
 0x1da   :  { %v4145_v21 = vmul.f32 0.70710677, %v2731_v15  ;;  %v4147_v22 = vadd.f32 %v2734_v16, %v2163_v14  ;;  %v4187_v4 = vmul.f32 0.5, %v2731_v15 }
 0x1db   :  { %v4149_v23 = vmul.f32 0.70710677, %v2733_v19  ;;  %v4151_v24 = vadd.f32 %v2736_v20, %v2165_v18 }
 0x1dc   :  { %v2194_v25 = vand.u32 2147483647, %v4145_v21  ;;  %v4155_v26 = vmul.f32 0.70710677, %v4147_v22  ;;  %vm2354_vm0 = vcmp.ge.f32.partialorder %v4145_v21, 0.0 }
 0x1dd   :  { %v2195_v27 = vand.u32 2147483647, %v4149_v23  ;;  %v4159_v28 = vmul.f32 0.70710677, %v4151_v24  ;;  %v1957_v35 = vpop.f32.mrb[4].mxu1  ;;  %vm2355_vm1 = vcmp.ge.f32.partialorder %v4149_v23, 0.0 }
 0x1de   :  { %v2202_v29 = vmul.f32 0.3275911, %v2194_v25  ;;  %v2196_v30 = vand.u32 2147483647, %v4155_v26  ;;  %v2169_v36 = vpop.f32.mrb[4].mxu0  ;;  %v1959_v39 = vpop.f32.mrb[5].mxu1  ;;  %v2738_v46 = vadd.f32 %v1957_v35, %v307_v60 }
 0x1df   :  { %v2203_v31 = vmul.f32 0.3275911, %v2195_v27  ;;  %v4163_v32 = vand.u32 2147483647, %v4159_v28  ;;  %v2171_v40 = vpop.f32.mrb[5].mxu0  ;;  %v1961_v43 = vpop.f32.mrb[6].mxu1  ;;  %v2740_v47 = vadd.f32 %v1959_v39, %v311_v61 }
 0x1e0   :  { %v2210_v33 = vadd.f32 1.0, %v2202_v29  ;;  %v2204_v34 = vmul.f32 0.3275911, %v2196_v30  ;;  %v2173_v44 = vpop.f32.mrb[6].mxu0  ;;  %v1963_v48 = vpop.f32.mrb[7].mxu1  ;;  %v2306_v42 = vsub.f32 0.0, %v2194_v25  ;;  %v2742_v50 = vadd.f32 %v1961_v43, %v307_v60 }
 0x1e1   :  { %v2211_v37 = vadd.f32 1.0, %v2203_v31  ;;  %v2205_v38 = vmul.f32 0.3275911, %v4163_v32  ;;  %v2175_v49 = vpop.f32.mrb[7].mxu0  ;;  %v2744_v51 = vadd.f32 %v1963_v48, %v311_v61  ;;  %v4166_v52 = vadd.f32 %v2738_v46, %v2169_v36 }
 0x1e2   :  { %3178 = vrcp.f32 %v2210_v33  ;;  %v2212_v41 = vadd.f32 1.0, %v2204_v34  ;;  %v4168_v53 = vadd.f32 %v2740_v47, %v2171_v40  ;;  %v2307_v54 = vsub.f32 0.0, %v2195_v27 }
 0x1e3   :  { %3180 = vrcp.f32 %v2211_v37  ;;  %v2213_v45 = vadd.f32 1.0, %v2205_v38  ;;  %v4170_v55 = vadd.f32 %v2742_v50, %v2173_v44  ;;  %v4172_v57 = vadd.f32 %v2744_v51, %v2175_v49 }
 0x1e4   :  { %3182 = vrcp.f32 %v2212_v41  ;;  %v2314_v58 = vmul.f32 %v2306_v42, %v2194_v25  ;;  %v4175_v62 = vmul.f32 0.70710677, %v4166_v52  ;;  %v4178_v63 = vmul.f32 0.70710677, %v4168_v53 }
 0x1e5   :  { %3184 = vrcp.f32 %v2213_v45  ;;  %v4181_v0 = vmul.f32 0.70710677, %v4170_v55  ;;  %v2308_v1 = vsub.f32 0.0, %v2196_v30  ;;  %v4185_v3 = vmul.f32 0.70710677, %v4172_v57 }
 0x1e6   :  { %v2198_v2 = vand.u32 2147483647, %v4175_v62  ;;  %v2315_v5 = vmul.f32 %v2307_v54, %v2195_v27  ;;  %v2199_v6 = vand.u32 2147483647, %v4178_v63  ;;  %v2322_v60 = vmul.f32 1.442695, %v2314_v58 }
 0x1e7   :  { %v4191_v56 = vand.u32 2147483647, %v4181_v0  ;;  %v4195_v61 = vmul.f32 0.5, %v2733_v19  ;;  %v2309_v7 = vsub.f32 0.0, %v4163_v32  ;;  %v4202_v12 = vand.u32 2147483647, %v4185_v3 }
 0x1e8   :  { %v2206_v8 = vmul.f32 0.3275911, %v2198_v2  ;;  %v2207_v11 = vmul.f32 0.3275911, %v2199_v6  ;;  %v2316_v14 = vmul.f32 %v2308_v1, %v2196_v30  ;;  %v2324_v18 = vmul.f32 1.442695, %v2315_v5 }
 0x1e9   :  { %v2208_v16 = vmul.f32 0.3275911, %v4191_v56  ;;  %v4207_v19 = vmul.f32 0.5, %v4147_v22  ;;  %v2310_v29 = vsub.f32 0.0, %v2198_v2  ;;  %v2317_v30 = vmul.f32 %v2309_v7, %v4163_v32 }
 0x1ea   :  { %v2214_v15 = vadd.f32 1.0, %v2206_v8  ;;  %v2215_v20 = vadd.f32 1.0, %v2207_v11  ;;  %v2326_v22 = vmul.f32 1.442695, %v2316_v14  ;;  %v2311_v37 = vsub.f32 0.0, %v2199_v6 }
 0x1eb   :  { %v2216_v31 = vadd.f32 1.0, %v2208_v16  ;;  %v2209_v38 = vmul.f32 0.3275911, %v4202_v12  ;;  %v2318_v44 = vmul.f32 %v2310_v29, %v2198_v2  ;;  %v2328_v46 = vmul.f32 1.442695, %v2317_v30 }
 0x1ec   :  { %v4193_v59 = vpop.eup %3178  ;;  %3186 = vrcp.f32 %v2214_v15  ;;  %v2319_v47 = vmul.f32 %v2311_v37, %v2199_v6  ;;  %v2312_v50 = vsub.f32 0.0, %v4191_v56  ;;  %v2313_v5 = vsub.f32 0.0, %v4202_v12 }
 0x1ed   :  { %v4198_v9 = vpop.eup %3180  ;;  %v2234_v10 = vmul.f32 1.0614054, %v4193_v59  ;;  %3188 = vrcp.f32 %v2215_v20  ;;  %v2217_v48 = vadd.f32 1.0, %v2209_v38  ;;  %v2330_v2 = vmul.f32 1.442695, %v2318_v44 }
 0x1ee   :  { %v2235_v13 = vmul.f32 1.0614054, %v4198_v9  ;;  %v4209_v25 = vpop.eup %3182  ;;  %3190 = vpow2.f32 %v2322_v60  ;;  %v4228_v8 = vmul.f32 0.5, %v4151_v24  ;;  %v2320_v14 = vmul.f32 %v2312_v50, %v4191_v56 }
 0x1ef   :  { %v2242_v17 = vadd.f32 -1.4531521, %v2234_v10  ;;  %v2236_v34 = vmul.f32 1.0614054, %v4209_v25  ;;  %v4214_v35 = vpop.eup %3184  ;;  %3192 = vrcp.f32 %v2216_v31  ;;  %v2321_v29 = vmul.f32 %v2313_v5, %v4202_v12 }
 0x1f0   :  { %v2243_v27 = vadd.f32 -1.4531521, %v2235_v13  ;;  %v2237_v41 = vmul.f32 1.0614054, %v4214_v35  ;;  %3194 = vpow2.f32 %v2324_v18  ;;  %v2332_v13 = vmul.f32 1.442695, %v2319_v47 }
 0x1f1   :  { %v2250_v33 = vmul.f32 %v4193_v59, %v2242_v17  ;;  %v2244_v40 = vadd.f32 -1.4531521, %v2236_v34  ;;  %3196 = vrcp.f32 %v2217_v48  ;;  %v2334_v38 = vmul.f32 1.442695, %v2320_v14 }
 0x1f2   :  { %v2251_v36 = vmul.f32 %v4198_v9, %v2243_v27  ;;  %v2245_v42 = vadd.f32 -1.4531521, %v2237_v41  ;;  %3198 = vpow2.f32 %v2326_v22  ;;  %vm2356_vm2 = vcmp.ge.f32.partialorder %v4155_v26, 0.0 }
 0x1f3   :  { %v2258_v39 = vadd.f32 1.4214138, %v2250_v33  ;;  %v2252_v49 = vmul.f32 %v4209_v25, %v2244_v40  ;;  %3200 = vpow2.f32 %v2328_v46  ;;  %vm2357_vm3 = vcmp.ge.f32.partialorder %v4159_v28, 0.0 }
 0x1f4   :  { %v2259_v43 = vadd.f32 1.4214138, %v2251_v36  ;;  %v2253_v58 = vmul.f32 %v4214_v35, %v2245_v42  ;;  %3202 = vpow2.f32 %v2330_v2  ;;  %vm2358_vm4 = vcmp.ge.f32.partialorder %v4175_v62, 0.0 }
 0x1f5   :  { %v2266_v32 = vmul.f32 %v4193_v59, %v2258_v39  ;;  %v2260_v54 = vadd.f32 1.4214138, %v2252_v49  ;;  %3204 = vpow2.f32 %v2332_v13  ;;  %vm2359_vm5 = vcmp.ge.f32.partialorder %v4178_v63, 0.0 }
 0x1f6   :  { %v2267_v45 = vmul.f32 %v4198_v9, %v2259_v43  ;;  %v2261_v6 = vadd.f32 1.4214138, %v2253_v58  ;;  %v4230_v10 = vpop.eup %3186  ;;  %3206 = vpow2.f32 %v2334_v38  ;;  %vm2360_vm6 = vcmp.ge.f32.partialorder %v4181_v0, 0.0 }
 0x1f7   :  { %v2274_v51 = vadd.f32 -0.28449672, %v2266_v32  ;;  %v2268_v7 = vmul.f32 %v4209_v25, %v2260_v54  ;;  %v4234_v15 = vpop.eup %3188  ;;  %v2238_v20 = vmul.f32 1.0614054, %v4230_v10  ;;  %v2336_v32 = vmul.f32 1.442695, %v2321_v29 }
 0x1f8   :  { %v2275_v1 = vadd.f32 -0.28449672, %v2267_v45  ;;  %v2269_v18 = vmul.f32 %v4214_v35, %v2261_v6  ;;  %v2239_v27 = vmul.f32 1.0614054, %v4234_v15  ;;  %v3191_v31 = vpop.eup %3190  ;;  %vm2361_vm7 = vcmp.ge.f32.partialorder %v4185_v3, 0.0 }
 0x1f9   :  { %v2282_v60 = vmul.f32 %v4193_v59, %v2274_v51  ;;  %v2276_v17 = vadd.f32 -0.28449672, %v2268_v7  ;;  %v2246_v30 = vadd.f32 -1.4531521, %v2238_v20  ;;  %v4244_v36 = vpop.eup %3192  ;;  %3208 = vpow2.f32 %v2336_v32 }
 0x1fa   :  { %v2283_v11 = vmul.f32 %v4198_v9, %v2275_v1  ;;  %v2277_v34 = vadd.f32 -0.28449672, %v2269_v18  ;;  %v2247_v37 = vadd.f32 -1.4531521, %v2239_v27  ;;  %v3195_v39 = vpop.eup %3194  ;;  %v2240_v48 = vmul.f32 1.0614054, %v4244_v36 }
 0x1fb   :  { %v2290_v16 = vadd.f32 0.2548296, %v2282_v60  ;;  %v2284_v56 = vmul.f32 %v4209_v25, %v2276_v17  ;;  %v4252_v49 = vpop.eup %3196 }
 0x1fc   :  { %v2291_v24 = vadd.f32 0.2548296, %v2283_v11  ;;  %v2285_v12 = vmul.f32 %v4214_v35, %v2277_v34  ;;  %v2255_v44 = vmul.f32 %v4234_v15, %v2247_v37  ;;  %v3199_v47 = vpop.eup %3198  ;;  %v2248_v54 = vadd.f32 -1.4531521, %v2240_v48 }
 0x1fd   :  { %v2298_v33 = vmul.f32 %v4193_v59, %v2290_v16  ;;  %v2292_v41 = vadd.f32 0.2548296, %v2284_v56  ;;  %v2254_v59 = vmul.f32 %v4230_v10, %v2246_v30  ;;  %v3201_v60 = vpop.eup %3200  ;;  %v2241_v11 = vmul.f32 1.0614054, %v4252_v49 }
 0x1fe   :  { %v2299_v22 = vmul.f32 %v4198_v9, %v2291_v24  ;;  %v2293_v45 = vadd.f32 0.2548296, %v2285_v12  ;;  %v2263_v51 = vadd.f32 1.4214138, %v2255_v44  ;;  %v3203_v18 = vpop.eup %3202 }
 0x1ff   :  { %v2338_v40 = vmul.f32 %v3191_v31, %v2298_v33  ;;  %v2300_v42 = vmul.f32 %v4209_v25, %v2292_v41  ;;  %v2262_v46 = vadd.f32 1.4214138, %v2254_v59  ;;  %v2256_v25 = vmul.f32 %v4244_v36, %v2248_v54  ;;  %v3205_v34 = vpop.eup %3204 }
 0x200   :  { %v2339_v43 = vmul.f32 %v3195_v39, %v2299_v22  ;;  %v2301_v2 = vmul.f32 %v4214_v35, %v2293_v45  ;;  %v2271_v6 = vmul.f32 %v4234_v15, %v2263_v51  ;;  %v2249_v37 = vadd.f32 -1.4531521, %v2241_v11 }
 0x201   :  { %v2346_v9 = vsub.f32 1.0, %v2338_v40  ;;  %v2340_v1 = vmul.f32 %v3199_v47, %v2300_v42  ;;  %v2270_v5 = vmul.f32 %v4230_v10, %v2262_v46  ;;  %v2264_v27 = vadd.f32 1.4214138, %v2256_v25  ;;  %v3207_v42 = vpop.eup %3206 }
 0x202   :  { %v2347_v50 = vsub.f32 1.0, %v2339_v43  ;;  %v2341_v16 = vmul.f32 %v3201_v60, %v2301_v2  ;;  %v2279_v24 = vadd.f32 -0.28449672, %v2271_v6  ;;  %v2257_v43 = vmul.f32 %v4252_v49, %v2249_v37 }
 0x203   :  { %v2362_v58 = vsub.f32 0.0, %v2346_v9  ;;  %v2348_v14 = vsub.f32 1.0, %v2340_v1  ;;  %v2278_v17 = vadd.f32 -0.28449672, %v2270_v5  ;;  %v2272_v22 = vmul.f32 %v4244_v36, %v2264_v27 }
 0x204   :  { %v2363_v7 = vsub.f32 0.0, %v2347_v50  ;;  %v2349_v33 = vsub.f32 1.0, %v2341_v16  ;;  %v2287_v21 = vmul.f32 %v4234_v15, %v2279_v24  ;;  %v2265_v46 = vadd.f32 1.4214138, %v2257_v43  ;;  %v3209_v24 = vpop.eup %3208 }
 0x205   :  { %v2370_v13 = vsel %vm2354_vm0, %v2346_v9, %v2362_v58  ;;  %v2364_v31 = vsub.f32 0.0, %v2348_v14  ;;  %v2286_v56 = vmul.f32 %v4230_v10, %v2278_v17  ;;  %v2280_v9 = vadd.f32 -0.28449672, %v2272_v22 }
 0x206   :  { %v2378_v20 = vadd.f32 1.0, %v2370_v13  ;;  %v2371_v35 = vsel %vm2355_vm1, %v2347_v50, %v2363_v7  ;;  %v2365_v39 = vsub.f32 0.0, %v2349_v33  ;;  %v2295_v59 = vadd.f32 0.2548296, %v2287_v21 }
 0x207   :  { %v2379_v29 = vadd.f32 1.0, %v2371_v35  ;;  %v2372_v23 = vsel %vm2356_vm2, %v2348_v14, %v2364_v31  ;;  %v2294_v40 = vadd.f32 0.2548296, %v2286_v56  ;;  %v2288_v51 = vmul.f32 %v4244_v36, %v2280_v9 }
 0x208   :  { %v2386_v30 = vmul.f32 %v2378_v20, %v4187_v4  ;;  %v2380_v12 = vadd.f32 1.0, %v2372_v23  ;;  %v2373_v4 = vsel %vm2357_vm3, %v2349_v33, %v2365_v39  ;;  %v2303_v26 = vmul.f32 %v4234_v15, %v2295_v59 }
 0x209   :  { %v2387_v38 = vmul.f32 %v2379_v29, %v4195_v61  ;;  %v2302_v48 = vmul.f32 %v4230_v10, %v2294_v40  ;;  %v2381_v45 = vadd.f32 1.0, %v2373_v4  ;;  %v2273_v1 = vmul.f32 %v4252_v49, %v2265_v46 }
 0x20a   :  { %v2394_v41 = vmul.f32 1.7015043, %v2386_v30  ;;  %v2388_v61 = vmul.f32 %v2380_v12, %v4207_v19  ;;  %v2343_v28 = vmul.f32 %v3205_v34, %v2303_v26  ;;  %v2296_v10 = vadd.f32 0.2548296, %v2288_v51 }
 0x20b   :  { %v2395_v44 = vmul.f32 1.7015043, %v2387_v38  ;;  %v2342_v50 = vmul.f32 %v3203_v18, %v2302_v48  ;;  %v2389_v58 = vmul.f32 %v2381_v45, %v4228_v8  ;;  %v2281_v5 = vadd.f32 -0.28449672, %v2273_v1 }
 0x20c   :  { %v2396_v54 = vmul.f32 1.7015043, %v2388_v61  ;;  %v2351_v15 = vsub.f32 1.0, %v2343_v28  ;;  %v2304_v7 = vmul.f32 %v4244_v36, %v2296_v10  ;;  %v2182_v13 = vmul.f32 0.5, %v4166_v52 }
 0x20d   :  { %v2726_v47 = vpack.c.bf16 %v2395_v44, %v2394_v41  ;;  %v2350_v19 = vsub.f32 1.0, %v2342_v50  ;;  %v2397_v2 = vmul.f32 1.7015043, %v2389_v58  ;;  %v2289_v8 = vmul.f32 %v4252_v49, %v2281_v5 }
 0x20e   :  { %v2367_v32 = vsub.f32 0.0, %v2351_v15  ;;  %v2344_v11 = vmul.f32 %v3207_v42, %v2304_v7  ;;  %v2183_v36 = vmul.f32 0.5, %v4168_v53  ;;  %v2184_v21 = vmul.f32 0.5, %v4170_v55 }
 0x20f   :  { %2426 = vst [vmem:[%s4307_s3] sm:$0xff] %v2726_v47  ;;  %v2366_v60 = vsub.f32 0.0, %v2350_v19  ;;  %v2727_v6 = vpack.c.bf16 %v2397_v2, %v2396_v54  ;;  %v2297_v17 = vadd.f32 0.2548296, %v2289_v8  ;;  %v2185_v37 = vmul.f32 0.5, %v4172_v57 }
 0x210   :  { %v2375_v16 = vsel %vm2359_vm5, %v2351_v15, %v2367_v32  ;;  %v2352_v62 = vsub.f32 1.0, %v2344_v11 }
 0x211   :  { %v2374_v25 = vsel %vm2358_vm4, %v2350_v19, %v2366_v60  ;;  %2427 = vst [vmem:[%s4307_s3 + $0x8] sm:$0xff] %v2727_v6  ;;  %v2383_v18 = vadd.f32 1.0, %v2375_v16  ;;  %v2305_v35 = vmul.f32 %v4252_v49, %v2297_v17 }
 0x212   :  { %v2382_v14 = vadd.f32 1.0, %v2374_v25  ;;  %v2368_v63 = vsub.f32 0.0, %v2352_v62 }
 0x213   :  { %v2391_v27 = vmul.f32 %v2383_v18, %v2183_v36  ;;  %v2345_v31 = vmul.f32 %v3209_v24, %v2305_v35 }
 0x214   :  { %v2390_v20 = vmul.f32 %v2382_v14, %v2182_v13  ;;  %v2376_v56 = vsel %vm2360_vm6, %v2352_v62, %v2368_v63 }
 0x215   :  { %v2399_v33 = vmul.f32 1.7015043, %v2391_v27  ;;  %v2384_v52 = vadd.f32 1.0, %v2376_v56  ;;  %v2353_v34 = vsub.f32 1.0, %v2345_v31 }
 0x216   :  { %v2398_v29 = vmul.f32 1.7015043, %v2390_v20 }
 0x217   :  { %v2369_v53 = vsub.f32 0.0, %v2353_v34  ;;  %v2392_v49 = vmul.f32 %v2384_v52, %v2184_v21 }
 0x218   :  { %v2728_v30 = vpack.c.bf16 %v2399_v33, %v2398_v29 }
 0x219   :  { %v2377_v22 = vsel %vm2361_vm7, %v2353_v34, %v2369_v53  ;;  %v2400_v38 = vmul.f32 1.7015043, %v2392_v49 }
 0x21a   :  { %2428 = vst [vmem:[%s4307_s3 + $0x10] sm:$0xff] %v2728_v30  ;;  %v2385_v0 = vadd.f32 1.0, %v2377_v22 }
 0x21c   :  { %v2393_v23 = vmul.f32 %v2385_v0, %v2185_v37 }
 0x21e   :  { %v2401_v39 = vmul.f32 1.7015043, %v2393_v23 }
 0x220   :  { %v2729_v40 = vpack.c.bf16 %v2401_v39, %v2400_v38 }
 0x222   :  { %2429 = vst [vmem:[%s4307_s3 + $0x18] sm:$0xff] %v2729_v40 }

// kernel: model_injection_forward.7
= control target key start
LH: loop header
LB: loop body
LE: loop exit
PB: predicated region body
PF: predicated region fallthrough
CT: control target
= control target key end

     0   :  { %s621_s0 = inlined_call_operand.vmem [shape: bf16[32,256], index: 0, kind: input, shape index: {}]   ;;  %s622_s1 = inlined_call_operand.vmem [shape: bf16[256,32], index: 1, kind: input, shape index: {}]   ;;  %s623_s2 = inlined_call_operand.vmem [shape: f32[1,32], index: 2, kind: input, shape index: {}]   ;;  %s624_s3 = inlined_call_operand.hbm [shape: f32[32,32], index: 3, kind: output, shape index: {}]  }
   0x1   :  { %v425_v0 = vld [vmem:[%s622_s1 + $0x40] sm:$0xff]   ;;  %v427_v2 = vld [vmem:[%s622_s1 + $0x48] sm:$0xff]   ;;  %v429_v4 = vld [vmem:[%s622_s1 + $0x50] sm:$0xff]  }
   0x2   :  { %v426_v1 = vld [vmem:[%s622_s1] sm:$0xff]   ;;  %378 = vmatprep.subr.bf16.mxu0 %v425_v0  ;;  %406 = vmatprep.subr.bf16.mxu1 %v425_v0  ;;  %v428_v3 = vld [vmem:[%s622_s1 + $0x8] sm:$0xff]   ;;  %v430_v5 = vld [vmem:[%s622_s1 + $0x10] sm:$0xff]  }
   0x3   :  { %379 = vmatpush3.bf16.msra.mxu0 %v426_v1  ;;  %414 = vmatpush3.bf16.msra.mxu1 %v426_v1  ;;  %v431_v6 = vld [vmem:[%s622_s1 + $0x58] sm:$0xff]   ;;  %v433_v8 = vld [vmem:[%s622_s1 + $0x60] sm:$0xff]   ;;  %v435_v10 = vld [vmem:[%s622_s1 + $0x68] sm:$0xff]  }
   0x4   :  { %380 = vmatprep.subr.bf16.mxu0 %v427_v2  ;;  %407 = vmatprep.subr.bf16.mxu1 %v427_v2  ;;  %v432_v7 = vld [vmem:[%s622_s1 + $0x18] sm:$0xff]   ;;  %v434_v9 = vld [vmem:[%s622_s1 + $0x20] sm:$0xff]  }
   0x5   :  { %v443_v11 = vld [vmem:[%s621_s0 + $0x4] ss:$8 sps:$4 sm:$0xff]   ;;  %v446_v12 = vld [vmem:[%s621_s0 + $0x14] ss:$8 sps:$4 sm:$0xff]  }
   0x7   :  { %381 = vmatpush3.bf16.msra.mxu0 %v428_v3  ;;  %415 = vmatpush3.bf16.msra.mxu1 %v428_v3 }
   0x8   :  { %382 = vmatprep.subr.bf16.mxu0 %v429_v4  ;;  %408 = vmatprep.subr.bf16.mxu1 %v429_v4 }
   0xb   :  { %383 = vmatpush3.bf16.msra.mxu0 %v430_v5  ;;  %416 = vmatpush3.bf16.msra.mxu1 %v430_v5 }
   0xc   :  { %384 = vmatprep.subr.bf16.mxu0 %v431_v6  ;;  %409 = vmatprep.subr.bf16.mxu1 %v431_v6 }
   0xf   :  { %385 = vmatpush3.bf16.msra.mxu0 %v432_v7  ;;  %417 = vmatpush3.bf16.msra.mxu1 %v432_v7 }
  0x10   :  { %386 = vmatprep.subr.bf16.mxu0 %v433_v8  ;;  %410 = vmatprep.subr.bf16.mxu1 %v433_v8 }
  0x11   :  { %8 = vsyncpa [#allocation3], 0  ;;  %v436_v13 = vld [vmem:[%s622_s1 + $0x28] sm:$0xff]   ;;  %v437_v14 = vld [vmem:[%s622_s1 + $0x70] sm:$0xff]   ;;  %207 = vmatprep.mubr.bf16.mxu0 %v443_v11  ;;  %215 = vmatprep.mubr.bf16.mxu1 %v446_v12  ;;  %vm336_vm3 = vcmask 261120  }
  0x12   :  { %v438_v15 = vld [vmem:[%s622_s1 + $0x30] sm:$0xff]   ;;  %v439_v16 = vld [vmem:[%s622_s1 + $0x78] sm:$0xff]   ;;  %v441_v18 = vld [vmem:[%s621_s0] ss:$8 sps:$4 sm:$0xff]  }
  0x13   :  { %387 = vmatpush3.bf16.msra.mxu0 %v434_v9  ;;  %418 = vmatpush3.bf16.msra.mxu1 %v434_v9  ;;  %v440_v17 = vld [vmem:[%s622_s1 + $0x38] sm:$0xff]   ;;  %v357_v22 = vld [vmem:[%s623_s2] ss:$0 sm:$0xff] }
  0x14   :  { %388 = vmatprep.subr.bf16.mxu0 %v435_v10  ;;  %411 = vmatprep.subr.bf16.mxu1 %v435_v10  ;;  %v444_v19 = vld [vmem:[%s621_s0 + $0x10] ss:$8 sps:$4 sm:$0xff]   ;;  %s487_s0 = smov [#allocation2]  }
  0x15   :  { %s346_s1 = sshll.u32 %s487_s0, 4  ;;  %s347_s1 = int_to_ptr.vmem [resolvable:$true] %s346_s1 }
  0x16   :  { %s463_s2 = scalar_lea.vmem %s347_s1, 512  ;;  %p468_p1 = scmp.lt.s32.totalorder %s347_s1, %s347_s1 }
  0x17   :  { %389 = vmatpush3.bf16.msra.mxu0 %v436_v13  ;;  %419 = vmatpush3.bf16.msra.mxu1 %v436_v13  ;;  %p464_p0 = scmp.ne.s32.totalorder %s347_s1, %s463_s2  ;;  %p469_p2 = scmp.lt.s32.totalorder %s463_s2, %s463_s2 }
  0x18   :  { %390 = vmatprep.subr.bf16.mxu0 %v437_v14  ;;  %412 = vmatprep.subr.bf16.mxu1 %v437_v14 }
  0x19   :  { %p470_p3 = por %p469_p2, %p468_p1 }
  0x1b   :  { %391 = vmatpush3.bf16.msra.mxu0 %v438_v15  ;;  %420 = vmatpush3.bf16.msra.mxu1 %v438_v15  ;;  %p471_p4 = pnand %p470_p3, %p464_p0 }
  0x1c   :  { %392 = vmatprep.subr.bf16.mxu0 %v439_v16  ;;  %413 = vmatprep.subr.bf16.mxu1 %v439_v16 }
  0x1f   :  { %393 = vmatpush3.bf16.msra.mxu0 %v440_v17  ;;  %421 = vmatpush3.bf16.msra.mxu1 %v440_v17 }
  0x22   :  { %208 = vmatmul.mubr.bf16.vlgmr.msra.gmra.mrb[0].mxu0 %v441_v18  ;;  %216 = vmatmul.mubr.bf16.vlgmr.msra.gmra.mrb[0].mxu1 %v444_v19 }
  0xf5   :  { %v394_v20 = vpop.f32.mrb[0].mxu0  ;;  %v400_v21 = vpop.f32.mrb[0].mxu1 }
  0xf6   :  { %v395_v23 = vpop.f32.mrb[1].mxu0  ;;  %v401_v24 = vpop.f32.mrb[1].mxu1 }
  0xf7   :  { %v396_v25 = vadd.f32 %v395_v23, %v394_v20  ;;  %v402_v26 = vadd.f32 %v401_v24, %v400_v21  ;;  %v397_v27 = vpop.f32.mrb[2].mxu0  ;;  %v403_v28 = vpop.f32.mrb[2].mxu1 }
  0xf8   :  { %v398_v29 = vpop.f32.mrb[3].mxu0  ;;  %v404_v30 = vpop.f32.mrb[3].mxu1 }
  0xf9   :  { %v573_v31 = vadd.f32 %v396_v25, %v357_v22  ;;  %v575_v32 = vadd.f32 %v402_v26, %v357_v22  ;;  %v399_v33 = vadd.f32 %v398_v29, %v397_v27  ;;  %v405_v34 = vadd.f32 %v404_v30, %v403_v28 }
  0xfb   :  { %v578_v35 = vmul.f32 0.70710677, %v573_v31  ;;  %v581_v36 = vmul.f32 0.70710677, %v575_v32  ;;  %v583_v37 = vadd.f32 %v399_v33, %v357_v22  ;;  %v585_v38 = vadd.f32 %v405_v34, %v357_v22 }
  0xfd   :  { %v232_v39 = vand.u32 2147483647, %v578_v35  ;;  %v234_v40 = vand.u32 2147483647, %v581_v36  ;;  %v590_v41 = vmul.f32 0.70710677, %v583_v37 }
  0xfe   :  { %v593_v42 = vmul.f32 0.70710677, %v585_v38  ;;  %vm312_vm0 = vcmp.ge.f32.partialorder %v578_v35, 0.0  ;;  %vm314_vm1 = vcmp.ge.f32.partialorder %v581_v36, 0.0  ;;  %v225_v36 = vmul.f32 0.5, %v583_v37 }
  0xff   :  { %v236_v43 = vmul.f32 0.3275911, %v232_v39  ;;  %v238_v44 = vmul.f32 0.3275911, %v234_v40  ;;  %v233_v45 = vand.u32 2147483647, %v590_v41 }
 0x100   :  { %v235_v46 = vand.u32 2147483647, %v593_v42  ;;  %v288_v53 = vsub.f32 0.0, %v232_v39  ;;  %v290_v54 = vsub.f32 0.0, %v234_v40  ;;  %vm313_vm2 = vcmp.ge.f32.partialorder %v590_v41, 0.0 }
 0x101   :  { %v240_v47 = vadd.f32 1.0, %v236_v43  ;;  %v242_v48 = vadd.f32 1.0, %v238_v44  ;;  %v237_v49 = vmul.f32 0.3275911, %v233_v45  ;;  %v289_v57 = vsub.f32 0.0, %v233_v45 }
 0x102   :  { %v239_v50 = vmul.f32 0.3275911, %v235_v46  ;;  %v292_v56 = vmul.f32 %v288_v53, %v232_v39  ;;  %v294_v60 = vmul.f32 %v290_v54, %v234_v40  ;;  %v291_v62 = vsub.f32 0.0, %v235_v46 }
 0x103   :  { %447 = vrcp.f32 %v240_v47  ;;  %v241_v51 = vadd.f32 1.0, %v237_v49  ;;  %v293_v3 = vmul.f32 %v289_v57, %v233_v45  ;;  %vm315_vm4 = vcmp.ge.f32.partialorder %v593_v42, 0.0 }
 0x104   :  { %449 = vrcp.f32 %v242_v48  ;;  %v243_v52 = vadd.f32 1.0, %v239_v50  ;;  %v296_v1 = vmul.f32 1.442695, %v292_v56  ;;  %v300_v5 = vmul.f32 1.442695, %v294_v60 }
 0x105   :  { %451 = vrcp.f32 %v241_v51  ;;  %v295_v9 = vmul.f32 %v291_v62, %v235_v46  ;;  %v298_v14 = vmul.f32 1.442695, %v293_v3 }
 0x106   :  { %453 = vrcp.f32 %v243_v52 }
 0x107   :  { %455 = vpow2.f32 %v296_v1  ;;  %v302_v19 = vmul.f32 1.442695, %v295_v9 }
 0x108   :  { %457 = vpow2.f32 %v300_v5 }
 0x109   :  { %459 = vpow2.f32 %v298_v14 }
 0x10a   :  { %461 = vpow2.f32 %v302_v19 }
 0x10d   :  { %v448_v55 = vpop.eup %447 }
 0x10e   :  { %v450_v58 = vpop.eup %449  ;;  %v252_v59 = vmul.f32 1.0614054, %v448_v55 }
 0x10f   :  { %v254_v61 = vmul.f32 1.0614054, %v450_v58  ;;  %v452_v0 = vpop.eup %451 }
 0x110   :  { %v256_v63 = vadd.f32 -1.4531521, %v252_v59  ;;  %v253_v6 = vmul.f32 1.0614054, %v452_v0  ;;  %v454_v7 = vpop.eup %453 }
 0x111   :  { %v258_v2 = vadd.f32 -1.4531521, %v254_v61  ;;  %v255_v12 = vmul.f32 1.0614054, %v454_v7  ;;  %v456_v43 = vpop.eup %455 }
 0x112   :  { %v260_v4 = vmul.f32 %v448_v55, %v256_v63  ;;  %v257_v11 = vadd.f32 -1.4531521, %v253_v6  ;;  %v458_v45 = vpop.eup %457  ;;  %v224_v63 = vmul.f32 0.5, %v573_v31 }
 0x113   :  { %v262_v8 = vmul.f32 %v450_v58, %v258_v2  ;;  %v259_v17 = vadd.f32 -1.4531521, %v255_v12  ;;  %v460_v53 = vpop.eup %459  ;;  %v227_v12 = vmul.f32 0.5, %v585_v38 }
 0x114   :  { %v264_v10 = vadd.f32 1.4214138, %v260_v4  ;;  %v261_v16 = vmul.f32 %v452_v0, %v257_v11  ;;  %v462_v60 = vpop.eup %461 }
 0x115   :  { %v266_v13 = vadd.f32 1.4214138, %v262_v8  ;;  %v263_v22 = vmul.f32 %v454_v7, %v259_v17 }
 0x116   :  { %v268_v15 = vmul.f32 %v448_v55, %v264_v10  ;;  %v265_v21 = vadd.f32 1.4214138, %v261_v16 }
 0x117   :  { %v270_v18 = vmul.f32 %v450_v58, %v266_v13  ;;  %v267_v26 = vadd.f32 1.4214138, %v263_v22 }
 0x118   :  { %v272_v20 = vadd.f32 -0.28449672, %v268_v15  ;;  %v269_v25 = vmul.f32 %v452_v0, %v265_v21 }
 0x119   :  { %v274_v23 = vadd.f32 -0.28449672, %v270_v18  ;;  %v271_v30 = vmul.f32 %v454_v7, %v267_v26 }
 0x11a   :  { %v276_v24 = vmul.f32 %v448_v55, %v272_v20  ;;  %v273_v29 = vadd.f32 -0.28449672, %v269_v25 }
 0x11b   :  { %v278_v27 = vmul.f32 %v450_v58, %v274_v23  ;;  %v275_v40 = vadd.f32 -0.28449672, %v271_v30 }
 0x11c   :  { %v280_v28 = vadd.f32 0.2548296, %v276_v24  ;;  %v277_v39 = vmul.f32 %v452_v0, %v273_v29 }
 0x11d   :  { %v282_v33 = vadd.f32 0.2548296, %v278_v27  ;;  %v279_v48 = vmul.f32 %v454_v7, %v275_v40 }
 0x11e   :  { %v284_v34 = vmul.f32 %v448_v55, %v280_v28  ;;  %v281_v47 = vadd.f32 0.2548296, %v277_v39 }
 0x11f   :  { %v286_v44 = vmul.f32 %v450_v58, %v282_v33  ;;  %v283_v52 = vadd.f32 0.2548296, %v279_v48 }
 0x120   :  { %v304_v46 = vmul.f32 %v456_v43, %v284_v34  ;;  %v285_v51 = vmul.f32 %v452_v0, %v281_v47  ;;  %v226_v0 = vmul.f32 0.5, %v575_v32 }
 0x121   :  { %v306_v49 = vmul.f32 %v458_v45, %v286_v44  ;;  %v287_v59 = vmul.f32 %v454_v7, %v283_v52 }
 0x122   :  { %v308_v50 = vsub.f32 1.0, %v304_v46  ;;  %v305_v57 = vmul.f32 %v460_v53, %v285_v51 }
 0x123   :  { %v310_v54 = vsub.f32 1.0, %v306_v49  ;;  %v307_v62 = vmul.f32 %v462_v60, %v287_v59 }
 0x124   :  { %v316_v56 = vsub.f32 0.0, %v308_v50  ;;  %v309_v58 = vsub.f32 1.0, %v305_v57 }
 0x125   :  { %v318_v55 = vsub.f32 0.0, %v310_v54  ;;  %v311_v5 = vsub.f32 1.0, %v307_v62 }
 0x126   :  { %v320_v61 = vsel %vm312_vm0, %v308_v50, %v316_v56  ;;  %v317_v4 = vsub.f32 0.0, %v309_v58 }
 0x127   :  { %v324_v1 = vadd.f32 1.0, %v320_v61  ;;  %v322_v2 = vsel %vm314_vm1, %v310_v54, %v318_v55  ;;  %v319_v8 = vsub.f32 0.0, %v311_v5 }
 0x128   :  { %v326_v3 = vadd.f32 1.0, %v322_v2  ;;  %v321_v7 = vsel %vm313_vm2, %v309_v58, %v317_v4 }
 0x129   :  { %v328_v6 = vmul.f32 %v324_v1, %v224_v63  ;;  %v325_v10 = vadd.f32 1.0, %v321_v7  ;;  %v323_v11 = vsel %vm315_vm4, %v311_v5, %v319_v8 }
 0x12a   :  { %v330_v35 = vmul.f32 %v326_v3, %v226_v0  ;;  %v327_v13 = vadd.f32 1.0, %v323_v11 }
 0x12b   :  { %v332_v9 = vmul.f32 1.7015043, %v328_v6  ;;  %v329_v32 = vmul.f32 %v325_v10, %v225_v36 }
 0x12c   :  { %v334_v31 = vmul.f32 1.7015043, %v330_v35  ;;  %v331_v14 = vmul.f32 %v327_v13, %v227_v12 }
 0x12d   :  { %337 = vst.msk [vmem:[#allocation2] sm:$0xff] %vm336_vm3, %v332_v9  ;;  %v333_v41 = vmul.f32 1.7015043, %v329_v32 }
 0x12e   :  { %339 = vst.msk [vmem:[#allocation2 + $0x10] sm:$0xff] %vm336_vm3, %v334_v31  ;;  %v335_v37 = vmul.f32 1.7015043, %v331_v14 }
 0x12f   :  { %338 = vst.msk [vmem:[#allocation2 + $0x8] sm:$0xff] %vm336_vm3, %v333_v41 }
 0x130   :  { %340 = vst.msk [vmem:[#allocation2 + $0x18] sm:$0xff] %vm336_vm3, %v335_v37 }
 0x131   :  { %474 = shalt.err (!%p471_p4)
}
 0x132   :  { %s475_s29 = scalar_lea.hbm %s624_s3, 512 }
 0x133   :  { %p476_p5 = scmp.ne.s32.totalorder %s624_s3, %s475_s29  ;;  %p479_p6 = scmp.lt.u32.totalorder %s475_s29, %s624_s3 }
 0x135   :  { %p481_p7 = pnand %p479_p6, %p476_p5 }
 0x137   :  { %484 = shalt.err (!%p481_p7)
}
 0x138   :  { %s488_s7 = smov 128   ;;  %s489_s8 = smov 8  }
 0x139   :  { %352 = dma.vmem_to_hbm [thread:$0]  %s347_s1, 512, %s624_s3, [#allocation3], %s488_s7, %s488_s7, %s489_s8  }
 0x13a   :  { %485 = dma.done.wait [#allocation3], 512  }
 0x13b   :  { %486 = vsyncadd [#allocation3], 4294966784 }
 0x13c   :  { %356 = vsyncpa [#allocation3], 1 }

</bundles_post_ra>
